<compile_context>
chip_gen: v7x
topology: tpu7x:2x2x1
jax: 0.10.0
libtpu: 0.0.40
codegen_flags: <defaults>
</compile_context>

<pallas_src>
import functools

import numpy as np
import jax
import jax.numpy as jnp
from jax.experimental import pallas as pl
from jax.experimental.pallas import tpu as pltpu

# ----------------------------- model config ---------------------------------
RESIDUAL_CHANNELS = 32
SKIP_CHANNELS = 32
NUM_CLASSES = 32
NUM_LAYERS = 4          # dilations 1,2,4,8
NUM_STACKS = 2
KERNEL_SIZE = 2
RECEPTIVE_FIELD = 1024  # fixed by the PyTorch module's `receptive_field` property
BN_EPS = 1e-5
T_TILE = 128            # one lane tile of time; must stay >= causal receptive field
SLOTS = 128             # lane width of the per-batch-element tail slab (lane-dense)
MAX_BATCH_FOLD = 8      # at most 8 waveforms folded into lanes per grid step

DILATIONS = tuple(2 ** i for _ in range(NUM_STACKS) for i in range(NUM_LAYERS))
CAUSAL_RF = 1 + sum(DILATIONS)   # 31 for this config


# ------------------------------- kernel -------------------------------------
def wavenet_kernel(wav_ref, lat_ref, start_w_ref, start_b_ref,
                   wdil_ref, bdil_ref, wrs_ref, brs_ref,
                   end1_w_ref, end1_b_ref, end2_w_ref, end2_b_ref,
                   out_ref, *, dilations, R, S):
    wav = wav_ref[0]                      # (1, N): batch_fold segments of 128 samples
    n = wav.shape[-1]

    # Hoisted per-segment time index (broadcasts are not CSE'd inside the loop).
    lane_t = jax.lax.broadcasted_iota(jnp.int32, (R, n), 1) & (T_TILE - 1)

    def shift_right(a, d):
        # a'[:, t] = a[:, t - d] within each 128-lane batch segment, 0 for t < d.
        # Zeros only corrupt columns t < sum(dilations) < 128 of a segment,
        # never the segment's last column, which is the only one emitted.
        if d == 0:
            return a
        rolled = pltpu.roll(a, shift=d, axis=1)
        return jnp.where(lane_t >= d, rolled, 0.0)

    # start_conv: CausalConv1d(1, R, k=2). Per-channel scale commutes with the
    # time shift, so scale first (broadcast to (R, N)) and shift once.
    sw = start_w_ref[...]                                     # (R, 2): col k = tap k
    x = (shift_right(sw[:, 0:1] * wav, 1)                     # tap at t-1
         + sw[:, 1:2] * wav                                   # tap at t
         + start_b_ref[...])                                  # (R, N)

    skip_acc = jnp.zeros((S, n), jnp.float32)

    # Unrolled layer stack (static dilations; fused taps, fused res+skip).
    for l, d in enumerate(dilations):
        xx = jnp.concatenate([shift_right(x, d), x], axis=0)  # (2R, N)
        dout = (jnp.dot(wdil_ref[l], xx, preferred_element_type=jnp.float32)
                + bdil_ref[l])                                # (R, N)
        # sigmoid(z) = 0.5 * (tanh(z/2) + 1) -> gate costs 2 EUP ops/element.
        gated = jnp.tanh(dout) * (0.5 * (jnp.tanh(0.5 * dout) + 1.0))
        rs = (jnp.dot(wrs_ref[l], gated, preferred_element_type=jnp.float32)
              + brs_ref[l])                                   # (R+S, N)
        x = x + rs[:R]
        skip_acc = skip_acc + rs[R:R + S]

    # Tail trim: only the last time column of each 128-lane batch segment feeds
    # the output.  Gather those columns with a one-hot MXU matmul (no XLU
    # transpose, no full-width tail FLOPs); slot b <- lane b*128 + 127.
    n_idx = jax.lax.broadcasted_iota(jnp.int32, (n, SLOTS), 0)
    s_idx = jax.lax.broadcasted_iota(jnp.int32, (n, SLOTS), 1)
    sel = (n_idx == s_idx * T_TILE + (T_TILE - 1)).astype(jnp.float32)
    h_last = jnp.dot(skip_acc, sel, preferred_element_type=jnp.float32)  # (S, SLOTS)

    # relu(sum(skips)) + latent, then BN1/conv1/relu/BN2/conv2 with the
    # eval-mode BatchNorms folded into the conv weights host-side.
    h = jnp.maximum(h_last, 0.0) + lat_ref[0]                 # (S, SLOTS)
    v = jnp.maximum(
        jnp.dot(end1_w_ref[...], h, preferred_element_type=jnp.float32)
        + end1_b_ref[...], 0.0)                               # (S, SLOTS)
    logits = (jnp.dot(end2_w_ref[...], v, preferred_element_type=jnp.float32)
              + end2_b_ref[...])                              # (C, SLOTS)

    out_ref[...] = logits[None]                               # (1, C, SLOTS) lane-dense


# ------------------------- one-time parameter packing ------------------------
def prepack_params(params):
    """Host-side packing / folding, hoisted out of the per-call forward."""
    wdil = jnp.concatenate([params["wdil0"], params["wdil1"]], axis=-1)   # (L, R, 2R)
    wrs = jnp.concatenate([params["wres"], params["wskip"]], axis=1)      # (L, R+S, R)
    brs = jnp.concatenate([params["bres"], params["bskip"]], axis=1)      # (L, R+S, 1)

    def fold_bn(bn, w, b):   # y = conv(bn(x)) folded into conv
        gamma, beta, mean, var = bn[:, 0], bn[:, 1], bn[:, 2], bn[:, 3]
        scale = gamma * jax.lax.rsqrt(var + BN_EPS)
        w_f = w * scale[None, :]
        b_f = b + w @ ((beta - mean * scale)[:, None])
        return w_f, b_f

    end1_w, end1_b = fold_bn(params["bn1"], params["end1_w"], params["end1_b"])
    end2_w, end2_b = fold_bn(params["bn2"], params["end2_w"], params["end2_b"])
    return dict(
        start_w=params["start_w"], start_b=params["start_b"],
        wdil=wdil, bdil=params["bdil"], wrs=wrs, brs=brs,
        end1_w=end1_w, end1_b=end1_b, end2_w=end2_w, end2_b=end2_b,
        # Only the last embedding column can reach the emitted logit (the model
        # keeps out[:, :, -1] and the latent add is pointwise in time).
        emb_last=params["embedding"][:, -1],                  # (num_embeddings,)
    )


# ------------------------------ forward wrapper ------------------------------
def wavenet_forward(lbl_idx, wav_in, packed, batch_fold=None):
    """Returns (B, num_classes) logits at the last time step."""
    B, _, T = wav_in.shape
    R, S, C = RESIDUAL_CHANNELS, SKIP_CHANNELS, NUM_CLASSES
    assert T == RECEPTIVE_FIELD, "latent add requires T == receptive_field"
    assert CAUSAL_RF <= T_TILE, "last-tile trim requires receptive field <= 128"

    # Fold several batch elements into the lane axis of every matmul.
    # On v7x, pass batch_fold=B//2 so two "parallel" grid steps occupy both
    # TensorCores; on v5e/v6e a single wide step is best.
    if batch_fold is None:
        batch_fold = max(1, min(B, MAX_BATCH_FOLD))
    assert batch_fold <= SLOTS
    groups = (B + batch_fold - 1) // batch_fold
    b_pad = groups * batch_fold
    n_lanes = batch_fold * T_TILE

    # Last 128 time samples of each waveform, laid side-by-side along lanes.
    wav_last = wav_in[:, 0, T - T_TILE:]                      # (B, 128)
    wav_last = jnp.pad(wav_last, ((0, b_pad - B), (0, 0)))
    wav_fold = wav_last.reshape(groups, 1, n_lanes)           # (G, 1, N)

    # Per-element latent value at the emitted time step, in slot layout.
    lat = packed["emb_last"][lbl_idx]                         # (B,)
    lat = jnp.pad(lat, (0, b_pad - B)).reshape(groups, batch_fold)
    lat = jnp.pad(lat, ((0, 0), (0, SLOTS - batch_fold)))[:, None, :]   # (G, 1, SLOTS)

    weight_args = (packed["start_w"], packed["start_b"], packed["wdil"],
                   packed["bdil"], packed["wrs"], packed["brs"],
                   packed["end1_w"], packed["end1_b"],
                   packed["end2_w"], packed["end2_b"])

    def full_spec(shape):
        n = len(shape)
        return pl.BlockSpec(shape, lambda g, _n=n: (0,) * _n)

    kernel = functools.partial(wavenet_kernel, dilations=DILATIONS, R=R, S=S)

    grid_spec = pltpu.PrefetchScalarGridSpec(
        num_scalar_prefetch=0,
        grid=(groups,),
        in_specs=[
            pl.BlockSpec((1, 1, n_lanes), lambda g: (g, 0, 0)),   # folded waveforms
            pl.BlockSpec((1, 1, SLOTS), lambda g: (g, 0, 0)),     # latent slots
        ] + [full_spec(w.shape) for w in weight_args],
        out_specs=pl.BlockSpec((1, C, SLOTS), lambda g: (g, 0, 0)),
    )

    out = pl.pallas_call(
        kernel,
        out_shape=jax.ShapeDtypeStruct((groups, C, SLOTS), jnp.float32),
        grid_spec=grid_spec,
        compiler_params=pltpu.CompilerParams(dimension_semantics=("parallel",)),
    )(wav_fold, lat, *weight_args)

    logits = jnp.swapaxes(out[:, :, :batch_fold], 1, 2)       # (G, batch_fold, C)
    return logits.reshape(b_pad, C)[:B]                       # (B, num_classes)


# ------------------------- deterministic params -------------------------------
def init_params(key):
    R, S, C = RESIDUAL_CHANNELS, SKIP_CHANNELS, NUM_CLASSES
    L = NUM_STACKS * NUM_LAYERS
    keys = jax.random.split(key, 16)

    def u(k, shape, fan_in):
        bound = 1.0 / np.sqrt(fan_in)
        return jax.random.uniform(k, shape, jnp.float32, -bound, bound)

    def bn_params(k):
        kg, kb, km, kv = jax.random.split(k, 4)
        gamma = jax.random.uniform(kg, (S, 1), jnp.float32, 0.5, 1.5)
        beta = jax.random.uniform(kb, (S, 1), jnp.float32, -0.5, 0.5)
        mean = jax.random.uniform(km, (S, 1), jnp.float32, -0.5, 0.5)
        var = jax.random.uniform(kv, (S, 1), jnp.float32, 0.5, 1.5)
        return jnp.concatenate([gamma, beta, mean, var], axis=1)  # (S, 4)

    return dict(
        start_w=u(keys[0], (R, 2), 1 * KERNEL_SIZE),          # col k = tap k
        start_b=u(keys[1], (R, 1), 1 * KERNEL_SIZE),
        wdil0=u(keys[2], (L, R, R), R * KERNEL_SIZE),         # dilated tap at t-d
        wdil1=u(keys[3], (L, R, R), R * KERNEL_SIZE),         # dilated tap at t
        bdil=u(keys[4], (L, R, 1), R * KERNEL_SIZE),
        wres=u(keys[5], (L, R, R), R),
        bres=u(keys[6], (L, R, 1), R),
        wskip=u(keys[7], (L, S, R), R),
        bskip=u(keys[8], (L, S, 1), R),
        end1_w=u(keys[9], (S, S), S),
        end1_b=u(keys[10], (S, 1), S),
        end2_w=u(keys[11], (C, S), S),
        end2_b=u(keys[12], (C, 1), S),
        bn1=bn_params(keys[13]),                              # gamma,beta,mean,var
        bn2=bn_params(keys[14]),
        embedding=jax.random.normal(keys[15], (2, RECEPTIVE_FIELD), jnp.float32),
    )


# --------------------------- pure-JAX reference -------------------------------
def reference_forward(lbl_idx, wav_in, p):
    HI = jax.lax.Precision.HIGHEST
    T = wav_in.shape[-1]

    def conv1x1(x, w, b):                                     # x (B, Cin, T)
        return jnp.einsum("oi,bit->bot", w, x, precision=HI) + b[None]

    def causal2(x, w0, w1, b, d):                             # kernel_size=2 causal conv
        xs = jnp.pad(x, ((0, 0), (0, 0), (d, 0)))[:, :, :T]
        return (jnp.einsum("oi,bit->bot", w0, xs, precision=HI)
                + jnp.einsum("oi,bit->bot", w1, x, precision=HI) + b[None])

    x = causal2(wav_in, p["start_w"][:, 0:1], p["start_w"][:, 1:2], p["start_b"], 1)
    skip_sum = jnp.zeros((wav_in.shape[0], SKIP_CHANNELS, T), jnp.float32)
    for l, d in enumerate(DILATIONS):
        dout = causal2(x, p["wdil0"][l], p["wdil1"][l], p["bdil"][l], d)
        gated = jnp.tanh(dout) * jax.nn.sigmoid(dout)
        x = x + conv1x1(gated, p["wres"][l], p["bres"][l])
        skip_sum = skip_sum + conv1x1(gated, p["wskip"][l], p["bskip"][l])

    out = jax.nn.relu(skip_sum) + p["embedding"][lbl_idx][:, None, :]

    def bn(x, pbn):
        g, b, m, v = pbn[:, 0], pbn[:, 1], pbn[:, 2], pbn[:, 3]
        return ((x - m[None, :, None]) * jax.lax.rsqrt(v + BN_EPS)[None, :, None]
                * g[None, :, None] + b[None, :, None])

    out = bn(out, p["bn1"])
    out = conv1x1(out, p["end1_w"], p["end1_b"])
    out = jax.nn.relu(out)
    out = bn(out, p["bn2"])
    out = conv1x1(out, p["end2_w"], p["end2_b"])
    return out[:, :, -1]


# --------------------------------- main ---------------------------------------
if __name__ == "__main__":
    key = jax.random.PRNGKey(0)
    pkey, wkey = jax.random.split(key)
    params = init_params(pkey)
    packed = prepack_params(params)   # one-time host-side packing (hoisted)

    B = 2
    wav_in = jax.random.normal(wkey, (B, 1, RECEPTIVE_FIELD), jnp.float32)
    lbl_idx = jnp.array([0, 1], dtype=jnp.int32)

    out = jax.block_until_ready(wavenet_forward(lbl_idx, wav_in, packed))
    ref = jax.block_until_ready(reference_forward(lbl_idx, wav_in, params))

    if not np.allclose(np.asarray(out), np.asarray(ref), rtol=2e-3, atol=2e-3):
        max_err = float(np.max(np.abs(np.asarray(out) - np.asarray(ref))))
        raise AssertionError(f"Pallas kernel mismatch vs JAX reference, max abs err={max_err}")

    print("KERNEL_OK")
</pallas_src>

<mosaic_0001>
module attributes {stable_mosaic.version = 11 : i64} {
  func.func @wavenet_kernel(%arg0: i32, %arg1: memref<1x1x256xf32, #tpu.memory_space<vmem>>, %arg2: memref<1x1x128xf32, #tpu.memory_space<vmem>>, %arg3: memref<32x2xf32, #tpu.memory_space<vmem>>, %arg4: memref<32x1xf32, #tpu.memory_space<vmem>>, %arg5: memref<8x32x64xf32, #tpu.memory_space<vmem>>, %arg6: memref<8x32x1xf32, #tpu.memory_space<vmem>>, %arg7: memref<8x64x32xf32, #tpu.memory_space<vmem>>, %arg8: memref<8x64x1xf32, #tpu.memory_space<vmem>>, %arg9: memref<32x32xf32, #tpu.memory_space<vmem>>, %arg10: memref<32x1xf32, #tpu.memory_space<vmem>>, %arg11: memref<32x32xf32, #tpu.memory_space<vmem>>, %arg12: memref<32x1xf32, #tpu.memory_space<vmem>>, %arg13: memref<1x32x128xf32, #tpu.memory_space<vmem>>) attributes {dimension_semantics = [#tpu.dimension_semantics<parallel>], iteration_bounds = array<i64: 1>, scalar_prefetch = 0 : i64, scratch_operands = 0 : i64, tpu.core_type = #tpu.core_type<tc>, window_params = [{transform_indices = @transform_0, window_bounds = array<i64: 1, 1, 256>}, {transform_indices = @transform_1, window_bounds = array<i64: 1, 1, 128>}, {pipeline_mode = #tpu.pipeline_mode<synchronous>, transform_indices = @transform_2, window_bounds = array<i64: 32, 2>}, {pipeline_mode = #tpu.pipeline_mode<synchronous>, transform_indices = @transform_3, window_bounds = array<i64: 32, 1>}, {pipeline_mode = #tpu.pipeline_mode<synchronous>, transform_indices = @transform_4, window_bounds = array<i64: 8, 32, 64>}, {pipeline_mode = #tpu.pipeline_mode<synchronous>, transform_indices = @transform_5, window_bounds = array<i64: 8, 32, 1>}, {pipeline_mode = #tpu.pipeline_mode<synchronous>, transform_indices = @transform_6, window_bounds = array<i64: 8, 64, 32>}, {pipeline_mode = #tpu.pipeline_mode<synchronous>, transform_indices = @transform_7, window_bounds = array<i64: 8, 64, 1>}, {pipeline_mode = #tpu.pipeline_mode<synchronous>, transform_indices = @transform_8, window_bounds = array<i64: 32, 32>}, {pipeline_mode = #tpu.pipeline_mode<synchronous>, transform_indices = @transform_9, window_bounds = array<i64: 32, 1>}, {pipeline_mode = #tpu.pipeline_mode<synchronous>, transform_indices = @transform_10, window_bounds = array<i64: 32, 32>}, {pipeline_mode = #tpu.pipeline_mode<synchronous>, transform_indices = @transform_11, window_bounds = array<i64: 32, 1>}, {transform_indices = @transform_12, window_bounds = array<i64: 1, 32, 128>}]} {
    %c0 = arith.constant 0 : index
    %c0_0 = arith.constant 0 : index
    %c0_1 = arith.constant 0 : index
    %0 = vector.load %arg1[%c0, %c0_0, %c0_1] : memref<1x1x256xf32, #tpu.memory_space<vmem>>, vector<1x1x256xf32>
    %1 = vector.shape_cast %0 : vector<1x1x256xf32> to vector<1x256xf32>
    %2 = tpu.iota {dimensions = array<i32: 1>} : vector<32x256xi32>
    %c127_i32 = arith.constant 127 : i32
    %3 = vector.broadcast %c127_i32 : i32 to vector<32x256xi32>
    %4 = arith.andi %2, %3 : vector<32x256xi32>
    %c0_2 = arith.constant 0 : index
    %c0_3 = arith.constant 0 : index
    %5 = vector.load %arg3[%c0_2, %c0_3] : memref<32x2xf32, #tpu.memory_space<vmem>>, vector<32x2xf32>
    %6 = vector.extract_strided_slice %5 {offsets = [0, 0], sizes = [32, 1], strides = [1, 1]} : vector<32x2xf32> to vector<32x1xf32>
    %7 = vector.broadcast %6 : vector<32x1xf32> to vector<32x256xf32>
    %8 = vector.broadcast %1 : vector<1x256xf32> to vector<32x256xf32>
    %9 = arith.mulf %7, %8 : vector<32x256xf32>
    %c1_i32 = arith.constant 1 : i32
    %10 = tpu.dynamic_rotate %9 by %c1_i32 dim 1 : vector<32x256xf32>, i32 -> vector<32x256xf32>
    %c1_i32_4 = arith.constant 1 : i32
    %11 = vector.broadcast %c1_i32_4 : i32 to vector<32x256xi32>
    %12 = arith.cmpi sge, %4, %11 : vector<32x256xi32>
    %cst = arith.constant 0.000000e+00 : f32
    %13 = vector.broadcast %cst : f32 to vector<32x256xf32>
    %14 = arith.select %12, %10, %13 : vector<32x256xi1>, vector<32x256xf32>
    %15 = vector.extract_strided_slice %5 {offsets = [0, 1], sizes = [32, 1], strides = [1, 1]} : vector<32x2xf32> to vector<32x1xf32>
    %16 = vector.broadcast %15 : vector<32x1xf32> to vector<32x256xf32>
    %17 = vector.broadcast %1 : vector<1x256xf32> to vector<32x256xf32>
    %18 = arith.mulf %16, %17 : vector<32x256xf32>
    %19 = arith.addf %14, %18 : vector<32x256xf32>
    %c0_5 = arith.constant 0 : index
    %c0_6 = arith.constant 0 : index
    %20 = vector.load %arg4[%c0_5, %c0_6] : memref<32x1xf32, #tpu.memory_space<vmem>>, vector<32x1xf32>
    %21 = vector.broadcast %20 : vector<32x1xf32> to vector<32x256xf32>
    %22 = arith.addf %19, %21 : vector<32x256xf32>
    %cst_7 = arith.constant 0.000000e+00 : f32
    %23 = vector.broadcast %cst_7 : f32 to vector<32x256xf32>
    %c1_i32_8 = arith.constant 1 : i32
    %24 = tpu.dynamic_rotate %22 by %c1_i32_8 dim 1 : vector<32x256xf32>, i32 -> vector<32x256xf32>
    %c1_i32_9 = arith.constant 1 : i32
    %25 = vector.broadcast %c1_i32_9 : i32 to vector<32x256xi32>
    %26 = arith.cmpi sge, %4, %25 : vector<32x256xi32>
    %cst_10 = arith.constant 0.000000e+00 : f32
    %27 = vector.broadcast %cst_10 : f32 to vector<32x256xf32>
    %28 = arith.select %26, %24, %27 : vector<32x256xi1>, vector<32x256xf32>
    %29 = tpu.concatenate %28, %22 in 0 : vector<32x256xf32>, vector<32x256xf32> -> vector<64x256xf32>
    %c0_11 = arith.constant 0 : index
    %c0_12 = arith.constant 0 : index
    %c0_13 = arith.constant 0 : index
    %30 = vector.load %arg5[%c0_11, %c0_12, %c0_13] : memref<8x32x64xf32, #tpu.memory_space<vmem>>, vector<1x32x64xf32>
    %31 = vector.shape_cast %30 : vector<1x32x64xf32> to vector<32x64xf32>
    %cst_14 = arith.constant dense<0.000000e+00> : vector<32x256xf32>
    %32 = tpu.matmul %31, %29, %cst_14 {dimension_numbers = #tpu.dot_dimension_numbers<[1], [0], [0], [1], [0, 0, 1, 1], [], []>} : vector<32x64xf32>, vector<64x256xf32>, vector<32x256xf32> -> vector<32x256xf32>
    %c0_15 = arith.constant 0 : index
    %c0_16 = arith.constant 0 : index
    %c0_17 = arith.constant 0 : index
    %33 = vector.load %arg6[%c0_15, %c0_16, %c0_17] : memref<8x32x1xf32, #tpu.memory_space<vmem>>, vector<1x32x1xf32>
    %34 = vector.shape_cast %33 : vector<1x32x1xf32> to vector<32x1xf32>
    %35 = vector.broadcast %34 : vector<32x1xf32> to vector<32x256xf32>
    %36 = arith.addf %32, %35 : vector<32x256xf32>
    %37 = math.tanh %36 : vector<32x256xf32>
    %cst_18 = arith.constant 5.000000e-01 : f32
    %38 = vector.broadcast %cst_18 : f32 to vector<32x256xf32>
    %39 = arith.mulf %38, %36 : vector<32x256xf32>
    %40 = math.tanh %39 : vector<32x256xf32>
    %cst_19 = arith.constant 1.000000e+00 : f32
    %41 = vector.broadcast %cst_19 : f32 to vector<32x256xf32>
    %42 = arith.addf %40, %41 : vector<32x256xf32>
    %cst_20 = arith.constant 5.000000e-01 : f32
    %43 = vector.broadcast %cst_20 : f32 to vector<32x256xf32>
    %44 = arith.mulf %43, %42 : vector<32x256xf32>
    %45 = arith.mulf %37, %44 : vector<32x256xf32>
    %c0_21 = arith.constant 0 : index
    %c0_22 = arith.constant 0 : index
    %c0_23 = arith.constant 0 : index
    %46 = vector.load %arg7[%c0_21, %c0_22, %c0_23] : memref<8x64x32xf32, #tpu.memory_space<vmem>>, vector<1x64x32xf32>
    %47 = vector.shape_cast %46 : vector<1x64x32xf32> to vector<64x32xf32>
    %cst_24 = arith.constant dense<0.000000e+00> : vector<64x256xf32>
    %48 = tpu.matmul %47, %45, %cst_24 {dimension_numbers = #tpu.dot_dimension_numbers<[1], [0], [0], [1], [0, 0, 1, 1], [], []>} : vector<64x32xf32>, vector<32x256xf32>, vector<64x256xf32> -> vector<64x256xf32>
    %c0_25 = arith.constant 0 : index
    %c0_26 = arith.constant 0 : index
    %c0_27 = arith.constant 0 : index
    %49 = vector.load %arg8[%c0_25, %c0_26, %c0_27] : memref<8x64x1xf32, #tpu.memory_space<vmem>>, vector<1x64x1xf32>
    %50 = vector.shape_cast %49 : vector<1x64x1xf32> to vector<64x1xf32>
    %51 = vector.broadcast %50 : vector<64x1xf32> to vector<64x256xf32>
    %52 = arith.addf %48, %51 : vector<64x256xf32>
    %53 = vector.extract_strided_slice %52 {offsets = [0, 0], sizes = [32, 256], strides = [1, 1]} : vector<64x256xf32> to vector<32x256xf32>
    %54 = arith.addf %22, %53 : vector<32x256xf32>
    %55 = vector.extract_strided_slice %52 {offsets = [32, 0], sizes = [32, 256], strides = [1, 1]} : vector<64x256xf32> to vector<32x256xf32>
    %56 = arith.addf %23, %55 : vector<32x256xf32>
    %c2_i32 = arith.constant 2 : i32
    %57 = tpu.dynamic_rotate %54 by %c2_i32 dim 1 : vector<32x256xf32>, i32 -> vector<32x256xf32>
    %c2_i32_28 = arith.constant 2 : i32
    %58 = vector.broadcast %c2_i32_28 : i32 to vector<32x256xi32>
    %59 = arith.cmpi sge, %4, %58 : vector<32x256xi32>
    %cst_29 = arith.constant 0.000000e+00 : f32
    %60 = vector.broadcast %cst_29 : f32 to vector<32x256xf32>
    %61 = arith.select %59, %57, %60 : vector<32x256xi1>, vector<32x256xf32>
    %62 = tpu.concatenate %61, %54 in 0 : vector<32x256xf32>, vector<32x256xf32> -> vector<64x256xf32>
    %c1 = arith.constant 1 : index
    %c0_30 = arith.constant 0 : index
    %c0_31 = arith.constant 0 : index
    %63 = vector.load %arg5[%c1, %c0_30, %c0_31] : memref<8x32x64xf32, #tpu.memory_space<vmem>>, vector<1x32x64xf32>
    %64 = vector.shape_cast %63 : vector<1x32x64xf32> to vector<32x64xf32>
    %cst_32 = arith.constant dense<0.000000e+00> : vector<32x256xf32>
    %65 = tpu.matmul %64, %62, %cst_32 {dimension_numbers = #tpu.dot_dimension_numbers<[1], [0], [0], [1], [0, 0, 1, 1], [], []>} : vector<32x64xf32>, vector<64x256xf32>, vector<32x256xf32> -> vector<32x256xf32>
    %c1_33 = arith.constant 1 : index
    %c0_34 = arith.constant 0 : index
    %c0_35 = arith.constant 0 : index
    %66 = vector.load %arg6[%c1_33, %c0_34, %c0_35] : memref<8x32x1xf32, #tpu.memory_space<vmem>>, vector<1x32x1xf32>
    %67 = vector.shape_cast %66 : vector<1x32x1xf32> to vector<32x1xf32>
    %68 = vector.broadcast %67 : vector<32x1xf32> to vector<32x256xf32>
    %69 = arith.addf %65, %68 : vector<32x256xf32>
    %70 = math.tanh %69 : vector<32x256xf32>
    %cst_36 = arith.constant 5.000000e-01 : f32
    %71 = vector.broadcast %cst_36 : f32 to vector<32x256xf32>
    %72 = arith.mulf %71, %69 : vector<32x256xf32>
    %73 = math.tanh %72 : vector<32x256xf32>
    %cst_37 = arith.constant 1.000000e+00 : f32
    %74 = vector.broadcast %cst_37 : f32 to vector<32x256xf32>
    %75 = arith.addf %73, %74 : vector<32x256xf32>
    %cst_38 = arith.constant 5.000000e-01 : f32
    %76 = vector.broadcast %cst_38 : f32 to vector<32x256xf32>
    %77 = arith.mulf %76, %75 : vector<32x256xf32>
    %78 = arith.mulf %70, %77 : vector<32x256xf32>
    %c1_39 = arith.constant 1 : index
    %c0_40 = arith.constant 0 : index
    %c0_41 = arith.constant 0 : index
    %79 = vector.load %arg7[%c1_39, %c0_40, %c0_41] : memref<8x64x32xf32, #tpu.memory_space<vmem>>, vector<1x64x32xf32>
    %80 = vector.shape_cast %79 : vector<1x64x32xf32> to vector<64x32xf32>
    %cst_42 = arith.constant dense<0.000000e+00> : vector<64x256xf32>
    %81 = tpu.matmul %80, %78, %cst_42 {dimension_numbers = #tpu.dot_dimension_numbers<[1], [0], [0], [1], [0, 0, 1, 1], [], []>} : vector<64x32xf32>, vector<32x256xf32>, vector<64x256xf32> -> vector<64x256xf32>
    %c1_43 = arith.constant 1 : index
    %c0_44 = arith.constant 0 : index
    %c0_45 = arith.constant 0 : index
    %82 = vector.load %arg8[%c1_43, %c0_44, %c0_45] : memref<8x64x1xf32, #tpu.memory_space<vmem>>, vector<1x64x1xf32>
    %83 = vector.shape_cast %82 : vector<1x64x1xf32> to vector<64x1xf32>
    %84 = vector.broadcast %83 : vector<64x1xf32> to vector<64x256xf32>
    %85 = arith.addf %81, %84 : vector<64x256xf32>
    %86 = vector.extract_strided_slice %85 {offsets = [0, 0], sizes = [32, 256], strides = [1, 1]} : vector<64x256xf32> to vector<32x256xf32>
    %87 = arith.addf %54, %86 : vector<32x256xf32>
    %88 = vector.extract_strided_slice %85 {offsets = [32, 0], sizes = [32, 256], strides = [1, 1]} : vector<64x256xf32> to vector<32x256xf32>
    %89 = arith.addf %56, %88 : vector<32x256xf32>
    %c4_i32 = arith.constant 4 : i32
    %90 = tpu.dynamic_rotate %87 by %c4_i32 dim 1 : vector<32x256xf32>, i32 -> vector<32x256xf32>
    %c4_i32_46 = arith.constant 4 : i32
    %91 = vector.broadcast %c4_i32_46 : i32 to vector<32x256xi32>
    %92 = arith.cmpi sge, %4, %91 : vector<32x256xi32>
    %cst_47 = arith.constant 0.000000e+00 : f32
    %93 = vector.broadcast %cst_47 : f32 to vector<32x256xf32>
    %94 = arith.select %92, %90, %93 : vector<32x256xi1>, vector<32x256xf32>
    %95 = tpu.concatenate %94, %87 in 0 : vector<32x256xf32>, vector<32x256xf32> -> vector<64x256xf32>
    %c2 = arith.constant 2 : index
    %c0_48 = arith.constant 0 : index
    %c0_49 = arith.constant 0 : index
    %96 = vector.load %arg5[%c2, %c0_48, %c0_49] : memref<8x32x64xf32, #tpu.memory_space<vmem>>, vector<1x32x64xf32>
    %97 = vector.shape_cast %96 : vector<1x32x64xf32> to vector<32x64xf32>
    %cst_50 = arith.constant dense<0.000000e+00> : vector<32x256xf32>
    %98 = tpu.matmul %97, %95, %cst_50 {dimension_numbers = #tpu.dot_dimension_numbers<[1], [0], [0], [1], [0, 0, 1, 1], [], []>} : vector<32x64xf32>, vector<64x256xf32>, vector<32x256xf32> -> vector<32x256xf32>
    %c2_51 = arith.constant 2 : index
    %c0_52 = arith.constant 0 : index
    %c0_53 = arith.constant 0 : index
    %99 = vector.load %arg6[%c2_51, %c0_52, %c0_53] : memref<8x32x1xf32, #tpu.memory_space<vmem>>, vector<1x32x1xf32>
    %100 = vector.shape_cast %99 : vector<1x32x1xf32> to vector<32x1xf32>
    %101 = vector.broadcast %100 : vector<32x1xf32> to vector<32x256xf32>
    %102 = arith.addf %98, %101 : vector<32x256xf32>
    %103 = math.tanh %102 : vector<32x256xf32>
    %cst_54 = arith.constant 5.000000e-01 : f32
    %104 = vector.broadcast %cst_54 : f32 to vector<32x256xf32>
    %105 = arith.mulf %104, %102 : vector<32x256xf32>
    %106 = math.tanh %105 : vector<32x256xf32>
    %cst_55 = arith.constant 1.000000e+00 : f32
    %107 = vector.broadcast %cst_55 : f32 to vector<32x256xf32>
    %108 = arith.addf %106, %107 : vector<32x256xf32>
    %cst_56 = arith.constant 5.000000e-01 : f32
    %109 = vector.broadcast %cst_56 : f32 to vector<32x256xf32>
    %110 = arith.mulf %109, %108 : vector<32x256xf32>
    %111 = arith.mulf %103, %110 : vector<32x256xf32>
    %c2_57 = arith.constant 2 : index
    %c0_58 = arith.constant 0 : index
    %c0_59 = arith.constant 0 : index
    %112 = vector.load %arg7[%c2_57, %c0_58, %c0_59] : memref<8x64x32xf32, #tpu.memory_space<vmem>>, vector<1x64x32xf32>
    %113 = vector.shape_cast %112 : vector<1x64x32xf32> to vector<64x32xf32>
    %cst_60 = arith.constant dense<0.000000e+00> : vector<64x256xf32>
    %114 = tpu.matmul %113, %111, %cst_60 {dimension_numbers = #tpu.dot_dimension_numbers<[1], [0], [0], [1], [0, 0, 1, 1], [], []>} : vector<64x32xf32>, vector<32x256xf32>, vector<64x256xf32> -> vector<64x256xf32>
    %c2_61 = arith.constant 2 : index
    %c0_62 = arith.constant 0 : index
    %c0_63 = arith.constant 0 : index
    %115 = vector.load %arg8[%c2_61, %c0_62, %c0_63] : memref<8x64x1xf32, #tpu.memory_space<vmem>>, vector<1x64x1xf32>
    %116 = vector.shape_cast %115 : vector<1x64x1xf32> to vector<64x1xf32>
    %117 = vector.broadcast %116 : vector<64x1xf32> to vector<64x256xf32>
    %118 = arith.addf %114, %117 : vector<64x256xf32>
    %119 = vector.extract_strided_slice %118 {offsets = [0, 0], sizes = [32, 256], strides = [1, 1]} : vector<64x256xf32> to vector<32x256xf32>
    %120 = arith.addf %87, %119 : vector<32x256xf32>
    %121 = vector.extract_strided_slice %118 {offsets = [32, 0], sizes = [32, 256], strides = [1, 1]} : vector<64x256xf32> to vector<32x256xf32>
    %122 = arith.addf %89, %121 : vector<32x256xf32>
    %c8_i32 = arith.constant 8 : i32
    %123 = tpu.dynamic_rotate %120 by %c8_i32 dim 1 : vector<32x256xf32>, i32 -> vector<32x256xf32>
    %c8_i32_64 = arith.constant 8 : i32
    %124 = vector.broadcast %c8_i32_64 : i32 to vector<32x256xi32>
    %125 = arith.cmpi sge, %4, %124 : vector<32x256xi32>
    %cst_65 = arith.constant 0.000000e+00 : f32
    %126 = vector.broadcast %cst_65 : f32 to vector<32x256xf32>
    %127 = arith.select %125, %123, %126 : vector<32x256xi1>, vector<32x256xf32>
    %128 = tpu.concatenate %127, %120 in 0 : vector<32x256xf32>, vector<32x256xf32> -> vector<64x256xf32>
    %c3 = arith.constant 3 : index
    %c0_66 = arith.constant 0 : index
    %c0_67 = arith.constant 0 : index
    %129 = vector.load %arg5[%c3, %c0_66, %c0_67] : memref<8x32x64xf32, #tpu.memory_space<vmem>>, vector<1x32x64xf32>
    %130 = vector.shape_cast %129 : vector<1x32x64xf32> to vector<32x64xf32>
    %cst_68 = arith.constant dense<0.000000e+00> : vector<32x256xf32>
    %131 = tpu.matmul %130, %128, %cst_68 {dimension_numbers = #tpu.dot_dimension_numbers<[1], [0], [0], [1], [0, 0, 1, 1], [], []>} : vector<32x64xf32>, vector<64x256xf32>, vector<32x256xf32> -> vector<32x256xf32>
    %c3_69 = arith.constant 3 : index
    %c0_70 = arith.constant 0 : index
    %c0_71 = arith.constant 0 : index
    %132 = vector.load %arg6[%c3_69, %c0_70, %c0_71] : memref<8x32x1xf32, #tpu.memory_space<vmem>>, vector<1x32x1xf32>
    %133 = vector.shape_cast %132 : vector<1x32x1xf32> to vector<32x1xf32>
    %134 = vector.broadcast %133 : vector<32x1xf32> to vector<32x256xf32>
    %135 = arith.addf %131, %134 : vector<32x256xf32>
    %136 = math.tanh %135 : vector<32x256xf32>
    %cst_72 = arith.constant 5.000000e-01 : f32
    %137 = vector.broadcast %cst_72 : f32 to vector<32x256xf32>
    %138 = arith.mulf %137, %135 : vector<32x256xf32>
    %139 = math.tanh %138 : vector<32x256xf32>
    %cst_73 = arith.constant 1.000000e+00 : f32
    %140 = vector.broadcast %cst_73 : f32 to vector<32x256xf32>
    %141 = arith.addf %139, %140 : vector<32x256xf32>
    %cst_74 = arith.constant 5.000000e-01 : f32
    %142 = vector.broadcast %cst_74 : f32 to vector<32x256xf32>
    %143 = arith.mulf %142, %141 : vector<32x256xf32>
    %144 = arith.mulf %136, %143 : vector<32x256xf32>
    %c3_75 = arith.constant 3 : index
    %c0_76 = arith.constant 0 : index
    %c0_77 = arith.constant 0 : index
    %145 = vector.load %arg7[%c3_75, %c0_76, %c0_77] : memref<8x64x32xf32, #tpu.memory_space<vmem>>, vector<1x64x32xf32>
    %146 = vector.shape_cast %145 : vector<1x64x32xf32> to vector<64x32xf32>
    %cst_78 = arith.constant dense<0.000000e+00> : vector<64x256xf32>
    %147 = tpu.matmul %146, %144, %cst_78 {dimension_numbers = #tpu.dot_dimension_numbers<[1], [0], [0], [1], [0, 0, 1, 1], [], []>} : vector<64x32xf32>, vector<32x256xf32>, vector<64x256xf32> -> vector<64x256xf32>
    %c3_79 = arith.constant 3 : index
    %c0_80 = arith.constant 0 : index
    %c0_81 = arith.constant 0 : index
    %148 = vector.load %arg8[%c3_79, %c0_80, %c0_81] : memref<8x64x1xf32, #tpu.memory_space<vmem>>, vector<1x64x1xf32>
    %149 = vector.shape_cast %148 : vector<1x64x1xf32> to vector<64x1xf32>
    %150 = vector.broadcast %149 : vector<64x1xf32> to vector<64x256xf32>
    %151 = arith.addf %147, %150 : vector<64x256xf32>
    %152 = vector.extract_strided_slice %151 {offsets = [0, 0], sizes = [32, 256], strides = [1, 1]} : vector<64x256xf32> to vector<32x256xf32>
    %153 = arith.addf %120, %152 : vector<32x256xf32>
    %154 = vector.extract_strided_slice %151 {offsets = [32, 0], sizes = [32, 256], strides = [1, 1]} : vector<64x256xf32> to vector<32x256xf32>
    %155 = arith.addf %122, %154 : vector<32x256xf32>
    %c1_i32_82 = arith.constant 1 : i32
    %156 = tpu.dynamic_rotate %153 by %c1_i32_82 dim 1 : vector<32x256xf32>, i32 -> vector<32x256xf32>
    %c1_i32_83 = arith.constant 1 : i32
    %157 = vector.broadcast %c1_i32_83 : i32 to vector<32x256xi32>
    %158 = arith.cmpi sge, %4, %157 : vector<32x256xi32>
    %cst_84 = arith.constant 0.000000e+00 : f32
    %159 = vector.broadcast %cst_84 : f32 to vector<32x256xf32>
    %160 = arith.select %158, %156, %159 : vector<32x256xi1>, vector<32x256xf32>
    %161 = tpu.concatenate %160, %153 in 0 : vector<32x256xf32>, vector<32x256xf32> -> vector<64x256xf32>
    %c4 = arith.constant 4 : index
    %c0_85 = arith.constant 0 : index
    %c0_86 = arith.constant 0 : index
    %162 = vector.load %arg5[%c4, %c0_85, %c0_86] : memref<8x32x64xf32, #tpu.memory_space<vmem>>, vector<1x32x64xf32>
    %163 = vector.shape_cast %162 : vector<1x32x64xf32> to vector<32x64xf32>
    %cst_87 = arith.constant dense<0.000000e+00> : vector<32x256xf32>
    %164 = tpu.matmul %163, %161, %cst_87 {dimension_numbers = #tpu.dot_dimension_numbers<[1], [0], [0], [1], [0, 0, 1, 1], [], []>} : vector<32x64xf32>, vector<64x256xf32>, vector<32x256xf32> -> vector<32x256xf32>
    %c4_88 = arith.constant 4 : index
    %c0_89 = arith.constant 0 : index
    %c0_90 = arith.constant 0 : index
    %165 = vector.load %arg6[%c4_88, %c0_89, %c0_90] : memref<8x32x1xf32, #tpu.memory_space<vmem>>, vector<1x32x1xf32>
    %166 = vector.shape_cast %165 : vector<1x32x1xf32> to vector<32x1xf32>
    %167 = vector.broadcast %166 : vector<32x1xf32> to vector<32x256xf32>
    %168 = arith.addf %164, %167 : vector<32x256xf32>
    %169 = math.tanh %168 : vector<32x256xf32>
    %cst_91 = arith.constant 5.000000e-01 : f32
    %170 = vector.broadcast %cst_91 : f32 to vector<32x256xf32>
    %171 = arith.mulf %170, %168 : vector<32x256xf32>
    %172 = math.tanh %171 : vector<32x256xf32>
    %cst_92 = arith.constant 1.000000e+00 : f32
    %173 = vector.broadcast %cst_92 : f32 to vector<32x256xf32>
    %174 = arith.addf %172, %173 : vector<32x256xf32>
    %cst_93 = arith.constant 5.000000e-01 : f32
    %175 = vector.broadcast %cst_93 : f32 to vector<32x256xf32>
    %176 = arith.mulf %175, %174 : vector<32x256xf32>
    %177 = arith.mulf %169, %176 : vector<32x256xf32>
    %c4_94 = arith.constant 4 : index
    %c0_95 = arith.constant 0 : index
    %c0_96 = arith.constant 0 : index
    %178 = vector.load %arg7[%c4_94, %c0_95, %c0_96] : memref<8x64x32xf32, #tpu.memory_space<vmem>>, vector<1x64x32xf32>
    %179 = vector.shape_cast %178 : vector<1x64x32xf32> to vector<64x32xf32>
    %cst_97 = arith.constant dense<0.000000e+00> : vector<64x256xf32>
    %180 = tpu.matmul %179, %177, %cst_97 {dimension_numbers = #tpu.dot_dimension_numbers<[1], [0], [0], [1], [0, 0, 1, 1], [], []>} : vector<64x32xf32>, vector<32x256xf32>, vector<64x256xf32> -> vector<64x256xf32>
    %c4_98 = arith.constant 4 : index
    %c0_99 = arith.constant 0 : index
    %c0_100 = arith.constant 0 : index
    %181 = vector.load %arg8[%c4_98, %c0_99, %c0_100] : memref<8x64x1xf32, #tpu.memory_space<vmem>>, vector<1x64x1xf32>
    %182 = vector.shape_cast %181 : vector<1x64x1xf32> to vector<64x1xf32>
    %183 = vector.broadcast %182 : vector<64x1xf32> to vector<64x256xf32>
    %184 = arith.addf %180, %183 : vector<64x256xf32>
    %185 = vector.extract_strided_slice %184 {offsets = [0, 0], sizes = [32, 256], strides = [1, 1]} : vector<64x256xf32> to vector<32x256xf32>
    %186 = arith.addf %153, %185 : vector<32x256xf32>
    %187 = vector.extract_strided_slice %184 {offsets = [32, 0], sizes = [32, 256], strides = [1, 1]} : vector<64x256xf32> to vector<32x256xf32>
    %188 = arith.addf %155, %187 : vector<32x256xf32>
    %c2_i32_101 = arith.constant 2 : i32
    %189 = tpu.dynamic_rotate %186 by %c2_i32_101 dim 1 : vector<32x256xf32>, i32 -> vector<32x256xf32>
    %c2_i32_102 = arith.constant 2 : i32
    %190 = vector.broadcast %c2_i32_102 : i32 to vector<32x256xi32>
    %191 = arith.cmpi sge, %4, %190 : vector<32x256xi32>
    %cst_103 = arith.constant 0.000000e+00 : f32
    %192 = vector.broadcast %cst_103 : f32 to vector<32x256xf32>
    %193 = arith.select %191, %189, %192 : vector<32x256xi1>, vector<32x256xf32>
    %194 = tpu.concatenate %193, %186 in 0 : vector<32x256xf32>, vector<32x256xf32> -> vector<64x256xf32>
    %c5 = arith.constant 5 : index
    %c0_104 = arith.constant 0 : index
    %c0_105 = arith.constant 0 : index
    %195 = vector.load %arg5[%c5, %c0_104, %c0_105] : memref<8x32x64xf32, #tpu.memory_space<vmem>>, vector<1x32x64xf32>
    %196 = vector.shape_cast %195 : vector<1x32x64xf32> to vector<32x64xf32>
    %cst_106 = arith.constant dense<0.000000e+00> : vector<32x256xf32>
    %197 = tpu.matmul %196, %194, %cst_106 {dimension_numbers = #tpu.dot_dimension_numbers<[1], [0], [0], [1], [0, 0, 1, 1], [], []>} : vector<32x64xf32>, vector<64x256xf32>, vector<32x256xf32> -> vector<32x256xf32>
    %c5_107 = arith.constant 5 : index
    %c0_108 = arith.constant 0 : index
    %c0_109 = arith.constant 0 : index
    %198 = vector.load %arg6[%c5_107, %c0_108, %c0_109] : memref<8x32x1xf32, #tpu.memory_space<vmem>>, vector<1x32x1xf32>
    %199 = vector.shape_cast %198 : vector<1x32x1xf32> to vector<32x1xf32>
    %200 = vector.broadcast %199 : vector<32x1xf32> to vector<32x256xf32>
    %201 = arith.addf %197, %200 : vector<32x256xf32>
    %202 = math.tanh %201 : vector<32x256xf32>
    %cst_110 = arith.constant 5.000000e-01 : f32
    %203 = vector.broadcast %cst_110 : f32 to vector<32x256xf32>
    %204 = arith.mulf %203, %201 : vector<32x256xf32>
    %205 = math.tanh %204 : vector<32x256xf32>
    %cst_111 = arith.constant 1.000000e+00 : f32
    %206 = vector.broadcast %cst_111 : f32 to vector<32x256xf32>
    %207 = arith.addf %205, %206 : vector<32x256xf32>
    %cst_112 = arith.constant 5.000000e-01 : f32
    %208 = vector.broadcast %cst_112 : f32 to vector<32x256xf32>
    %209 = arith.mulf %208, %207 : vector<32x256xf32>
    %210 = arith.mulf %202, %209 : vector<32x256xf32>
    %c5_113 = arith.constant 5 : index
    %c0_114 = arith.constant 0 : index
    %c0_115 = arith.constant 0 : index
    %211 = vector.load %arg7[%c5_113, %c0_114, %c0_115] : memref<8x64x32xf32, #tpu.memory_space<vmem>>, vector<1x64x32xf32>
    %212 = vector.shape_cast %211 : vector<1x64x32xf32> to vector<64x32xf32>
    %cst_116 = arith.constant dense<0.000000e+00> : vector<64x256xf32>
    %213 = tpu.matmul %212, %210, %cst_116 {dimension_numbers = #tpu.dot_dimension_numbers<[1], [0], [0], [1], [0, 0, 1, 1], [], []>} : vector<64x32xf32>, vector<32x256xf32>, vector<64x256xf32> -> vector<64x256xf32>
    %c5_117 = arith.constant 5 : index
    %c0_118 = arith.constant 0 : index
    %c0_119 = arith.constant 0 : index
    %214 = vector.load %arg8[%c5_117, %c0_118, %c0_119] : memref<8x64x1xf32, #tpu.memory_space<vmem>>, vector<1x64x1xf32>
    %215 = vector.shape_cast %214 : vector<1x64x1xf32> to vector<64x1xf32>
    %216 = vector.broadcast %215 : vector<64x1xf32> to vector<64x256xf32>
    %217 = arith.addf %213, %216 : vector<64x256xf32>
    %218 = vector.extract_strided_slice %217 {offsets = [0, 0], sizes = [32, 256], strides = [1, 1]} : vector<64x256xf32> to vector<32x256xf32>
    %219 = arith.addf %186, %218 : vector<32x256xf32>
    %220 = vector.extract_strided_slice %217 {offsets = [32, 0], sizes = [32, 256], strides = [1, 1]} : vector<64x256xf32> to vector<32x256xf32>
    %221 = arith.addf %188, %220 : vector<32x256xf32>
    %c4_i32_120 = arith.constant 4 : i32
    %222 = tpu.dynamic_rotate %219 by %c4_i32_120 dim 1 : vector<32x256xf32>, i32 -> vector<32x256xf32>
    %c4_i32_121 = arith.constant 4 : i32
    %223 = vector.broadcast %c4_i32_121 : i32 to vector<32x256xi32>
    %224 = arith.cmpi sge, %4, %223 : vector<32x256xi32>
    %cst_122 = arith.constant 0.000000e+00 : f32
    %225 = vector.broadcast %cst_122 : f32 to vector<32x256xf32>
    %226 = arith.select %224, %222, %225 : vector<32x256xi1>, vector<32x256xf32>
    %227 = tpu.concatenate %226, %219 in 0 : vector<32x256xf32>, vector<32x256xf32> -> vector<64x256xf32>
    %c6 = arith.constant 6 : index
    %c0_123 = arith.constant 0 : index
    %c0_124 = arith.constant 0 : index
    %228 = vector.load %arg5[%c6, %c0_123, %c0_124] : memref<8x32x64xf32, #tpu.memory_space<vmem>>, vector<1x32x64xf32>
    %229 = vector.shape_cast %228 : vector<1x32x64xf32> to vector<32x64xf32>
    %cst_125 = arith.constant dense<0.000000e+00> : vector<32x256xf32>
    %230 = tpu.matmul %229, %227, %cst_125 {dimension_numbers = #tpu.dot_dimension_numbers<[1], [0], [0], [1], [0, 0, 1, 1], [], []>} : vector<32x64xf32>, vector<64x256xf32>, vector<32x256xf32> -> vector<32x256xf32>
    %c6_126 = arith.constant 6 : index
    %c0_127 = arith.constant 0 : index
    %c0_128 = arith.constant 0 : index
    %231 = vector.load %arg6[%c6_126, %c0_127, %c0_128] : memref<8x32x1xf32, #tpu.memory_space<vmem>>, vector<1x32x1xf32>
    %232 = vector.shape_cast %231 : vector<1x32x1xf32> to vector<32x1xf32>
    %233 = vector.broadcast %232 : vector<32x1xf32> to vector<32x256xf32>
    %234 = arith.addf %230, %233 : vector<32x256xf32>
    %235 = math.tanh %234 : vector<32x256xf32>
    %cst_129 = arith.constant 5.000000e-01 : f32
    %236 = vector.broadcast %cst_129 : f32 to vector<32x256xf32>
    %237 = arith.mulf %236, %234 : vector<32x256xf32>
    %238 = math.tanh %237 : vector<32x256xf32>
    %cst_130 = arith.constant 1.000000e+00 : f32
    %239 = vector.broadcast %cst_130 : f32 to vector<32x256xf32>
    %240 = arith.addf %238, %239 : vector<32x256xf32>
    %cst_131 = arith.constant 5.000000e-01 : f32
    %241 = vector.broadcast %cst_131 : f32 to vector<32x256xf32>
    %242 = arith.mulf %241, %240 : vector<32x256xf32>
    %243 = arith.mulf %235, %242 : vector<32x256xf32>
    %c6_132 = arith.constant 6 : index
    %c0_133 = arith.constant 0 : index
    %c0_134 = arith.constant 0 : index
    %244 = vector.load %arg7[%c6_132, %c0_133, %c0_134] : memref<8x64x32xf32, #tpu.memory_space<vmem>>, vector<1x64x32xf32>
    %245 = vector.shape_cast %244 : vector<1x64x32xf32> to vector<64x32xf32>
    %cst_135 = arith.constant dense<0.000000e+00> : vector<64x256xf32>
    %246 = tpu.matmul %245, %243, %cst_135 {dimension_numbers = #tpu.dot_dimension_numbers<[1], [0], [0], [1], [0, 0, 1, 1], [], []>} : vector<64x32xf32>, vector<32x256xf32>, vector<64x256xf32> -> vector<64x256xf32>
    %c6_136 = arith.constant 6 : index
    %c0_137 = arith.constant 0 : index
    %c0_138 = arith.constant 0 : index
    %247 = vector.load %arg8[%c6_136, %c0_137, %c0_138] : memref<8x64x1xf32, #tpu.memory_space<vmem>>, vector<1x64x1xf32>
    %248 = vector.shape_cast %247 : vector<1x64x1xf32> to vector<64x1xf32>
    %249 = vector.broadcast %248 : vector<64x1xf32> to vector<64x256xf32>
    %250 = arith.addf %246, %249 : vector<64x256xf32>
    %251 = vector.extract_strided_slice %250 {offsets = [0, 0], sizes = [32, 256], strides = [1, 1]} : vector<64x256xf32> to vector<32x256xf32>
    %252 = arith.addf %219, %251 : vector<32x256xf32>
    %253 = vector.extract_strided_slice %250 {offsets = [32, 0], sizes = [32, 256], strides = [1, 1]} : vector<64x256xf32> to vector<32x256xf32>
    %254 = arith.addf %221, %253 : vector<32x256xf32>
    %c8_i32_139 = arith.constant 8 : i32
    %255 = tpu.dynamic_rotate %252 by %c8_i32_139 dim 1 : vector<32x256xf32>, i32 -> vector<32x256xf32>
    %c8_i32_140 = arith.constant 8 : i32
    %256 = vector.broadcast %c8_i32_140 : i32 to vector<32x256xi32>
    %257 = arith.cmpi sge, %4, %256 : vector<32x256xi32>
    %cst_141 = arith.constant 0.000000e+00 : f32
    %258 = vector.broadcast %cst_141 : f32 to vector<32x256xf32>
    %259 = arith.select %257, %255, %258 : vector<32x256xi1>, vector<32x256xf32>
    %260 = tpu.concatenate %259, %252 in 0 : vector<32x256xf32>, vector<32x256xf32> -> vector<64x256xf32>
    %c7 = arith.constant 7 : index
    %c0_142 = arith.constant 0 : index
    %c0_143 = arith.constant 0 : index
    %261 = vector.load %arg5[%c7, %c0_142, %c0_143] : memref<8x32x64xf32, #tpu.memory_space<vmem>>, vector<1x32x64xf32>
    %262 = vector.shape_cast %261 : vector<1x32x64xf32> to vector<32x64xf32>
    %cst_144 = arith.constant dense<0.000000e+00> : vector<32x256xf32>
    %263 = tpu.matmul %262, %260, %cst_144 {dimension_numbers = #tpu.dot_dimension_numbers<[1], [0], [0], [1], [0, 0, 1, 1], [], []>} : vector<32x64xf32>, vector<64x256xf32>, vector<32x256xf32> -> vector<32x256xf32>
    %c7_145 = arith.constant 7 : index
    %c0_146 = arith.constant 0 : index
    %c0_147 = arith.constant 0 : index
    %264 = vector.load %arg6[%c7_145, %c0_146, %c0_147] : memref<8x32x1xf32, #tpu.memory_space<vmem>>, vector<1x32x1xf32>
    %265 = vector.shape_cast %264 : vector<1x32x1xf32> to vector<32x1xf32>
    %266 = vector.broadcast %265 : vector<32x1xf32> to vector<32x256xf32>
    %267 = arith.addf %263, %266 : vector<32x256xf32>
    %268 = math.tanh %267 : vector<32x256xf32>
    %cst_148 = arith.constant 5.000000e-01 : f32
    %269 = vector.broadcast %cst_148 : f32 to vector<32x256xf32>
    %270 = arith.mulf %269, %267 : vector<32x256xf32>
    %271 = math.tanh %270 : vector<32x256xf32>
    %cst_149 = arith.constant 1.000000e+00 : f32
    %272 = vector.broadcast %cst_149 : f32 to vector<32x256xf32>
    %273 = arith.addf %271, %272 : vector<32x256xf32>
    %cst_150 = arith.constant 5.000000e-01 : f32
    %274 = vector.broadcast %cst_150 : f32 to vector<32x256xf32>
    %275 = arith.mulf %274, %273 : vector<32x256xf32>
    %276 = arith.mulf %268, %275 : vector<32x256xf32>
    %c7_151 = arith.constant 7 : index
    %c0_152 = arith.constant 0 : index
    %c0_153 = arith.constant 0 : index
    %277 = vector.load %arg7[%c7_151, %c0_152, %c0_153] : memref<8x64x32xf32, #tpu.memory_space<vmem>>, vector<1x64x32xf32>
    %278 = vector.shape_cast %277 : vector<1x64x32xf32> to vector<64x32xf32>
    %cst_154 = arith.constant dense<0.000000e+00> : vector<64x256xf32>
    %279 = tpu.matmul %278, %276, %cst_154 {dimension_numbers = #tpu.dot_dimension_numbers<[1], [0], [0], [1], [0, 0, 1, 1], [], []>} : vector<64x32xf32>, vector<32x256xf32>, vector<64x256xf32> -> vector<64x256xf32>
    %c7_155 = arith.constant 7 : index
    %c0_156 = arith.constant 0 : index
    %c0_157 = arith.constant 0 : index
    %280 = vector.load %arg8[%c7_155, %c0_156, %c0_157] : memref<8x64x1xf32, #tpu.memory_space<vmem>>, vector<1x64x1xf32>
    %281 = vector.shape_cast %280 : vector<1x64x1xf32> to vector<64x1xf32>
    %282 = vector.broadcast %281 : vector<64x1xf32> to vector<64x256xf32>
    %283 = arith.addf %279, %282 : vector<64x256xf32>
    %284 = vector.extract_strided_slice %283 {offsets = [32, 0], sizes = [32, 256], strides = [1, 1]} : vector<64x256xf32> to vector<32x256xf32>
    %285 = arith.addf %254, %284 : vector<32x256xf32>
    %286 = tpu.iota {dimensions = array<i32: 0>} : vector<256x128xi32>
    %287 = tpu.iota {dimensions = array<i32: 1>} : vector<256x128xi32>
    %c128_i32 = arith.constant 128 : i32
    %288 = vector.broadcast %c128_i32 : i32 to vector<256x128xi32>
    %289 = arith.muli %287, %288 : vector<256x128xi32>
    %c127_i32_158 = arith.constant 127 : i32
    %290 = vector.broadcast %c127_i32_158 : i32 to vector<256x128xi32>
    %291 = arith.addi %289, %290 : vector<256x128xi32>
    %292 = arith.cmpi eq, %286, %291 : vector<256x128xi32>
    %293 = arith.extui %292 : vector<256x128xi1> to vector<256x128xi32>
    %294 = arith.sitofp %293 : vector<256x128xi32> to vector<256x128xf32>
    %cst_159 = arith.constant dense<0.000000e+00> : vector<32x128xf32>
    %295 = tpu.matmul %285, %294, %cst_159 {dimension_numbers = #tpu.dot_dimension_numbers<[1], [0], [0], [1], [0, 0, 1, 1], [], []>} : vector<32x256xf32>, vector<256x128xf32>, vector<32x128xf32> -> vector<32x128xf32>
    %cst_160 = arith.constant 0.000000e+00 : f32
    %296 = vector.broadcast %cst_160 : f32 to vector<32x128xf32>
    %297 = arith.maximumf %295, %296 : vector<32x128xf32>
    %c0_161 = arith.constant 0 : index
    %c0_162 = arith.constant 0 : index
    %c0_163 = arith.constant 0 : index
    %298 = vector.load %arg2[%c0_161, %c0_162, %c0_163] : memref<1x1x128xf32, #tpu.memory_space<vmem>>, vector<1x1x128xf32>
    %299 = vector.shape_cast %298 : vector<1x1x128xf32> to vector<1x128xf32>
    %300 = vector.broadcast %299 : vector<1x128xf32> to vector<32x128xf32>
    %301 = arith.addf %297, %300 : vector<32x128xf32>
    %c0_164 = arith.constant 0 : index
    %c0_165 = arith.constant 0 : index
    %302 = vector.load %arg9[%c0_164, %c0_165] : memref<32x32xf32, #tpu.memory_space<vmem>>, vector<32x32xf32>
    %cst_166 = arith.constant dense<0.000000e+00> : vector<32x128xf32>
    %303 = tpu.matmul %302, %301, %cst_166 {dimension_numbers = #tpu.dot_dimension_numbers<[1], [0], [0], [1], [0, 0, 1, 1], [], []>} : vector<32x32xf32>, vector<32x128xf32>, vector<32x128xf32> -> vector<32x128xf32>
    %c0_167 = arith.constant 0 : index
    %c0_168 = arith.constant 0 : index
    %304 = vector.load %arg10[%c0_167, %c0_168] : memref<32x1xf32, #tpu.memory_space<vmem>>, vector<32x1xf32>
    %305 = vector.broadcast %304 : vector<32x1xf32> to vector<32x128xf32>
    %306 = arith.addf %303, %305 : vector<32x128xf32>
    %cst_169 = arith.constant 0.000000e+00 : f32
    %307 = vector.broadcast %cst_169 : f32 to vector<32x128xf32>
    %308 = arith.maximumf %306, %307 : vector<32x128xf32>
    %c0_170 = arith.constant 0 : index
    %c0_171 = arith.constant 0 : index
    %309 = vector.load %arg11[%c0_170, %c0_171] : memref<32x32xf32, #tpu.memory_space<vmem>>, vector<32x32xf32>
    %cst_172 = arith.constant dense<0.000000e+00> : vector<32x128xf32>
    %310 = tpu.matmul %309, %308, %cst_172 {dimension_numbers = #tpu.dot_dimension_numbers<[1], [0], [0], [1], [0, 0, 1, 1], [], []>} : vector<32x32xf32>, vector<32x128xf32>, vector<32x128xf32> -> vector<32x128xf32>
    %c0_173 = arith.constant 0 : index
    %c0_174 = arith.constant 0 : index
    %311 = vector.load %arg12[%c0_173, %c0_174] : memref<32x1xf32, #tpu.memory_space<vmem>>, vector<32x1xf32>
    %312 = vector.broadcast %311 : vector<32x1xf32> to vector<32x128xf32>
    %313 = arith.addf %310, %312 : vector<32x128xf32>
    %314 = vector.shape_cast %313 : vector<32x128xf32> to vector<1x32x128xf32>
    %c0_175 = arith.constant 0 : index
    %c0_176 = arith.constant 0 : index
    %c0_177 = arith.constant 0 : index
    %315 = vector.load %arg13[%c0_175, %c0_176, %c0_177] : memref<1x32x128xf32, #tpu.memory_space<vmem>>, vector<1x32x128xf32>
    tpu.vector_store %arg13[%c0_175, %c0_176, %c0_177], %314 {strides = array<i32>} : memref<1x32x128xf32, #tpu.memory_space<vmem>>, vector<1x32x128xf32>,
    return
  }
  func.func @transform_0(%arg0: i32) -> (i32, i32, i32) {
    %c0_i32 = arith.constant 0 : i32
    %c0_i32_0 = arith.constant 0 : i32
    %c0_i32_1 = arith.constant 0 : i32
    return %arg0, %c0_i32, %c0_i32_0 : i32, i32, i32
  }
  func.func @transform_1(%arg0: i32) -> (i32, i32, i32) {
    %c0_i32 = arith.constant 0 : i32
    %c0_i32_0 = arith.constant 0 : i32
    %c0_i32_1 = arith.constant 0 : i32
    return %arg0, %c0_i32, %c0_i32_0 : i32, i32, i32
  }
  func.func @transform_2(%arg0: i32) -> (i32, i32) {
    %c0_i32 = arith.constant 0 : i32
    %c0_i32_0 = arith.constant 0 : i32
    %c0_i32_1 = arith.constant 0 : i32
    return %c0_i32, %c0_i32_0 : i32, i32
  }
  func.func @transform_3(%arg0: i32) -> (i32, i32) {
    %c0_i32 = arith.constant 0 : i32
    %c0_i32_0 = arith.constant 0 : i32
    %c0_i32_1 = arith.constant 0 : i32
    return %c0_i32, %c0_i32_0 : i32, i32
  }
  func.func @transform_4(%arg0: i32) -> (i32, i32, i32) {
    %c0_i32 = arith.constant 0 : i32
    %c0_i32_0 = arith.constant 0 : i32
    %c0_i32_1 = arith.constant 0 : i32
    %c0_i32_2 = arith.constant 0 : i32
    return %c0_i32, %c0_i32_0, %c0_i32_1 : i32, i32, i32
  }
  func.func @transform_5(%arg0: i32) -> (i32, i32, i32) {
    %c0_i32 = arith.constant 0 : i32
    %c0_i32_0 = arith.constant 0 : i32
    %c0_i32_1 = arith.constant 0 : i32
    %c0_i32_2 = arith.constant 0 : i32
    return %c0_i32, %c0_i32_0, %c0_i32_1 : i32, i32, i32
  }
  func.func @transform_6(%arg0: i32) -> (i32, i32, i32) {
    %c0_i32 = arith.constant 0 : i32
    %c0_i32_0 = arith.constant 0 : i32
    %c0_i32_1 = arith.constant 0 : i32
    %c0_i32_2 = arith.constant 0 : i32
    return %c0_i32, %c0_i32_0, %c0_i32_1 : i32, i32, i32
  }
  func.func @transform_7(%arg0: i32) -> (i32, i32, i32) {
    %c0_i32 = arith.constant 0 : i32
    %c0_i32_0 = arith.constant 0 : i32
    %c0_i32_1 = arith.constant 0 : i32
    %c0_i32_2 = arith.constant 0 : i32
    return %c0_i32, %c0_i32_0, %c0_i32_1 : i32, i32, i32
  }
  func.func @transform_8(%arg0: i32) -> (i32, i32) {
    %c0_i32 = arith.constant 0 : i32
    %c0_i32_0 = arith.constant 0 : i32
    %c0_i32_1 = arith.constant 0 : i32
    return %c0_i32, %c0_i32_0 : i32, i32
  }
  func.func @transform_9(%arg0: i32) -> (i32, i32) {
    %c0_i32 = arith.constant 0 : i32
    %c0_i32_0 = arith.constant 0 : i32
    %c0_i32_1 = arith.constant 0 : i32
    return %c0_i32, %c0_i32_0 : i32, i32
  }
  func.func @transform_10(%arg0: i32) -> (i32, i32) {
    %c0_i32 = arith.constant 0 : i32
    %c0_i32_0 = arith.constant 0 : i32
    %c0_i32_1 = arith.constant 0 : i32
    return %c0_i32, %c0_i32_0 : i32, i32
  }
  func.func @transform_11(%arg0: i32) -> (i32, i32) {
    %c0_i32 = arith.constant 0 : i32
    %c0_i32_0 = arith.constant 0 : i32
    %c0_i32_1 = arith.constant 0 : i32
    return %c0_i32, %c0_i32_0 : i32, i32
  }
  func.func @transform_12(%arg0: i32) -> (i32, i32, i32) {
    %c0_i32 = arith.constant 0 : i32
    %c0_i32_0 = arith.constant 0 : i32
    %c0_i32_1 = arith.constant 0 : i32
    return %arg0, %c0_i32, %c0_i32_0 : i32, i32, i32
  }
}

</mosaic_0001>

<bundles_post_ra>
// kernel: tpu_custom_call.1
= control target key start
LH: loop header
LB: loop body
LE: loop exit
PB: predicated region body
PF: predicated region fallthrough
CT: control target
= control target key end

     0   :  { %v5395_v2 = vmov 0   ;;  %s7116_s0 = inlined_call_operand.vmem [shape: f32[1,1,256], index: 0, kind: input, shape index: {}]   ;;  %s7117_s1 = inlined_call_operand.vmem [shape: f32[1,1,128], index: 1, kind: input, shape index: {}]   ;;  %s7118_s2 = inlined_call_operand.vmem [shape: f32[32,2], index: 2, kind: input, shape index: {}]   ;;  %s7119_s3 = inlined_call_operand.vmem [shape: f32[32,1], index: 3, kind: input, shape index: {}]   ;;  %s7120_s4 = inlined_call_operand.vmem [shape: f32[8,32,64], index: 4, kind: input, shape index: {}]   ;;  %s7121_s5 = inlined_call_operand.vmem [shape: f32[8,32,1], index: 5, kind: input, shape index: {}]   ;;  %s7122_s6 = inlined_call_operand.vmem [shape: f32[8,64,32], index: 6, kind: input, shape index: {}]   ;;  %s7123_s7 = inlined_call_operand.vmem [shape: f32[8,64,1], index: 7, kind: input, shape index: {}]   ;;  %s7124_s8 = inlined_call_operand.vmem [shape: f32[32,32], index: 8, kind: input, shape index: {}]   ;;  %s7125_s9 = inlined_call_operand.vmem [shape: f32[32,1], index: 9, kind: input, shape index: {}]   ;;  %s7126_s10 = inlined_call_operand.vmem [shape: f32[32,32], index: 10, kind: input, shape index: {}]   ;;  %s7127_s11 = inlined_call_operand.vmem [shape: f32[32,1], index: 11, kind: input, shape index: {}]   ;;  %s7128_s12 = inlined_call_operand.hbm [shape: f32[1,32,128], index: 12, kind: output, shape index: {}]  }
   0x1   :  { %v48_v0 = vld [vmem:[%s7118_s2] sm:$0xff]  ;;  %v50_v1 = vld [vmem:[%s7118_s2 + $0x10] sm:$0xff]  ;;  %4949 = vset.pattern.permute.xlu0 %v5395_v2  ;;  %4950 = vset.pattern.permute.xlu1 %v5395_v2  ;;  %v49_v3 = vld [vmem:[%s7118_s2 + $0x8] sm:$0xff] }
   0x2   :  { %54 = vperm.xlu0 %4949, %v48_v0   ;;  %64 = vperm.xlu1 %4950, %v50_v1   ;;  %v51_v4 = vld [vmem:[%s7118_s2 + $0x18] sm:$0xff] }
   0x3   :  { %17 = vsyncpa [#allocation3], 0  ;;  %v5396_v5 = vmov 1   ;;  %v158_v6 = vld [vmem:[%s7119_s3] sm:$0xff]  ;;  %v159_v7 = vld [vmem:[%s7119_s3 + $0x8] sm:$0xff]  ;;  %v43_v10 = vlaneseq  ;;  %vm250_vm5 = vcmask 523264  }
   0x4   :  { %v161_v8 = vld [vmem:[%s7119_s3 + $0x18] sm:$0xff]  ;;  %v160_v9 = vld [vmem:[%s7119_s3 + $0x10] sm:$0xff]  ;;  %v42_v14 = vld [vmem:[%s7116_s0] sm:$0x3]  ;;  %s5397_s3 = smov 1   ;;  %vm456_vm6 = vcmask 261120  }
   0x5   :  { %v5494_v11 = vshrl.u32 %v43_v10, 7  ;;  %v5521_v35 = vand.u32 127, %v43_v10  ;;  %s5399_s16 = smov 2   ;;  %s5400_s2 = smov 4  }
   0x6   :  { %59 = vperm.xlu0 %4949, %v49_v3   ;;  %69 = vperm.xlu1 %4950, %v51_v4   ;;  %s5401_s0 = smov 8   ;;  %s5403_s14 = smov [#allocation2]  }
   0x7   :  { %v75_v12 = vsub.s32 0, %v5494_v11  ;;  %v79_v13 = vsub.s32 1, %v5494_v11  ;;  %v45_v37 = vadd.s32 128, %v5521_v35  ;;  %vm107_vm0 = vcmp.lt.s32.totalorder %v5521_v35, 1  ;;  %s4047_s15 = sshll.u32 %s5403_s14, 4  ;;  %s4048_s15 = int_to_ptr.vmem [resolvable:$true] %s4047_s15 }
   0x8   :  { %vm116_vm1 = vcmp.ge.s32.totalorder %v5521_v35, 1  ;;  %vm626_vm7 = vcmp.lt.s32.totalorder %v5521_v35, 2  ;;  %vm635_vm9 = vcmp.ge.s32.totalorder %v5521_v35, 2  ;;  %vm1051_vm12 = vcmp.lt.s32.totalorder %v5521_v35, 4  ;;  %p5376_p1 = scmp.lt.s32.totalorder %s4048_s15, %s4048_s15 }
   0x9   :  { %v5501_v15 = vrot.slane %v42_v14, %v75_v12  ;;  %v5503_v16 = vrot.slane %v42_v14, %v79_v13  ;;  %v5524_v39 = vand.u32 127, %v45_v37  ;;  %v410_v37 = vld [vmem:[%s7123_s7 + $0x10] sm:$0xff]  ;;  %vm5641_vm4 = vmpackc.low %vm116_vm1, %vm116_vm1  ;;  %vm1060_vm14 = vcmp.ge.s32.totalorder %v5521_v35, 4 }
   0xa   :  { %4952 = vset.pattern.permute.xlu1 %v5396_v5  ;;  %4951 = vset.pattern.permute.xlu0 %v5396_v5  ;;  %vm5804_vm11 = vmpackc.low %vm635_vm9, %vm635_vm9  ;;  %vm1485_vm9 = vcmp.ge.s32.totalorder %v5521_v35, 8 }
   0xb   :  { %131 = vperm.xlu1 %4952, %v49_v3   ;;  %127 = vperm.xlu0 %4951, %v48_v0   ;;  %vm117_vm2 = vcmp.ge.s32.totalorder %v5524_v39, 1  ;;  %vm636_vm8 = vcmp.ge.s32.totalorder %v5524_v39, 2  ;;  %vm1061_vm13 = vcmp.ge.s32.totalorder %v5524_v39, 4 }
   0xc   :  { %vm5630_vm3 = vmpackc.low %vm117_vm2, %vm117_vm2 }
   0xd   :  { %vm5800_vm10 = vmpackc.low %vm636_vm8, %vm636_vm8  ;;  %vm1486_vm8 = vcmp.ge.s32.totalorder %v5524_v39, 8 }
   0xe   :  { %vm5959_vm15 = vmpackc.low %vm1061_vm13, %vm1061_vm13 }
   0xf   :  { %135 = vperm.xlu1 %4952, %v50_v1   ;;  %139 = vperm.xlu0 %4951, %v51_v4   ;;  %vm6122_vm13 = vmpackc.low %vm1486_vm8, %vm1486_vm8 }
  0x13   :  { %4953 = vset.pattern.permute.xlu1 %v5395_v2  ;;  %4954 = vset.pattern.permute.xlu0 %v5395_v2 }
  0x14   :  { %164 = vperm.xlu1 %4953, %v158_v6   ;;  %169 = vperm.xlu0 %4954, %v159_v7  }
  0x18   :  { %179 = vperm.xlu1 %4953, %v161_v8   ;;  %174 = vperm.xlu0 %4954, %v160_v9  }
  0x81   :  { %v55_v17 = vpop.permute.xlu0 %54  ;;  %v65_v18 = vpop.permute.xlu1 %64 }
  0x82   :  { %v83_v19 = vmul.f32 %v5501_v15, %v55_v17  ;;  %v84_v20 = vmul.f32 %v5503_v16, %v55_v17  ;;  %v87_v21 = vmul.f32 %v5501_v15, %v65_v18  ;;  %v88_v24 = vmul.f32 %v5503_v16, %v65_v18 }
  0x84   :  { %99 = vrot.lane.b32.xlu0 %v84_v20, %s5397_s3  ;;  %91 = vrot.lane.b32.xlu1 %v83_v19, %s5397_s3 }
  0x85   :  { %v60_v22 = vpop.permute.xlu0 %59  ;;  %v70_v26 = vpop.permute.xlu1 %69 }
  0x86   :  { %v85_v23 = vmul.f32 %v5501_v15, %v60_v22  ;;  %v86_v25 = vmul.f32 %v5503_v16, %v60_v22  ;;  %v89_v27 = vmul.f32 %v5501_v15, %v70_v26  ;;  %v90_v28 = vmul.f32 %v5503_v16, %v70_v26 }
  0x88   :  { %95 = vrot.lane.b32.xlu0 %v87_v21, %s5397_s3  ;;  %93 = vrot.lane.b32.xlu1 %v85_v23, %s5397_s3 }
  0x8a   :  { %v128_v29 = vpop.permute.xlu0 %127  ;;  %v132_v30 = vpop.permute.xlu1 %131 }
  0x8b   :  { %v142_v47 = vmul.f32 %v128_v29, %v5501_v15  ;;  %v143_v49 = vmul.f32 %v128_v29, %v5503_v16  ;;  %v144_v50 = vmul.f32 %v132_v30, %v5501_v15  ;;  %v145_v54 = vmul.f32 %v132_v30, %v5503_v16  ;;  %v226_v29 = vld [vmem:[%s7121_s5] sm:$0xff]  ;;  %v227_v30 = vld [vmem:[%s7121_s5 + $0x8] sm:$0xff] }
  0x8c   :  { %103 = vrot.lane.b32.xlu0 %v88_v24, %s5397_s3  ;;  %101 = vrot.lane.b32.xlu1 %v86_v25, %s5397_s3 }
  0x8e   :  { %v140_v31 = vpop.permute.xlu0 %139  ;;  %v136_v32 = vpop.permute.xlu1 %135 }
  0x8f   :  { %v146_v6 = vmul.f32 %v136_v32, %v5501_v15  ;;  %v147_v8 = vmul.f32 %v136_v32, %v5503_v16  ;;  %v148_v12 = vmul.f32 %v140_v31, %v5501_v15  ;;  %v149_v13 = vmul.f32 %v140_v31, %v5503_v16  ;;  %v228_v32 = vld [vmem:[%s7121_s5 + $0x10] sm:$0xff] }
  0x90   :  { %97 = vrot.lane.b32.xlu1 %v89_v27, %s5397_s3  ;;  %v5398_v31 = vmov 0.0  }
  0x91   :  { %327 = vmatprep.mubr.f32.mxu0 %v5398_v31  ;;  %970 = vmatprep.mubr.f32.mxu1 %v5398_v31 }
  0x93   :  { %v170_v33 = vpop.permute.xlu0 %169  ;;  %v165_v34 = vpop.permute.xlu1 %164 }
  0x94   :  { %105 = vrot.lane.b32.xlu1 %v90_v28, %s5397_s3 }
  0x97   :  { %v175_v36 = vpop.permute.xlu0 %174  ;;  %v180_v38 = vpop.permute.xlu1 %179 }
  0xf6   :  { %v100_v40 = vpop.permute.xlu0 %99  ;;  %v92_v41 = vpop.permute.xlu1 %91 }
  0xf7   :  { %v112_v42 = vsel %vm107_vm0, %v100_v40, %v92_v41  ;;  %v108_v43 = vsel %vm107_vm0, %v92_v41, %v100_v40 }
  0xf8   :  { %v118_v46 = vsel %vm116_vm1, %v112_v42, 0.0  ;;  %v119_v48 = vsel %vm117_vm2, %v108_v43, 0.0 }
  0xf9   :  { %v150_v51 = vadd.f32 %v142_v47, %v118_v46  ;;  %v151_v55 = vadd.f32 %v143_v49, %v119_v48  ;;  %v4210_v48 = vld [vmem:[%s7120_s4 + $0x80] sm:$0xff] }
  0xfa   :  { %v96_v44 = vpop.permute.xlu0 %95  ;;  %v94_v45 = vpop.permute.xlu1 %93 }
  0xfb   :  { %v5553_v0 = vadd.f32 %v165_v34, %v150_v51  ;;  %v5555_v2 = vadd.f32 %v165_v34, %v151_v55  ;;  %v408_v34 = vld [vmem:[%s7123_s7] sm:$0xff] }
  0xfe   :  { %v104_v52 = vpop.permute.xlu0 %103  ;;  %v102_v53 = vpop.permute.xlu1 %101 }
  0xff   :  { %v109_v56 = vsel %vm107_vm0, %v94_v45, %v102_v53  ;;  %v113_v57 = vsel %vm107_vm0, %v102_v53, %v94_v45  ;;  %v114_v58 = vsel %vm107_vm0, %v104_v52, %v96_v44  ;;  %v110_v61 = vsel %vm107_vm0, %v96_v44, %v104_v52  ;;  %v4211_v53 = vld [vmem:[%s7120_s4 + $0x88] sm:$0xff] }
 0x100   :  { %v120_v59 = vsel %vm116_vm1, %v113_v57, 0.0  ;;  %v121_v60 = vsel %vm117_vm2, %v109_v56, 0.0  ;;  %v122_v3 = vsel %vm116_vm1, %v114_v58, 0.0  ;;  %v123_v7 = vsel %vm117_vm2, %v110_v61, 0.0 }
 0x101   :  { %v152_v62 = vadd.f32 %v144_v50, %v120_v59  ;;  %v153_v63 = vadd.f32 %v145_v54, %v121_v60  ;;  %v154_v14 = vadd.f32 %v146_v6, %v122_v3  ;;  %v155_v18 = vadd.f32 %v147_v8, %v123_v7 }
 0x102   :  { %v98_v1 = vpop.permute.xlu1 %97 }
 0x103   :  { %v5559_v4 = vadd.f32 %v170_v33, %v152_v62  ;;  %v5561_v5 = vadd.f32 %v170_v33, %v153_v63  ;;  %v5583_v23 = vadd.f32 %v175_v36, %v154_v14  ;;  %v5585_v24 = vadd.f32 %v175_v36, %v155_v18  ;;  %v229_v33 = vld [vmem:[%s7121_s5 + $0x18] sm:$0xff]  ;;  %v409_v36 = vld [vmem:[%s7123_s7 + $0x8] sm:$0xff] }
 0x104   :  { %v225_v14 = vld [vmem:[%s7120_s4 + $0x18] sm:$0xff] }
 0x105   :  { %v4955_v9 = vpack.i.bf16 %v5559_v4, %v5553_v0  ;;  %v4960_v10 = vpack.i.bf16 %v5561_v5, %v5555_v2  ;;  %v4559_v6 = vpack.c.bf16 %v5561_v5, %v5555_v2  ;;  %v4561_v7 = vpack.c.bf16 %v5559_v4, %v5553_v0 }
 0x106   :  { %v106_v17 = vpop.permute.xlu1 %105 }
 0x107   :  { %v111_v19 = vsel %vm107_vm0, %v98_v1, %v106_v17  ;;  %v115_v20 = vsel %vm107_vm0, %v106_v17, %v98_v1  ;;  %4956 = vrot.lane.b32.xlu0 %v4955_v9, %s5397_s3  ;;  %4961 = vrot.lane.b32.xlu1 %v4960_v10, %s5397_s3  ;;  %v222_v10 = vld [vmem:[%s7120_s4] sm:$0xff] }
 0x108   :  { %v124_v21 = vsel %vm116_vm1, %v115_v20, 0.0  ;;  %v125_v15 = vsel %vm117_vm2, %v111_v19, 0.0  ;;  %vm5963_vm1 = vmpackc.low %vm1060_vm14, %vm1060_vm14  ;;  %vm1476_vm2 = vcmp.lt.s32.totalorder %v5521_v35, 8 }
 0x109   :  { %v156_v16 = vadd.f32 %v148_v12, %v124_v21  ;;  %v157_v22 = vadd.f32 %v149_v13, %v125_v15  ;;  %v223_v12 = vld [vmem:[%s7120_s4 + $0x8] sm:$0xff]  ;;  %v224_v13 = vld [vmem:[%s7120_s4 + $0x10] sm:$0xff]  ;;  %vm6126_vm14 = vmpackc.low %vm1485_vm9, %vm1485_vm9 }
 0x10b   :  { %v5587_v25 = vadd.f32 %v180_v38, %v156_v16  ;;  %v5589_v26 = vadd.f32 %v180_v38, %v157_v22  ;;  %v411_v38 = vld [vmem:[%s7123_s7 + $0x18] sm:$0xff] }
 0x10d   :  { %v4965_v27 = vpack.i.bf16 %v5587_v25, %v5583_v23  ;;  %v4970_v28 = vpack.i.bf16 %v5589_v26, %v5585_v24  ;;  %v4563_v8 = vpack.c.bf16 %v5589_v26, %v5585_v24  ;;  %v4565_v9 = vpack.c.bf16 %v5587_v25, %v5583_v23 }
 0x10f   :  { %4966 = vrot.lane.b32.xlu0 %v4965_v27, %s5397_s3  ;;  %4971 = vrot.lane.b32.xlu1 %v4970_v28, %s5397_s3 }
 0x113   :  { %232 = vperm.xlu0 %4954, %v226_v29   ;;  %237 = vperm.xlu1 %4953, %v227_v30  }
 0x117   :  { %242 = vperm.xlu0 %4954, %v228_v32   ;;  %247 = vperm.xlu1 %4953, %v229_v33  }
 0x11b   :  { %418 = vperm.xlu0 %4954, %v408_v34   ;;  %423 = vperm.xlu1 %4953, %v409_v36  }
 0x11f   :  { %428 = vperm.xlu0 %4954, %v410_v37   ;;  %433 = vperm.xlu1 %4953, %v411_v38  }
 0x179   :  { %v4957_v40 = vpop.permute.xlu0 %4956  ;;  %v4962_v41 = vpop.permute.xlu1 %4961 }
 0x17a   :  { %v4959_v42 = vunpack.i.h.bf16 %v4957_v40  ;;  %v4958_v43 = vunpack.i.l.bf16 %v4957_v40  ;;  %v4964_v44 = vunpack.i.h.bf16 %v4962_v41  ;;  %v4963_v45 = vunpack.i.l.bf16 %v4962_v41 }
 0x17c   :  { %v206_v46 = vsel %vm107_vm0, %v4958_v43, %v4963_v45  ;;  %v207_v47 = vsel %vm107_vm0, %v4959_v42, %v4964_v44  ;;  %v210_v49 = vsel %vm107_vm0, %v4963_v45, %v4958_v43  ;;  %v211_v50 = vsel %vm107_vm0, %v4964_v44, %v4959_v42 }
 0x17d   :  { %v4547_v51 = vpack.c.bf16 %v207_v47, %v206_v46  ;;  %v4550_v52 = vpack.c.bf16 %v211_v50, %v210_v49 }
 0x17f   :  { %4549 = vmatprep.subr.msk.bf16.mxu0 %vm5630_vm3, %v4547_v51 }
 0x180   :  { %4552 = vmatpush1.bf16.msk.msra.mxu0 %vm5641_vm4, %v4550_v52 }
 0x181   :  { %v4967_v54 = vpop.permute.xlu0 %4966  ;;  %v4972_v55 = vpop.permute.xlu1 %4971 }
 0x182   :  { %v4969_v56 = vunpack.i.h.bf16 %v4967_v54  ;;  %v4968_v57 = vunpack.i.l.bf16 %v4967_v54  ;;  %v4974_v58 = vunpack.i.h.bf16 %v4972_v55  ;;  %v4973_v59 = vunpack.i.l.bf16 %v4972_v55 }
 0x184   :  { %v209_v60 = vsel %vm107_vm0, %v4969_v56, %v4974_v58  ;;  %v213_v61 = vsel %vm107_vm0, %v4974_v58, %v4969_v56  ;;  %v208_v62 = vsel %vm107_vm0, %v4968_v57, %v4973_v59  ;;  %v212_v63 = vsel %vm107_vm0, %v4973_v59, %v4968_v57 }
 0x185   :  { %v4553_v1 = vpack.c.bf16 %v209_v60, %v208_v62  ;;  %v4556_v3 = vpack.c.bf16 %v213_v61, %v212_v63 }
 0x187   :  { %4555 = vmatprep.subr.msk.bf16.mxu0 %vm5630_vm3, %v4553_v1 }
 0x188   :  { %4558 = vmatpush1.bf16.msk.msra.mxu0 %vm5641_vm4, %v4556_v3 }
 0x189   :  { %4560 = vmatprep.subr.bf16.mxu0 %v4559_v6 }
 0x18c   :  { %4562 = vmatpush1.bf16.msra.mxu0 %v4561_v7 }
 0x18d   :  { %4564 = vmatprep.subr.bf16.mxu0 %v4563_v8 }
 0x190   :  { %4566 = vmatpush1.bf16.msra.mxu0 %v4565_v9 }
 0x192   :  { %v233_v17 = vpop.permute.xlu0 %232  ;;  %v238_v16 = vpop.permute.xlu1 %237 }
 0x193   :  { %4066 = vmatmul.mubr.msk.f32.vlgmr.msra.gmra.mrb[0].mxu0 %vm250_vm5, %v222_v10 }
 0x194   :  { %333 = vmatprep.mubr.f32.mxu0 %v5398_v31 }
 0x196   :  { %v243_v33 = vpop.permute.xlu0 %242  ;;  %v248_v42 = vpop.permute.xlu1 %247 }
 0x197   :  { %4067 = vmatmul.mubr.msk.f32.gmra.mrb[2].mxu0 %vm250_vm5, %v223_v12 }
 0x198   :  { %339 = vmatprep.mubr.f32.mxu0 %v5398_v31 }
 0x19b   :  { %4068 = vmatmul.mubr.msk.f32.gmra.mrb[4].mxu0 %vm250_vm5, %v224_v13 }
 0x19c   :  { %345 = vmatprep.mubr.f32.mxu0 %v5398_v31 }
 0x19f   :  { %4069 = vmatmul.mubr.msk.f32.gmra.mrb[6].mxu0 %vm250_vm5, %v225_v14 }
 0x1a0   :  { %545 = vmatprep.mubr.f32.mxu0 %v5398_v31 }
 0x266   :  { %v329_v18 = vpop.f32.mrb[0].mxu0 }
 0x267   :  { %v330_v19 = vadd.f32 %v329_v18, %v233_v17  ;;  %v331_v20 = vpop.f32.mrb[1].mxu0 }
 0x268   :  { %v332_v21 = vadd.f32 %v331_v20, %v233_v17 }
 0x269   :  { %v360_v15 = vmul.f32 0.5, %v330_v19 }
 0x26a   :  { %v361_v22 = vmul.f32 0.5, %v332_v21  ;;  %v335_v27 = vpop.f32.mrb[2].mxu0 }
 0x26b   :  { %5115 = vtanh.f32 %v360_v15  ;;  %v336_v28 = vadd.f32 %v335_v27, %v238_v16  ;;  %v337_v29 = vpop.f32.mrb[3].mxu0 }
 0x26c   :  { %5117 = vtanh.f32 %v361_v22  ;;  %v338_v30 = vadd.f32 %v337_v29, %v238_v16 }
 0x26d   :  { %5119 = vtanh.f32 %v330_v19  ;;  %v362_v32 = vmul.f32 0.5, %v336_v28 }
 0x26e   :  { %5121 = vtanh.f32 %v332_v21  ;;  %v363_v34 = vmul.f32 0.5, %v338_v30  ;;  %v341_v36 = vpop.f32.mrb[4].mxu0 }
 0x26f   :  { %5123 = vtanh.f32 %v362_v32  ;;  %v342_v37 = vadd.f32 %v341_v36, %v243_v33  ;;  %v343_v38 = vpop.f32.mrb[5].mxu0 }
 0x270   :  { %5125 = vtanh.f32 %v363_v34  ;;  %v344_v40 = vadd.f32 %v343_v38, %v243_v33 }
 0x271   :  { %5127 = vtanh.f32 %v336_v28  ;;  %v364_v41 = vmul.f32 0.5, %v342_v37 }
 0x272   :  { %5129 = vtanh.f32 %v338_v30  ;;  %v365_v43 = vmul.f32 0.5, %v344_v40  ;;  %v347_v44 = vpop.f32.mrb[6].mxu0 }
 0x273   :  { %5131 = vtanh.f32 %v364_v41  ;;  %v348_v45 = vadd.f32 %v347_v44, %v248_v42  ;;  %v349_v46 = vpop.f32.mrb[7].mxu0  ;;  %v400_v44 = vld [vmem:[%s7122_s6] sm:$0xff] }
 0x274   :  { %5133 = vtanh.f32 %v365_v43  ;;  %v350_v47 = vadd.f32 %v349_v46, %v248_v42  ;;  %v402_v46 = vld [vmem:[%s7122_s6 + $0x10] sm:$0xff] }
 0x275   :  { %v5116_v49 = vpop.eup %5115  ;;  %v366_v50 = vmul.f32 0.5, %v348_v45 }
 0x276   :  { %v5118_v51 = vpop.eup %5117  ;;  %v376_v52 = vadd.f32 1.0, %v5116_v49  ;;  %v367_v54 = vmul.f32 0.5, %v350_v47 }
 0x277   :  { %v5120_v55 = vpop.eup %5119  ;;  %v377_v56 = vadd.f32 1.0, %v5118_v51  ;;  %5135 = vtanh.f32 %v366_v50  ;;  %v419_v51 = vpop.permute.xlu0 %418 }
 0x278   :  { %v5122_v57 = vpop.eup %5121  ;;  %5137 = vtanh.f32 %v367_v54  ;;  %v384_v60 = vmul.f32 0.5, %v376_v52  ;;  %v424_v54 = vpop.permute.xlu1 %423 }
 0x279   :  { %v5124_v58 = vpop.eup %5123  ;;  %5139 = vtanh.f32 %v342_v37  ;;  %v385_v63 = vmul.f32 0.5, %v377_v56 }
 0x27a   :  { %v5126_v59 = vpop.eup %5125  ;;  %v378_v61 = vadd.f32 1.0, %v5124_v58  ;;  %5141 = vtanh.f32 %v344_v40  ;;  %v392_v10 = vmul.f32 %v5120_v55, %v384_v60  ;;  %v404_v60 = vld [vmem:[%s7122_s6 + $0x20] sm:$0xff] }
 0x27b   :  { %v5128_v62 = vpop.eup %5127  ;;  %v379_v1 = vadd.f32 1.0, %v5126_v59  ;;  %5143 = vtanh.f32 %v348_v45  ;;  %v393_v17 = vmul.f32 %v5122_v57, %v385_v63  ;;  %v401_v45 = vld [vmem:[%s7122_s6 + $0x8] sm:$0xff] }
 0x27c   :  { %v5130_v3 = vpop.eup %5129  ;;  %v386_v6 = vmul.f32 0.5, %v378_v61  ;;  %5145 = vtanh.f32 %v350_v47  ;;  %v403_v47 = vld [vmem:[%s7122_s6 + $0x18] sm:$0xff] }
 0x27d   :  { %v5132_v7 = vpop.eup %5131  ;;  %v387_v8 = vmul.f32 0.5, %v379_v1 }
 0x27e   :  { %v5134_v9 = vpop.eup %5133  ;;  %v394_v12 = vmul.f32 %v5128_v62, %v386_v6  ;;  %v380_v13 = vadd.f32 1.0, %v5132_v7 }
 0x27f   :  { %v381_v14 = vadd.f32 1.0, %v5134_v9  ;;  %v395_v18 = vmul.f32 %v5130_v3, %v387_v8  ;;  %v405_v8 = vld [vmem:[%s7122_s6 + $0x28] sm:$0xff] }
 0x280   :  { %v4569_v19 = vpack.c.bf16 %v394_v12, %v392_v10  ;;  %v388_v16 = vmul.f32 0.5, %v380_v13 }
 0x281   :  { %v5136_v20 = vpop.eup %5135  ;;  %v4567_v21 = vpack.c.bf16 %v395_v18, %v393_v17  ;;  %v389_v28 = vmul.f32 0.5, %v381_v14  ;;  %v406_v17 = vld [vmem:[%s7122_s6 + $0x30] sm:$0xff] }
 0x282   :  { %v5138_v15 = vpop.eup %5137  ;;  %v382_v22 = vadd.f32 1.0, %v5136_v20 }
 0x283   :  { %v5140_v27 = vpop.eup %5139  ;;  %v383_v29 = vadd.f32 1.0, %v5138_v15  ;;  %4568 = vmatprep.subr.bf16.mxu0 %v4567_v21 }
 0x284   :  { %v5142_v30 = vpop.eup %5141  ;;  %v390_v32 = vmul.f32 0.5, %v382_v22  ;;  %4570 = vmatpush1.bf16.msra.mxu0 %v4569_v19  ;;  %v396_v37 = vmul.f32 %v5140_v27, %v388_v16  ;;  %v4084_v16 = vld [vmem:[%s7121_s5 + $0x30] sm:$0xff]  ;;  %v4085_v22 = vld [vmem:[%s7121_s5 + $0x38] sm:$0xff]  ;;  %v4106_v27 = vld [vmem:[%s7123_s7 + $0x40] sm:$0xff] }
 0x285   :  { %v5144_v33 = vpop.eup %5143  ;;  %v391_v34 = vmul.f32 0.5, %v383_v29  ;;  %v397_v40 = vmul.f32 %v5142_v30, %v389_v28  ;;  %v4107_v28 = vld [vmem:[%s7123_s7 + $0x48] sm:$0xff]  ;;  %v4108_v29 = vld [vmem:[%s7123_s7 + $0x50] sm:$0xff]  ;;  %v4109_v30 = vld [vmem:[%s7123_s7 + $0x58] sm:$0xff] }
 0x286   :  { %v5146_v36 = vpop.eup %5145  ;;  %v398_v38 = vmul.f32 %v5144_v33, %v390_v32 }
 0x287   :  { %v399_v41 = vmul.f32 %v5146_v36, %v391_v34 }
 0x288   :  { %v4573_v42 = vpack.c.bf16 %v398_v38, %v396_v37 }
 0x289   :  { %v4571_v43 = vpack.c.bf16 %v399_v41, %v397_v40 }
 0x28b   :  { %4572 = vmatprep.subr.bf16.mxu0 %v4571_v43 }
 0x28c   :  { %4574 = vmatpush1.bf16.msra.mxu0 %v4573_v42 }
 0x28f   :  { %4070 = vmatmul.mubr.msk.f32.vlgmr.msra.gmra.mrb[8].mxu0 %vm456_vm6, %v400_v44  ;;  %v4254_v44 = vld [vmem:[%s7120_s4 + $0xa0] sm:$0xff] }
 0x290   :  { %551 = vmatprep.mubr.f32.mxu0 %v5398_v31 }
 0x293   :  { %4071 = vmatmul.mubr.msk.f32.gmra.mrb[10].mxu0 %vm456_vm6, %v401_v45 }
 0x294   :  { %557 = vmatprep.mubr.f32.mxu0 %v5398_v31 }
 0x297   :  { %4072 = vmatmul.mubr.msk.f32.gmra.mrb[12].mxu0 %vm456_vm6, %v402_v46 }
 0x298   :  { %563 = vmatprep.mubr.f32.mxu0 %v5398_v31 }
 0x29b   :  { %4073 = vmatmul.mubr.msk.f32.gmra.mrb[14].mxu0 %vm456_vm6, %v403_v47  ;;  %v4255_v47 = vld [vmem:[%s7120_s4 + $0xa8] sm:$0xff] }
 0x29c   :  { %569 = vmatprep.mubr.f32.mxu0 %v5398_v31 }
 0x29f   :  { %4074 = vmatmul.mubr.msk.f32.gmra.mrb[16].mxu0 %vm456_vm6, %v404_v60 }
 0x2a0   :  { %575 = vmatprep.mubr.f32.mxu0 %v5398_v31 }
 0x2a3   :  { %4075 = vmatmul.mubr.msk.f32.gmra.mrb[18].mxu0 %vm456_vm6, %v405_v8  ;;  %v4078_v8 = vld [vmem:[%s7120_s4 + $0x20] sm:$0xff] }
 0x2a4   :  { %581 = vmatprep.mubr.f32.mxu0 %v5398_v31 }
 0x2a7   :  { %4076 = vmatmul.mubr.msk.f32.gmra.mrb[20].mxu0 %vm456_vm6, %v406_v17 }
 0x2a8   :  { %587 = vmatprep.mubr.f32.mxu0 %v5398_v31 }
 0x362   :  { %v547_v49 = vpop.f32.mrb[8].mxu0 }
 0x363   :  { %v549_v50 = vpop.f32.mrb[9].mxu0  ;;  %v548_v52 = vadd.f32 %v547_v49, %v419_v51 }
 0x364   :  { %v550_v55 = vadd.f32 %v549_v50, %v419_v51 }
 0x365   :  { %v5713_v61 = vadd.f32 %v548_v52, %v5553_v0  ;;  %v429_v0 = vpop.permute.xlu0 %428 }
 0x366   :  { %v553_v56 = vpop.f32.mrb[10].mxu0  ;;  %v5720_v63 = vadd.f32 %v550_v55, %v5555_v2 }
 0x367   :  { %v554_v57 = vadd.f32 %v553_v56, %v424_v54  ;;  %v555_v58 = vpop.f32.mrb[11].mxu0 }
 0x368   :  { %v556_v59 = vadd.f32 %v555_v58, %v424_v54 }
 0x369   :  { %v5716_v62 = vadd.f32 %v554_v57, %v5559_v4 }
 0x36a   :  { %v5723_v1 = vadd.f32 %v556_v59, %v5561_v5  ;;  %v559_v3 = vpop.f32.mrb[12].mxu0  ;;  %v434_v5 = vpop.permute.xlu1 %433 }
 0x36b   :  { %v561_v6 = vpop.f32.mrb[13].mxu0  ;;  %v4975_v7 = vpack.i.bf16 %v5716_v62, %v5713_v61  ;;  %v560_v2 = vadd.f32 %v559_v3, %v429_v0 }
 0x36c   :  { %v4980_v4 = vpack.i.bf16 %v5723_v1, %v5720_v63  ;;  %v562_v9 = vadd.f32 %v561_v6, %v429_v0  ;;  %v4587_v6 = vpack.c.bf16 %v5723_v1, %v5720_v63 }
 0x36d   :  { %4976 = vrot.lane.b32.xlu0 %v4975_v7, %s5399_s16  ;;  %v5741_v18 = vadd.f32 %v560_v2, %v5583_v23  ;;  %v4589_v7 = vpack.c.bf16 %v5716_v62, %v5713_v61  ;;  %v4079_v2 = vld [vmem:[%s7120_s4 + $0x28] sm:$0xff] }
 0x36e   :  { %v565_v10 = vpop.f32.mrb[14].mxu0  ;;  %4981 = vrot.lane.b32.xlu1 %v4980_v4, %s5399_s16  ;;  %v5748_v20 = vadd.f32 %v562_v9, %v5585_v24  ;;  %v4082_v24 = vld [vmem:[%s7121_s5 + $0x20] sm:$0xff]  ;;  %v4081_v9 = vld [vmem:[%s7120_s4 + $0x38] sm:$0xff] }
 0x36f   :  { %v566_v12 = vadd.f32 %v565_v10, %v434_v5  ;;  %v567_v13 = vpop.f32.mrb[15].mxu0 }
 0x370   :  { %v568_v14 = vadd.f32 %v567_v13, %v434_v5  ;;  %v4080_v5 = vld [vmem:[%s7120_s4 + $0x30] sm:$0xff] }
 0x371   :  { %v5744_v19 = vadd.f32 %v566_v12, %v5587_v25  ;;  %v407_v25 = vld [vmem:[%s7122_s6 + $0x38] sm:$0xff] }
 0x372   :  { %v5751_v21 = vadd.f32 %v568_v14, %v5589_v26  ;;  %4077 = vmatmul.mubr.msk.f32.gmra.mrb[22].mxu0 %vm456_vm6, %v407_v25  ;;  %v4083_v26 = vld [vmem:[%s7121_s5 + $0x28] sm:$0xff]  ;;  %v5852_v10 = vpop.f32.mrb[16].mxu0 }
 0x373   :  { %v4985_v15 = vpack.i.bf16 %v5744_v19, %v5741_v18  ;;  %751 = vmatprep.mubr.f32.mxu0 %v5398_v31  ;;  %v4593_v4 = vpack.c.bf16 %v5744_v19, %v5741_v18  ;;  %v5854_v12 = vpop.f32.mrb[17].mxu0 }
 0x374   :  { %v4990_v23 = vpack.i.bf16 %v5751_v21, %v5748_v20  ;;  %v4591_v0 = vpack.c.bf16 %v5751_v21, %v5748_v20 }
 0x375   :  { %4986 = vrot.lane.b32.xlu0 %v4985_v15, %s5399_s16 }
 0x376   :  { %4991 = vrot.lane.b32.xlu1 %v4990_v23, %s5399_s16  ;;  %v5856_v13 = vpop.f32.mrb[18].mxu0 }
 0x377   :  { %v5858_v14 = vpop.f32.mrb[19].mxu0 }
 0x379   :  { %657 = vperm.xlu0 %4954, %v4082_v24  }
 0x37a   :  { %662 = vperm.xlu1 %4953, %v4083_v26   ;;  %v5860_v17 = vpop.f32.mrb[20].mxu0 }
 0x37b   :  { %v5862_v15 = vpop.f32.mrb[21].mxu0 }
 0x37d   :  { %667 = vperm.xlu0 %4954, %v4084_v16  }
 0x37e   :  { %672 = vperm.xlu1 %4953, %v4085_v22  }
 0x381   :  { %844 = vperm.xlu0 %4954, %v4106_v27  }
 0x382   :  { %849 = vperm.xlu1 %4953, %v4107_v28  }
 0x385   :  { %854 = vperm.xlu0 %4954, %v4108_v29  }
 0x386   :  { %859 = vperm.xlu1 %4953, %v4109_v30  }
 0x3df   :  { %v4977_v32 = vpop.permute.xlu0 %4976 }
 0x3e0   :  { %v4979_v33 = vunpack.i.h.bf16 %v4977_v32  ;;  %v4978_v34 = vunpack.i.l.bf16 %v4977_v32  ;;  %v4982_v36 = vpop.permute.xlu1 %4981 }
 0x3e1   :  { %v4984_v37 = vunpack.i.h.bf16 %v4982_v36  ;;  %v4983_v38 = vunpack.i.l.bf16 %v4982_v36 }
 0x3e3   :  { %v627_v40 = vsel %vm626_vm7, %v4978_v34, %v4983_v38  ;;  %v628_v41 = vsel %vm626_vm7, %v4979_v33, %v4984_v37  ;;  %v631_v42 = vsel %vm626_vm7, %v4983_v38, %v4978_v34  ;;  %v632_v43 = vsel %vm626_vm7, %v4984_v37, %v4979_v33 }
 0x3e4   :  { %v4578_v45 = vpack.c.bf16 %v632_v43, %v631_v42  ;;  %v4575_v46 = vpack.c.bf16 %v628_v41, %v627_v40 }
 0x3e6   :  { %4577 = vmatprep.subr.msk.bf16.mxu0 %vm5800_vm10, %v4575_v46 }
 0x3e7   :  { %v4987_v49 = vpop.permute.xlu0 %4986  ;;  %4580 = vmatpush1.bf16.msk.msra.mxu0 %vm5804_vm11, %v4578_v45 }
 0x3e8   :  { %v4989_v50 = vunpack.i.h.bf16 %v4987_v49  ;;  %v4988_v51 = vunpack.i.l.bf16 %v4987_v49  ;;  %v4992_v52 = vpop.permute.xlu1 %4991 }
 0x3e9   :  { %v4994_v54 = vunpack.i.h.bf16 %v4992_v52  ;;  %v4993_v55 = vunpack.i.l.bf16 %v4992_v52 }
 0x3eb   :  { %v629_v56 = vsel %vm626_vm7, %v4988_v51, %v4993_v55  ;;  %v630_v57 = vsel %vm626_vm7, %v4989_v50, %v4994_v54  ;;  %v633_v58 = vsel %vm626_vm7, %v4993_v55, %v4988_v51  ;;  %v634_v59 = vsel %vm626_vm7, %v4994_v54, %v4989_v50 }
 0x3ec   :  { %v4584_v60 = vpack.c.bf16 %v634_v59, %v633_v58  ;;  %v4581_v3 = vpack.c.bf16 %v630_v57, %v629_v56 }
 0x3ee   :  { %4583 = vmatprep.subr.msk.bf16.mxu0 %vm5800_vm10, %v4581_v3 }
 0x3ef   :  { %4586 = vmatpush1.bf16.msk.msra.mxu0 %vm5804_vm11, %v4584_v60 }
 0x3f0   :  { %4588 = vmatprep.subr.bf16.mxu0 %v4587_v6 }
 0x3f3   :  { %4590 = vmatpush1.bf16.msra.mxu0 %v4589_v7 }
 0x3f4   :  { %4592 = vmatprep.subr.bf16.mxu0 %v4591_v0 }
 0x3f7   :  { %4594 = vmatpush1.bf16.msra.mxu0 %v4593_v4 }
 0x3f8   :  { %v658_v24 = vpop.permute.xlu0 %657 }
 0x3f9   :  { %v663_v29 = vpop.permute.xlu1 %662 }
 0x3fa   :  { %4094 = vmatmul.mubr.msk.f32.vlgmr.msra.gmra.mrb[24].mxu0 %vm250_vm5, %v4078_v8 }
 0x3fb   :  { %757 = vmatprep.mubr.f32.mxu0 %v5398_v31 }
 0x3fc   :  { %v668_v38 = vpop.permute.xlu0 %667 }
 0x3fd   :  { %v673_v49 = vpop.permute.xlu1 %672 }
 0x3fe   :  { %4095 = vmatmul.mubr.msk.f32.gmra.mrb[26].mxu0 %vm250_vm5, %v4079_v2 }
 0x3ff   :  { %763 = vmatprep.mubr.f32.mxu0 %v5398_v31 }
 0x402   :  { %4096 = vmatmul.mubr.msk.f32.gmra.mrb[28].mxu0 %vm250_vm5, %v4080_v5 }
 0x403   :  { %769 = vmatprep.mubr.f32.mxu0 %v5398_v31 }
 0x406   :  { %4097 = vmatmul.mubr.msk.f32.gmra.mrb[30].mxu0 %vm250_vm5, %v4081_v9 }
 0x407   :  { %1176 = vmatprep.mubr.f32.mxu0 %v5398_v31 }
 0x445   :  { %v5864_v23 = vpop.f32.mrb[22].mxu0 }
 0x446   :  { %v5866_v25 = vpop.f32.mrb[23].mxu0 }
 0x4cd   :  { %v753_v26 = vpop.f32.mrb[24].mxu0 }
 0x4ce   :  { %v754_v16 = vadd.f32 %v753_v26, %v658_v24  ;;  %v755_v22 = vpop.f32.mrb[25].mxu0 }
 0x4cf   :  { %v756_v27 = vadd.f32 %v755_v22, %v658_v24 }
 0x4d0   :  { %v784_v28 = vmul.f32 0.5, %v754_v16 }
 0x4d1   :  { %v785_v30 = vmul.f32 0.5, %v756_v27  ;;  %v759_v32 = vpop.f32.mrb[26].mxu0 }
 0x4d2   :  { %5147 = vtanh.f32 %v784_v28  ;;  %v760_v33 = vadd.f32 %v759_v32, %v663_v29  ;;  %v761_v34 = vpop.f32.mrb[27].mxu0 }
 0x4d3   :  { %5149 = vtanh.f32 %v785_v30  ;;  %v762_v36 = vadd.f32 %v761_v34, %v663_v29 }
 0x4d4   :  { %5151 = vtanh.f32 %v754_v16  ;;  %v786_v37 = vmul.f32 0.5, %v760_v33 }
 0x4d5   :  { %5153 = vtanh.f32 %v756_v27  ;;  %v787_v40 = vmul.f32 0.5, %v762_v36  ;;  %v765_v41 = vpop.f32.mrb[28].mxu0 }
 0x4d6   :  { %5155 = vtanh.f32 %v786_v37  ;;  %v766_v42 = vadd.f32 %v765_v41, %v668_v38  ;;  %v767_v43 = vpop.f32.mrb[29].mxu0 }
 0x4d7   :  { %5157 = vtanh.f32 %v787_v40  ;;  %v768_v45 = vadd.f32 %v767_v43, %v668_v38 }
 0x4d8   :  { %5159 = vtanh.f32 %v760_v33  ;;  %v788_v46 = vmul.f32 0.5, %v766_v42 }
 0x4d9   :  { %5161 = vtanh.f32 %v762_v36  ;;  %v789_v50 = vmul.f32 0.5, %v768_v45  ;;  %v771_v51 = vpop.f32.mrb[30].mxu0 }
 0x4da   :  { %5163 = vtanh.f32 %v788_v46  ;;  %v772_v52 = vadd.f32 %v771_v51, %v673_v49  ;;  %v773_v54 = vpop.f32.mrb[31].mxu0 }
 0x4db   :  { %5165 = vtanh.f32 %v789_v50  ;;  %v774_v55 = vadd.f32 %v773_v54, %v673_v49 }
 0x4dc   :  { %v5148_v56 = vpop.eup %5147  ;;  %v790_v57 = vmul.f32 0.5, %v772_v52 }
 0x4dd   :  { %v5150_v58 = vpop.eup %5149  ;;  %v800_v59 = vadd.f32 1.0, %v5148_v56  ;;  %v791_v60 = vmul.f32 0.5, %v774_v55 }
 0x4de   :  { %v5152_v3 = vpop.eup %5151  ;;  %5167 = vtanh.f32 %v790_v57  ;;  %v801_v6 = vadd.f32 1.0, %v5150_v58 }
 0x4df   :  { %v5154_v7 = vpop.eup %5153  ;;  %5169 = vtanh.f32 %v791_v60  ;;  %v808_v2 = vmul.f32 0.5, %v800_v59 }
 0x4e0   :  { %v5156_v0 = vpop.eup %5155  ;;  %5171 = vtanh.f32 %v766_v42  ;;  %v809_v24 = vmul.f32 0.5, %v801_v6  ;;  %v4098_v6 = vld [vmem:[%s7122_s6 + $0x40] sm:$0xff] }
 0x4e1   :  { %v5158_v4 = vpop.eup %5157  ;;  %v802_v8 = vadd.f32 1.0, %v5156_v0  ;;  %5173 = vtanh.f32 %v768_v45  ;;  %v816_v30 = vmul.f32 %v5152_v3, %v808_v2  ;;  %v4100_v0 = vld [vmem:[%s7122_s6 + $0x50] sm:$0xff] }
 0x4e2   :  { %v5160_v5 = vpop.eup %5159  ;;  %5175 = vtanh.f32 %v772_v52  ;;  %v803_v9 = vadd.f32 1.0, %v5158_v4  ;;  %v817_v34 = vmul.f32 %v5154_v7, %v809_v24  ;;  %v4099_v7 = vld [vmem:[%s7122_s6 + $0x48] sm:$0xff]  ;;  %v4101_v4 = vld [vmem:[%s7122_s6 + $0x58] sm:$0xff]  ;;  %v850_v24 = vpop.permute.xlu1 %849 }
 0x4e3   :  { %v5162_v26 = vpop.eup %5161  ;;  %5177 = vtanh.f32 %v774_v55  ;;  %v810_v16 = vmul.f32 0.5, %v802_v8 }
 0x4e4   :  { %v5164_v22 = vpop.eup %5163  ;;  %v811_v27 = vmul.f32 0.5, %v803_v9 }
 0x4e5   :  { %v5166_v28 = vpop.eup %5165  ;;  %v804_v29 = vadd.f32 1.0, %v5164_v22  ;;  %v818_v32 = vmul.f32 %v5160_v5, %v810_v16  ;;  %v845_v5 = vpop.permute.xlu0 %844 }
 0x4e6   :  { %v805_v33 = vadd.f32 1.0, %v5166_v28  ;;  %v819_v36 = vmul.f32 %v5162_v26, %v811_v27 }
 0x4e7   :  { %v4597_v37 = vpack.c.bf16 %v818_v32, %v816_v30  ;;  %v812_v42 = vmul.f32 0.5, %v804_v29 }
 0x4e8   :  { %v5168_v38 = vpop.eup %5167  ;;  %v4595_v40 = vpack.c.bf16 %v819_v36, %v817_v34  ;;  %v813_v46 = vmul.f32 0.5, %v805_v33 }
 0x4e9   :  { %v5170_v41 = vpop.eup %5169  ;;  %v806_v43 = vadd.f32 1.0, %v5168_v38  ;;  %v855_v38 = vpop.permute.xlu0 %854 }
 0x4ea   :  { %v5172_v45 = vpop.eup %5171  ;;  %v807_v49 = vadd.f32 1.0, %v5170_v41  ;;  %4596 = vmatprep.subr.bf16.mxu1 %v4595_v40 }
 0x4eb   :  { %v5174_v50 = vpop.eup %5173  ;;  %v814_v51 = vmul.f32 0.5, %v806_v43  ;;  %4598 = vmatpush1.bf16.msra.mxu1 %v4597_v37  ;;  %v820_v56 = vmul.f32 %v5172_v45, %v812_v42 }
 0x4ec   :  { %v5176_v52 = vpop.eup %5175  ;;  %v815_v54 = vmul.f32 0.5, %v807_v49  ;;  %v821_v58 = vmul.f32 %v5174_v50, %v813_v46 }
 0x4ed   :  { %v5178_v55 = vpop.eup %5177  ;;  %v822_v57 = vmul.f32 %v5176_v52, %v814_v51 }
 0x4ee   :  { %v823_v59 = vmul.f32 %v5178_v55, %v815_v54  ;;  %v4150_v54 = vld [vmem:[%s7123_s7 + $0x80] sm:$0xff]  ;;  %v4151_v55 = vld [vmem:[%s7123_s7 + $0x88] sm:$0xff] }
 0x4ef   :  { %v4601_v60 = vpack.c.bf16 %v822_v57, %v820_v56  ;;  %v4152_v56 = vld [vmem:[%s7123_s7 + $0x90] sm:$0xff]  ;;  %v4153_v57 = vld [vmem:[%s7123_s7 + $0x98] sm:$0xff] }
 0x4f0   :  { %v4599_v3 = vpack.c.bf16 %v823_v59, %v821_v58 }
 0x4f2   :  { %4600 = vmatprep.subr.bf16.mxu1 %v4599_v3 }
 0x4f3   :  { %4602 = vmatpush1.bf16.msra.mxu1 %v4601_v60 }
 0x4f6   :  { %4114 = vmatmul.mubr.msk.f32.vlgmr.msra.gmra.mrb[0].mxu1 %vm456_vm6, %v4098_v6 }
 0x4f7   :  { %976 = vmatprep.mubr.f32.mxu1 %v5398_v31 }
 0x4fa   :  { %4115 = vmatmul.mubr.msk.f32.gmra.mrb[2].mxu1 %vm456_vm6, %v4099_v7 }
 0x4fb   :  { %982 = vmatprep.mubr.f32.mxu1 %v5398_v31 }
 0x4fe   :  { %4116 = vmatmul.mubr.msk.f32.gmra.mrb[4].mxu1 %vm456_vm6, %v4100_v0 }
 0x4ff   :  { %988 = vmatprep.mubr.f32.mxu1 %v5398_v31 }
 0x502   :  { %4117 = vmatmul.mubr.msk.f32.gmra.mrb[6].mxu1 %vm456_vm6, %v4101_v4 }
 0x503   :  { %994 = vmatprep.mubr.f32.mxu1 %v5398_v31 }
 0x5c9   :  { %v972_v8 = vpop.f32.mrb[0].mxu1 }
 0x5ca   :  { %v974_v2 = vpop.f32.mrb[1].mxu1  ;;  %v973_v9 = vadd.f32 %v972_v8, %v845_v5 }
 0x5cb   :  { %v975_v26 = vadd.f32 %v974_v2, %v845_v5  ;;  %v4298_v5 = vld [vmem:[%s7120_s4 + $0xc0] sm:$0xff] }
 0x5cc   :  { %v5889_v29 = vadd.f32 %v973_v9, %v5713_v61 }
 0x5cd   :  { %v978_v16 = vpop.f32.mrb[2].mxu1  ;;  %v5895_v32 = vadd.f32 %v975_v26, %v5720_v63  ;;  %v4299_v26 = vld [vmem:[%s7120_s4 + $0xc8] sm:$0xff] }
 0x5ce   :  { %v979_v22 = vadd.f32 %v978_v16, %v850_v24  ;;  %v980_v27 = vpop.f32.mrb[3].mxu1 }
 0x5cf   :  { %v981_v28 = vadd.f32 %v980_v27, %v850_v24 }
 0x5d0   :  { %v5892_v30 = vadd.f32 %v979_v22, %v5716_v62  ;;  %v860_v62 = vpop.permute.xlu1 %859 }
 0x5d1   :  { %v5898_v33 = vadd.f32 %v981_v28, %v5723_v1  ;;  %v984_v34 = vpop.f32.mrb[4].mxu1 }
 0x5d2   :  { %v986_v36 = vpop.f32.mrb[5].mxu1  ;;  %v4995_v37 = vpack.i.bf16 %v5892_v30, %v5889_v29  ;;  %v985_v61 = vadd.f32 %v984_v34, %v855_v38 }
 0x5d3   :  { %v5000_v40 = vpack.i.bf16 %v5898_v33, %v5895_v32  ;;  %v987_v41 = vadd.f32 %v986_v36, %v855_v38 }
 0x5d4   :  { %4996 = vrot.lane.b32.xlu0 %v4995_v37, %s5400_s2  ;;  %v5907_v45 = vadd.f32 %v985_v61, %v5741_v18  ;;  %v4126_v18 = vld [vmem:[%s7121_s5 + $0x40] sm:$0xff] }
 0x5d5   :  { %v990_v63 = vpop.f32.mrb[6].mxu1  ;;  %5001 = vrot.lane.b32.xlu1 %v5000_v40, %s5400_s2  ;;  %v5913_v49 = vadd.f32 %v987_v41, %v5748_v20  ;;  %v4128_v20 = vld [vmem:[%s7121_s5 + $0x50] sm:$0xff] }
 0x5d6   :  { %v991_v1 = vadd.f32 %v990_v63, %v860_v62  ;;  %v992_v42 = vpop.f32.mrb[7].mxu1  ;;  %v4615_v63 = vpack.c.bf16 %v5898_v33, %v5895_v32 }
 0x5d7   :  { %v993_v43 = vadd.f32 %v992_v42, %v860_v62 }
 0x5d8   :  { %v5910_v46 = vadd.f32 %v991_v1, %v5744_v19  ;;  %v4127_v19 = vld [vmem:[%s7121_s5 + $0x48] sm:$0xff]  ;;  %v4617_v1 = vpack.c.bf16 %v5892_v30, %v5889_v29 }
 0x5d9   :  { %v5916_v50 = vadd.f32 %v993_v43, %v5751_v21  ;;  %v4129_v21 = vld [vmem:[%s7121_s5 + $0x58] sm:$0xff] }
 0x5da   :  { %v5005_v51 = vpack.i.bf16 %v5910_v46, %v5907_v45  ;;  %v4621_v43 = vpack.c.bf16 %v5910_v46, %v5907_v45 }
 0x5db   :  { %v5010_v52 = vpack.i.bf16 %v5916_v50, %v5913_v49  ;;  %v4619_v42 = vpack.c.bf16 %v5916_v50, %v5913_v49 }
 0x5dc   :  { %5006 = vrot.lane.b32.xlu0 %v5005_v51, %s5400_s2  ;;  %v4122_v51 = vld [vmem:[%s7120_s4 + $0x40] sm:$0xff] }
 0x5dd   :  { %5011 = vrot.lane.b32.xlu1 %v5010_v52, %s5400_s2  ;;  %v4123_v52 = vld [vmem:[%s7120_s4 + $0x48] sm:$0xff] }
 0x5e0   :  { %1082 = vperm.xlu0 %4954, %v4126_v18   ;;  %v4124_v18 = vld [vmem:[%s7120_s4 + $0x50] sm:$0xff] }
 0x5e1   :  { %1087 = vperm.xlu1 %4953, %v4127_v19   ;;  %v4125_v19 = vld [vmem:[%s7120_s4 + $0x58] sm:$0xff] }
 0x5e4   :  { %1092 = vperm.xlu0 %4954, %v4128_v20   ;;  %v4102_v20 = vld [vmem:[%s7122_s6 + $0x60] sm:$0xff] }
 0x5e5   :  { %1097 = vperm.xlu1 %4953, %v4129_v21   ;;  %4118 = vmatmul.mubr.msk.f32.gmra.mrb[8].mxu1 %vm456_vm6, %v4102_v20  ;;  %v4103_v21 = vld [vmem:[%s7122_s6 + $0x68] sm:$0xff] }
 0x5e6   :  { %1000 = vmatprep.mubr.f32.mxu1 %v5398_v31 }
 0x5e8   :  { %1269 = vperm.xlu0 %4954, %v4150_v54   ;;  %v4104_v54 = vld [vmem:[%s7122_s6 + $0x70] sm:$0xff] }
 0x5e9   :  { %1274 = vperm.xlu1 %4953, %v4151_v55   ;;  %4119 = vmatmul.mubr.msk.f32.gmra.mrb[10].mxu1 %vm456_vm6, %v4103_v21  ;;  %v4105_v55 = vld [vmem:[%s7122_s6 + $0x78] sm:$0xff] }
 0x5ea   :  { %1006 = vmatprep.mubr.f32.mxu1 %v5398_v31 }
 0x5ec   :  { %1279 = vperm.xlu0 %4954, %v4152_v56  }
 0x5ed   :  { %1284 = vperm.xlu1 %4953, %v4153_v57   ;;  %4120 = vmatmul.mubr.msk.f32.gmra.mrb[12].mxu1 %vm456_vm6, %v4104_v54 }
 0x5ee   :  { %1012 = vmatprep.mubr.f32.mxu1 %v5398_v31 }
 0x5f1   :  { %4121 = vmatmul.mubr.msk.f32.gmra.mrb[14].mxu1 %vm456_vm6, %v4105_v55 }
 0x5f2   :  { %1395 = vmatprep.mubr.f32.mxu1 %v5398_v31 }
 0x646   :  { %v4997_v58 = vpop.permute.xlu0 %4996 }
 0x647   :  { %v4999_v59 = vunpack.i.h.bf16 %v4997_v58  ;;  %v4998_v60 = vunpack.i.l.bf16 %v4997_v58  ;;  %v5002_v3 = vpop.permute.xlu1 %5001 }
 0x648   :  { %v5004_v6 = vunpack.i.h.bf16 %v5002_v3  ;;  %v5003_v7 = vunpack.i.l.bf16 %v5002_v3 }
 0x64a   :  { %v1052_v0 = vsel %vm1051_vm12, %v4998_v60, %v5003_v7  ;;  %v1053_v4 = vsel %vm1051_vm12, %v4999_v59, %v5004_v6  ;;  %v1056_v8 = vsel %vm1051_vm12, %v5003_v7, %v4998_v60  ;;  %v1057_v2 = vsel %vm1051_vm12, %v5004_v6, %v4999_v59 }
 0x64b   :  { %v4606_v9 = vpack.c.bf16 %v1057_v2, %v1056_v8  ;;  %v4603_v24 = vpack.c.bf16 %v1053_v4, %v1052_v0 }
 0x64d   :  { %4605 = vmatprep.subr.msk.bf16.mxu0 %vm5959_vm15, %v4603_v24 }
 0x64e   :  { %v5007_v16 = vpop.permute.xlu0 %5006  ;;  %4608 = vmatpush1.bf16.msk.msra.mxu0 %vm5963_vm1, %v4606_v9 }
 0x64f   :  { %v5009_v22 = vunpack.i.h.bf16 %v5007_v16  ;;  %v5008_v27 = vunpack.i.l.bf16 %v5007_v16  ;;  %v5012_v28 = vpop.permute.xlu1 %5011 }
 0x650   :  { %v5014_v34 = vunpack.i.h.bf16 %v5012_v28  ;;  %v5013_v36 = vunpack.i.l.bf16 %v5012_v28 }
 0x652   :  { %v1054_v37 = vsel %vm1051_vm12, %v5008_v27, %v5013_v36  ;;  %v1055_v38 = vsel %vm1051_vm12, %v5009_v22, %v5014_v34  ;;  %v1058_v40 = vsel %vm1051_vm12, %v5013_v36, %v5008_v27  ;;  %v1059_v61 = vsel %vm1051_vm12, %v5014_v34, %v5009_v22 }
 0x653   :  { %v4612_v62 = vpack.c.bf16 %v1059_v61, %v1058_v40  ;;  %v4609_v41 = vpack.c.bf16 %v1055_v38, %v1054_v37 }
 0x655   :  { %4611 = vmatprep.subr.msk.bf16.mxu0 %vm5959_vm15, %v4609_v41 }
 0x656   :  { %4614 = vmatpush1.bf16.msk.msra.mxu0 %vm5963_vm1, %v4612_v62 }
 0x657   :  { %4616 = vmatprep.subr.bf16.mxu0 %v4615_v63 }
 0x65a   :  { %4618 = vmatpush1.bf16.msra.mxu0 %v4617_v1 }
 0x65b   :  { %4620 = vmatprep.subr.bf16.mxu0 %v4619_v42 }
 0x65e   :  { %4622 = vmatpush1.bf16.msra.mxu0 %v4621_v43 }
 0x65f   :  { %v1083_v56 = vpop.permute.xlu0 %1082 }
 0x660   :  { %v1088_v6 = vpop.permute.xlu1 %1087 }
 0x661   :  { %4138 = vmatmul.mubr.msk.f32.vlgmr.msra.gmra.mrb[32].mxu0 %vm250_vm5, %v4122_v51 }
 0x662   :  { %1182 = vmatprep.mubr.f32.mxu0 %v5398_v31 }
 0x663   :  { %v1093_v24 = vpop.permute.xlu0 %1092 }
 0x664   :  { %v1098_v37 = vpop.permute.xlu1 %1097 }
 0x665   :  { %4139 = vmatmul.mubr.msk.f32.gmra.mrb[34].mxu0 %vm250_vm5, %v4123_v52 }
 0x666   :  { %1188 = vmatprep.mubr.f32.mxu0 %v5398_v31 }
 0x669   :  { %4140 = vmatmul.mubr.msk.f32.gmra.mrb[36].mxu0 %vm250_vm5, %v4124_v18 }
 0x66a   :  { %1194 = vmatprep.mubr.f32.mxu0 %v5398_v31 }
 0x66d   :  { %4141 = vmatmul.mubr.msk.f32.gmra.mrb[38].mxu0 %vm250_vm5, %v4125_v19 }
 0x66e   :  { %1601 = vmatprep.mubr.f32.mxu0 %v5398_v31 }
 0x734   :  { %v1178_v57 = vpop.f32.mrb[32].mxu0 }
 0x735   :  { %v1179_v58 = vadd.f32 %v1178_v57, %v1083_v56  ;;  %v1180_v59 = vpop.f32.mrb[33].mxu0 }
 0x736   :  { %v1181_v60 = vadd.f32 %v1180_v59, %v1083_v56 }
 0x737   :  { %v1209_v3 = vmul.f32 0.5, %v1179_v58 }
 0x738   :  { %v1210_v7 = vmul.f32 0.5, %v1181_v60  ;;  %v1184_v0 = vpop.f32.mrb[34].mxu0 }
 0x739   :  { %5179 = vtanh.f32 %v1209_v3  ;;  %v1185_v4 = vadd.f32 %v1184_v0, %v1088_v6  ;;  %v1186_v8 = vpop.f32.mrb[35].mxu0 }
 0x73a   :  { %5181 = vtanh.f32 %v1210_v7  ;;  %v1187_v2 = vadd.f32 %v1186_v8, %v1088_v6 }
 0x73b   :  { %5183 = vtanh.f32 %v1179_v58  ;;  %v1211_v9 = vmul.f32 0.5, %v1185_v4 }
 0x73c   :  { %5185 = vtanh.f32 %v1181_v60  ;;  %v1212_v16 = vmul.f32 0.5, %v1187_v2  ;;  %v1190_v22 = vpop.f32.mrb[36].mxu0 }
 0x73d   :  { %5187 = vtanh.f32 %v1211_v9  ;;  %v1191_v27 = vadd.f32 %v1190_v22, %v1093_v24  ;;  %v1192_v28 = vpop.f32.mrb[37].mxu0 }
 0x73e   :  { %5189 = vtanh.f32 %v1212_v16  ;;  %v1193_v34 = vadd.f32 %v1192_v28, %v1093_v24 }
 0x73f   :  { %5191 = vtanh.f32 %v1185_v4  ;;  %v1213_v36 = vmul.f32 0.5, %v1191_v27 }
 0x740   :  { %5193 = vtanh.f32 %v1187_v2  ;;  %v1214_v38 = vmul.f32 0.5, %v1193_v34  ;;  %v1196_v40 = vpop.f32.mrb[38].mxu0 }
 0x741   :  { %5195 = vtanh.f32 %v1213_v36  ;;  %v1197_v61 = vadd.f32 %v1196_v40, %v1098_v37  ;;  %v1198_v62 = vpop.f32.mrb[39].mxu0 }
 0x742   :  { %5197 = vtanh.f32 %v1214_v38  ;;  %v1199_v41 = vadd.f32 %v1198_v62, %v1098_v37 }
 0x743   :  { %v5180_v63 = vpop.eup %5179  ;;  %v1215_v1 = vmul.f32 0.5, %v1197_v61 }
 0x744   :  { %v5182_v42 = vpop.eup %5181  ;;  %v1225_v43 = vadd.f32 1.0, %v5180_v63  ;;  %v1216_v51 = vmul.f32 0.5, %v1199_v41 }
 0x745   :  { %v5184_v52 = vpop.eup %5183  ;;  %v1226_v18 = vadd.f32 1.0, %v5182_v42  ;;  %5199 = vtanh.f32 %v1215_v1 }
 0x746   :  { %v5186_v19 = vpop.eup %5185  ;;  %5201 = vtanh.f32 %v1216_v51  ;;  %v1233_v54 = vmul.f32 0.5, %v1225_v43 }
 0x747   :  { %v5188_v20 = vpop.eup %5187  ;;  %5203 = vtanh.f32 %v1191_v27  ;;  %v1234_v57 = vmul.f32 0.5, %v1226_v18 }
 0x748   :  { %v5190_v21 = vpop.eup %5189  ;;  %v1227_v55 = vadd.f32 1.0, %v5188_v20  ;;  %5205 = vtanh.f32 %v1193_v34  ;;  %v1241_v0 = vmul.f32 %v5184_v52, %v1233_v54  ;;  %v4142_v20 = vld [vmem:[%s7122_s6 + $0x80] sm:$0xff]  ;;  %v4144_v54 = vld [vmem:[%s7122_s6 + $0x90] sm:$0xff] }
 0x749   :  { %v5192_v56 = vpop.eup %5191  ;;  %v1228_v58 = vadd.f32 1.0, %v5190_v21  ;;  %5207 = vtanh.f32 %v1197_v61  ;;  %v1242_v9 = vmul.f32 %v5186_v19, %v1234_v57  ;;  %v4143_v21 = vld [vmem:[%s7122_s6 + $0x88] sm:$0xff] }
 0x74a   :  { %v5194_v59 = vpop.eup %5193  ;;  %v1235_v60 = vmul.f32 0.5, %v1227_v55  ;;  %5209 = vtanh.f32 %v1199_v41  ;;  %v4145_v55 = vld [vmem:[%s7122_s6 + $0x98] sm:$0xff] }
 0x74b   :  { %v5196_v3 = vpop.eup %5195  ;;  %v1236_v6 = vmul.f32 0.5, %v1228_v58  ;;  %v1270_v58 = vpop.permute.xlu0 %1269 }
 0x74c   :  { %v5198_v7 = vpop.eup %5197  ;;  %v1243_v4 = vmul.f32 %v5192_v56, %v1235_v60  ;;  %v1229_v8 = vadd.f32 1.0, %v5196_v3  ;;  %v1275_v60 = vpop.permute.xlu1 %1274 }
 0x74d   :  { %v1230_v2 = vadd.f32 1.0, %v5198_v7  ;;  %v1244_v24 = vmul.f32 %v5194_v59, %v1236_v6 }
 0x74e   :  { %v4625_v16 = vpack.c.bf16 %v1243_v4, %v1241_v0  ;;  %v1237_v34 = vmul.f32 0.5, %v1229_v8 }
 0x74f   :  { %v5200_v22 = vpop.eup %5199  ;;  %v4623_v27 = vpack.c.bf16 %v1244_v24, %v1242_v9  ;;  %v1238_v38 = vmul.f32 0.5, %v1230_v2 }
 0x750   :  { %v5202_v28 = vpop.eup %5201  ;;  %v1231_v36 = vadd.f32 1.0, %v5200_v22 }
 0x751   :  { %v5204_v37 = vpop.eup %5203  ;;  %v1232_v40 = vadd.f32 1.0, %v5202_v28  ;;  %4624 = vmatprep.subr.bf16.mxu1 %v4623_v27  ;;  %v1280_v28 = vpop.permute.xlu0 %1279 }
 0x752   :  { %v5206_v61 = vpop.eup %5205  ;;  %v1239_v62 = vmul.f32 0.5, %v1231_v36  ;;  %4626 = vmatpush1.bf16.msra.mxu1 %v4625_v16  ;;  %v1245_v42 = vmul.f32 %v5204_v37, %v1237_v34 }
 0x753   :  { %v5208_v41 = vpop.eup %5207  ;;  %v1240_v63 = vmul.f32 0.5, %v1232_v40  ;;  %v1246_v51 = vmul.f32 %v5206_v61, %v1238_v38 }
 0x754   :  { %v5210_v1 = vpop.eup %5209  ;;  %v1247_v43 = vmul.f32 %v5208_v41, %v1239_v62 }
 0x755   :  { %v1248_v52 = vmul.f32 %v5210_v1, %v1240_v63 }
 0x756   :  { %v4629_v18 = vpack.c.bf16 %v1247_v43, %v1245_v42  ;;  %v4194_v42 = vld [vmem:[%s7123_s7 + $0xc0] sm:$0xff]  ;;  %v4195_v43 = vld [vmem:[%s7123_s7 + $0xc8] sm:$0xff] }
 0x757   :  { %v4627_v19 = vpack.c.bf16 %v1248_v52, %v1246_v51  ;;  %v4196_v51 = vld [vmem:[%s7123_s7 + $0xd0] sm:$0xff]  ;;  %v4197_v52 = vld [vmem:[%s7123_s7 + $0xd8] sm:$0xff] }
 0x759   :  { %4628 = vmatprep.subr.bf16.mxu1 %v4627_v19 }
 0x75a   :  { %4630 = vmatpush1.bf16.msra.mxu1 %v4629_v18 }
 0x75d   :  { %4158 = vmatmul.mubr.msk.f32.vlgmr.msra.gmra.mrb[16].mxu1 %vm456_vm6, %v4142_v20 }
 0x75e   :  { %1401 = vmatprep.mubr.f32.mxu1 %v5398_v31 }
 0x761   :  { %4159 = vmatmul.mubr.msk.f32.gmra.mrb[18].mxu1 %vm456_vm6, %v4143_v21 }
 0x762   :  { %1407 = vmatprep.mubr.f32.mxu1 %v5398_v31 }
 0x765   :  { %4160 = vmatmul.mubr.msk.f32.gmra.mrb[20].mxu1 %vm456_vm6, %v4144_v54 }
 0x766   :  { %1413 = vmatprep.mubr.f32.mxu1 %v5398_v31 }
 0x769   :  { %4161 = vmatmul.mubr.msk.f32.gmra.mrb[22].mxu1 %vm456_vm6, %v4145_v55 }
 0x76a   :  { %1419 = vmatprep.mubr.f32.mxu1 %v5398_v31 }
 0x830   :  { %v1397_v56 = vpop.f32.mrb[16].mxu1 }
 0x831   :  { %v1399_v57 = vpop.f32.mrb[17].mxu1  ;;  %v1398_v59 = vadd.f32 %v1397_v56, %v1270_v58 }
 0x832   :  { %v1400_v3 = vadd.f32 %v1399_v57, %v1270_v58 }
 0x833   :  { %v6052_v8 = vadd.f32 %v1398_v59, %v5889_v29 }
 0x834   :  { %v1403_v6 = vpop.f32.mrb[18].mxu1  ;;  %v6058_v9 = vadd.f32 %v1400_v3, %v5895_v32 }
 0x835   :  { %v1404_v7 = vadd.f32 %v1403_v6, %v1275_v60  ;;  %v1405_v0 = vpop.f32.mrb[19].mxu1  ;;  %v4343_v6 = vld [vmem:[%s7120_s4 + $0xe8] sm:$0xff] }
 0x836   :  { %v1406_v4 = vadd.f32 %v1405_v0, %v1275_v60  ;;  %v4342_v60 = vld [vmem:[%s7120_s4 + $0xe0] sm:$0xff] }
 0x837   :  { %v6055_v2 = vadd.f32 %v1404_v7, %v5892_v30  ;;  %v1285_v30 = vpop.permute.xlu1 %1284 }
 0x838   :  { %v6061_v24 = vadd.f32 %v1406_v4, %v5898_v33  ;;  %v1409_v16 = vpop.f32.mrb[20].mxu1 }
 0x839   :  { %v1411_v22 = vpop.f32.mrb[21].mxu1  ;;  %v5015_v27 = vpack.i.bf16 %v6055_v2, %v6052_v8  ;;  %v1410_v29 = vadd.f32 %v1409_v16, %v1280_v28 }
 0x83a   :  { %v5020_v34 = vpack.i.bf16 %v6061_v24, %v6058_v9  ;;  %v1412_v36 = vadd.f32 %v1411_v22, %v1280_v28 }
 0x83b   :  { %5016 = vrot.lane.b32.xlu0 %v5015_v27, %s5401_s0  ;;  %v6070_v40 = vadd.f32 %v1410_v29, %v5907_v45  ;;  %v4170_v45 = vld [vmem:[%s7121_s5 + $0x60] sm:$0xff] }
 0x83c   :  { %v1415_v32 = vpop.f32.mrb[22].mxu1  ;;  %5021 = vrot.lane.b32.xlu1 %v5020_v34, %s5401_s0  ;;  %v6076_v62 = vadd.f32 %v1412_v36, %v5913_v49  ;;  %v4172_v49 = vld [vmem:[%s7121_s5 + $0x70] sm:$0xff] }
 0x83d   :  { %v1416_v33 = vadd.f32 %v1415_v32, %v1285_v30  ;;  %v1417_v37 = vpop.f32.mrb[23].mxu1 }
 0x83e   :  { %v1418_v38 = vadd.f32 %v1417_v37, %v1285_v30  ;;  %v4645_v37 = vpack.c.bf16 %v6055_v2, %v6052_v8 }
 0x83f   :  { %v6073_v61 = vadd.f32 %v1416_v33, %v5910_v46  ;;  %v4171_v46 = vld [vmem:[%s7121_s5 + $0x68] sm:$0xff]  ;;  %v4643_v33 = vpack.c.bf16 %v6061_v24, %v6058_v9 }
 0x840   :  { %v6079_v41 = vadd.f32 %v1418_v38, %v5916_v50  ;;  %v4173_v50 = vld [vmem:[%s7121_s5 + $0x78] sm:$0xff] }
 0x841   :  { %v5025_v63 = vpack.i.bf16 %v6073_v61, %v6070_v40 }
 0x842   :  { %v5030_v1 = vpack.i.bf16 %v6079_v41, %v6076_v62  ;;  %v4647_v38 = vpack.c.bf16 %v6079_v41, %v6076_v62 }
 0x843   :  { %5026 = vrot.lane.b32.xlu0 %v5025_v63, %s5401_s0  ;;  %v4649_v63 = vpack.c.bf16 %v6073_v61, %v6070_v40 }
 0x844   :  { %5031 = vrot.lane.b32.xlu1 %v5030_v1, %s5401_s0  ;;  %v4166_v1 = vld [vmem:[%s7120_s4 + $0x60] sm:$0xff] }
 0x847   :  { %1507 = vperm.xlu0 %4954, %v4170_v45   ;;  %v4167_v45 = vld [vmem:[%s7120_s4 + $0x68] sm:$0xff] }
 0x848   :  { %1512 = vperm.xlu1 %4953, %v4171_v46   ;;  %v4168_v46 = vld [vmem:[%s7120_s4 + $0x70] sm:$0xff] }
 0x84b   :  { %1517 = vperm.xlu0 %4954, %v4172_v49   ;;  %v4169_v49 = vld [vmem:[%s7120_s4 + $0x78] sm:$0xff] }
 0x84c   :  { %1522 = vperm.xlu1 %4953, %v4173_v50   ;;  %v4146_v50 = vld [vmem:[%s7122_s6 + $0xa0] sm:$0xff] }
 0x84d   :  { %4162 = vmatmul.mubr.msk.f32.gmra.mrb[8].mxu1 %vm456_vm6, %v4146_v50 }
 0x84e   :  { %1425 = vmatprep.mubr.f32.mxu1 %v5398_v31 }
 0x84f   :  { %1694 = vperm.xlu0 %4954, %v4194_v42   ;;  %v4147_v42 = vld [vmem:[%s7122_s6 + $0xa8] sm:$0xff] }
 0x850   :  { %1699 = vperm.xlu1 %4953, %v4195_v43   ;;  %v4148_v43 = vld [vmem:[%s7122_s6 + $0xb0] sm:$0xff] }
 0x851   :  { %4163 = vmatmul.mubr.msk.f32.gmra.mrb[10].mxu1 %vm456_vm6, %v4147_v42 }
 0x852   :  { %1431 = vmatprep.mubr.f32.mxu1 %v5398_v31 }
 0x853   :  { %1704 = vperm.xlu0 %4954, %v4196_v51   ;;  %v4149_v51 = vld [vmem:[%s7122_s6 + $0xb8] sm:$0xff] }
 0x854   :  { %1709 = vperm.xlu1 %4953, %v4197_v52  }
 0x855   :  { %4164 = vmatmul.mubr.msk.f32.gmra.mrb[12].mxu1 %vm456_vm6, %v4148_v43 }
 0x856   :  { %1437 = vmatprep.mubr.f32.mxu1 %v5398_v31 }
 0x859   :  { %4165 = vmatmul.mubr.msk.f32.gmra.mrb[14].mxu1 %vm456_vm6, %v4149_v51 }
 0x85a   :  { %1820 = vmatprep.mubr.f32.mxu1 %v5398_v31 }
 0x8ad   :  { %v5017_v18 = vpop.permute.xlu0 %5016 }
 0x8ae   :  { %v5019_v19 = vunpack.i.h.bf16 %v5017_v18  ;;  %v5018_v20 = vunpack.i.l.bf16 %v5017_v18  ;;  %v5022_v21 = vpop.permute.xlu1 %5021 }
 0x8af   :  { %v5024_v54 = vunpack.i.h.bf16 %v5022_v21  ;;  %v5023_v55 = vunpack.i.l.bf16 %v5022_v21 }
 0x8b1   :  { %v1477_v56 = vsel %vm1476_vm2, %v5018_v20, %v5023_v55  ;;  %v1478_v57 = vsel %vm1476_vm2, %v5019_v19, %v5024_v54  ;;  %v1481_v58 = vsel %vm1476_vm2, %v5023_v55, %v5018_v20  ;;  %v1482_v59 = vsel %vm1476_vm2, %v5024_v54, %v5019_v19 }
 0x8b2   :  { %v4631_v39 = vpack.c.bf16 %v1478_v57, %v1477_v56  ;;  %v4634_v3 = vpack.c.bf16 %v1482_v59, %v1481_v58 }
 0x8b4   :  { %4633 = vmatprep.subr.msk.bf16.mxu0 %vm6122_vm13, %v4631_v39 }
 0x8b5   :  { %v5027_v7 = vpop.permute.xlu0 %5026  ;;  %4636 = vmatpush1.bf16.msk.msra.mxu0 %vm6126_vm14, %v4634_v3 }
 0x8b6   :  { %v5029_v0 = vunpack.i.h.bf16 %v5027_v7  ;;  %v5028_v4 = vunpack.i.l.bf16 %v5027_v7  ;;  %v5032_v16 = vpop.permute.xlu1 %5031 }
 0x8b7   :  { %v5034_v22 = vunpack.i.h.bf16 %v5032_v16  ;;  %v5033_v27 = vunpack.i.l.bf16 %v5032_v16 }
 0x8b9   :  { %v1479_v28 = vsel %vm1476_vm2, %v5028_v4, %v5033_v27  ;;  %v1480_v34 = vsel %vm1476_vm2, %v5029_v0, %v5034_v22  ;;  %v1483_v29 = vsel %vm1476_vm2, %v5033_v27, %v5028_v4  ;;  %v1484_v30 = vsel %vm1476_vm2, %v5034_v22, %v5029_v0 }
 0x8ba   :  { %v4637_v36 = vpack.c.bf16 %v1480_v34, %v1479_v28  ;;  %v4640_v32 = vpack.c.bf16 %v1484_v30, %v1483_v29 }
 0x8bc   :  { %4639 = vmatprep.subr.msk.bf16.mxu0 %vm6122_vm13, %v4637_v36 }
 0x8bd   :  { %4642 = vmatpush1.bf16.msk.msra.mxu0 %vm6126_vm14, %v4640_v32 }
 0x8be   :  { %4644 = vmatprep.subr.bf16.mxu0 %v4643_v33 }
 0x8c1   :  { %4646 = vmatpush1.bf16.msra.mxu0 %v4645_v37 }
 0x8c2   :  { %4648 = vmatprep.subr.bf16.mxu0 %v4647_v38 }
 0x8c5   :  { %4650 = vmatpush1.bf16.msra.mxu0 %v4649_v63 }
 0x8c6   :  { %v1508_v52 = vpop.permute.xlu0 %1507 }
 0x8c7   :  { %v1513_v55 = vpop.permute.xlu1 %1512 }
 0x8c8   :  { %4182 = vmatmul.mubr.msk.f32.vlgmr.msra.gmra.mrb[40].mxu0 %vm250_vm5, %v4166_v1 }
 0x8c9   :  { %1607 = vmatprep.mubr.f32.mxu0 %v5398_v31 }
 0x8ca   :  { %v1518_v7 = vpop.permute.xlu0 %1517 }
 0x8cb   :  { %v1523_v34 = vpop.permute.xlu1 %1522 }
 0x8cc   :  { %4183 = vmatmul.mubr.msk.f32.gmra.mrb[42].mxu0 %vm250_vm5, %v4167_v45 }
 0x8cd   :  { %1613 = vmatprep.mubr.f32.mxu0 %v5398_v31 }
 0x8d0   :  { %4184 = vmatmul.mubr.msk.f32.gmra.mrb[44].mxu0 %vm250_vm5, %v4168_v46 }
 0x8d1   :  { %1619 = vmatprep.mubr.f32.mxu0 %v5398_v31 }
 0x8d4   :  { %4185 = vmatmul.mubr.msk.f32.gmra.mrb[46].mxu0 %vm250_vm5, %v4169_v49 }
 0x8d5   :  { %2023 = vmatprep.mubr.f32.mxu0 %v5398_v31 }
 0x99b   :  { %v1603_v18 = vpop.f32.mrb[40].mxu0 }
 0x99c   :  { %v1604_v19 = vadd.f32 %v1603_v18, %v1508_v52  ;;  %v1605_v20 = vpop.f32.mrb[41].mxu0 }
 0x99d   :  { %v1606_v21 = vadd.f32 %v1605_v20, %v1508_v52 }
 0x99e   :  { %v1634_v54 = vmul.f32 0.5, %v1604_v19 }
 0x99f   :  { %v1635_v56 = vmul.f32 0.5, %v1606_v21  ;;  %v1609_v57 = vpop.f32.mrb[42].mxu0 }
 0x9a0   :  { %5211 = vtanh.f32 %v1634_v54  ;;  %v1610_v58 = vadd.f32 %v1609_v57, %v1513_v55  ;;  %v1611_v59 = vpop.f32.mrb[43].mxu0 }
 0x9a1   :  { %5213 = vtanh.f32 %v1635_v56  ;;  %v1612_v39 = vadd.f32 %v1611_v59, %v1513_v55 }
 0x9a2   :  { %5215 = vtanh.f32 %v1604_v19  ;;  %v1636_v3 = vmul.f32 0.5, %v1610_v58 }
 0x9a3   :  { %5217 = vtanh.f32 %v1606_v21  ;;  %v1637_v0 = vmul.f32 0.5, %v1612_v39  ;;  %v1615_v4 = vpop.f32.mrb[44].mxu0 }
 0x9a4   :  { %5219 = vtanh.f32 %v1636_v3  ;;  %v1616_v16 = vadd.f32 %v1615_v4, %v1518_v7  ;;  %v1617_v22 = vpop.f32.mrb[45].mxu0 }
 0x9a5   :  { %5221 = vtanh.f32 %v1637_v0  ;;  %v1618_v27 = vadd.f32 %v1617_v22, %v1518_v7 }
 0x9a6   :  { %5223 = vtanh.f32 %v1610_v58  ;;  %v1638_v28 = vmul.f32 0.5, %v1616_v16 }
 0x9a7   :  { %5225 = vtanh.f32 %v1612_v39  ;;  %v1639_v29 = vmul.f32 0.5, %v1618_v27  ;;  %v1621_v30 = vpop.f32.mrb[46].mxu0 }
 0x9a8   :  { %5227 = vtanh.f32 %v1638_v28  ;;  %v1622_v36 = vadd.f32 %v1621_v30, %v1523_v34  ;;  %v1623_v32 = vpop.f32.mrb[47].mxu0 }
 0x9a9   :  { %5229 = vtanh.f32 %v1639_v29  ;;  %v1624_v33 = vadd.f32 %v1623_v32, %v1523_v34 }
 0x9aa   :  { %v5212_v37 = vpop.eup %5211  ;;  %v1640_v38 = vmul.f32 0.5, %v1622_v36 }
 0x9ab   :  { %v5214_v63 = vpop.eup %5213  ;;  %v1650_v1 = vadd.f32 1.0, %v5212_v37  ;;  %v1641_v45 = vmul.f32 0.5, %v1624_v33 }
 0x9ac   :  { %v5216_v46 = vpop.eup %5215  ;;  %v1651_v49 = vadd.f32 1.0, %v5214_v63  ;;  %5231 = vtanh.f32 %v1640_v38 }
 0x9ad   :  { %v5218_v50 = vpop.eup %5217  ;;  %5233 = vtanh.f32 %v1641_v45  ;;  %v1658_v51 = vmul.f32 0.5, %v1650_v1 }
 0x9ae   :  { %v5220_v42 = vpop.eup %5219  ;;  %5235 = vtanh.f32 %v1616_v16  ;;  %v1659_v19 = vmul.f32 0.5, %v1651_v49 }
 0x9af   :  { %v5222_v43 = vpop.eup %5221  ;;  %v1652_v52 = vadd.f32 1.0, %v5220_v42  ;;  %5237 = vtanh.f32 %v1618_v27  ;;  %v1666_v58 = vmul.f32 %v5216_v46, %v1658_v51  ;;  %v4187_v51 = vld [vmem:[%s7122_s6 + $0xc8] sm:$0xff] }
 0x9b0   :  { %v5224_v18 = vpop.eup %5223  ;;  %v1653_v20 = vadd.f32 1.0, %v5222_v43  ;;  %5239 = vtanh.f32 %v1622_v36  ;;  %v1667_v7 = vmul.f32 %v5218_v50, %v1659_v19  ;;  %v4186_v43 = vld [vmem:[%s7122_s6 + $0xc0] sm:$0xff] }
 0x9b1   :  { %v5226_v21 = vpop.eup %5225  ;;  %v1660_v54 = vmul.f32 0.5, %v1652_v52  ;;  %5241 = vtanh.f32 %v1624_v33  ;;  %v4188_v52 = vld [vmem:[%s7122_s6 + $0xd0] sm:$0xff] }
 0x9b2   :  { %v5228_v55 = vpop.eup %5227  ;;  %v1661_v56 = vmul.f32 0.5, %v1653_v20 }
 0x9b3   :  { %v5230_v57 = vpop.eup %5229  ;;  %v1668_v59 = vmul.f32 %v5224_v18, %v1660_v54  ;;  %v1654_v39 = vadd.f32 1.0, %v5228_v55  ;;  %v4189_v18 = vld [vmem:[%s7122_s6 + $0xd8] sm:$0xff]  ;;  %v1700_v55 = vpop.permute.xlu1 %1699 }
 0x9b4   :  { %v1655_v3 = vadd.f32 1.0, %v5230_v57  ;;  %v1669_v0 = vmul.f32 %v5226_v21, %v1661_v56  ;;  %v1695_v21 = vpop.permute.xlu0 %1694 }
 0x9b5   :  { %v4653_v4 = vpack.c.bf16 %v1668_v59, %v1666_v58  ;;  %v1662_v28 = vmul.f32 0.5, %v1654_v39 }
 0x9b6   :  { %v5232_v16 = vpop.eup %5231  ;;  %v4651_v22 = vpack.c.bf16 %v1669_v0, %v1667_v7  ;;  %v1663_v30 = vmul.f32 0.5, %v1655_v3 }
 0x9b7   :  { %v5234_v27 = vpop.eup %5233  ;;  %v1656_v34 = vadd.f32 1.0, %v5232_v16 }
 0x9b8   :  { %v5236_v29 = vpop.eup %5235  ;;  %v1657_v36 = vadd.f32 1.0, %v5234_v27  ;;  %4652 = vmatprep.subr.bf16.mxu1 %v4651_v22 }
 0x9b9   :  { %v5238_v32 = vpop.eup %5237  ;;  %v1664_v33 = vmul.f32 0.5, %v1656_v34  ;;  %4654 = vmatpush1.bf16.msra.mxu1 %v4653_v4  ;;  %v1670_v1 = vmul.f32 %v5236_v29, %v1662_v28  ;;  %v1705_v28 = vpop.permute.xlu0 %1704 }
 0x9ba   :  { %v5240_v37 = vpop.eup %5239  ;;  %v1665_v38 = vmul.f32 0.5, %v1657_v36  ;;  %v1671_v46 = vmul.f32 %v5238_v32, %v1663_v30 }
 0x9bb   :  { %v5242_v63 = vpop.eup %5241  ;;  %v1672_v45 = vmul.f32 %v5240_v37, %v1664_v33 }
 0x9bc   :  { %v1673_v49 = vmul.f32 %v5242_v63, %v1665_v38 }
 0x9bd   :  { %v4657_v50 = vpack.c.bf16 %v1672_v45, %v1670_v1  ;;  %v4238_v45 = vld [vmem:[%s7123_s7 + $0x100] sm:$0xff] }
 0x9be   :  { %v4655_v42 = vpack.c.bf16 %v1673_v49, %v1671_v46  ;;  %v4239_v46 = vld [vmem:[%s7123_s7 + $0x108] sm:$0xff]  ;;  %v4240_v49 = vld [vmem:[%s7123_s7 + $0x110] sm:$0xff] }
 0x9c0   :  { %4656 = vmatprep.subr.bf16.mxu1 %v4655_v42 }
 0x9c1   :  { %4658 = vmatpush1.bf16.msra.mxu1 %v4657_v50  ;;  %v4241_v50 = vld [vmem:[%s7123_s7 + $0x118] sm:$0xff] }
 0x9c4   :  { %4202 = vmatmul.mubr.msk.f32.vlgmr.msra.gmra.mrb[24].mxu1 %vm456_vm6, %v4186_v43 }
 0x9c5   :  { %1826 = vmatprep.mubr.f32.mxu1 %v5398_v31 }
 0x9c8   :  { %4203 = vmatmul.mubr.msk.f32.gmra.mrb[26].mxu1 %vm456_vm6, %v4187_v51 }
 0x9c9   :  { %1832 = vmatprep.mubr.f32.mxu1 %v5398_v31 }
 0x9cc   :  { %4204 = vmatmul.mubr.msk.f32.gmra.mrb[28].mxu1 %vm456_vm6, %v4188_v52 }
 0x9cd   :  { %1838 = vmatprep.mubr.f32.mxu1 %v5398_v31 }
 0x9d0   :  { %4205 = vmatmul.mubr.msk.f32.gmra.mrb[30].mxu1 %vm456_vm6, %v4189_v18 }
 0x9d1   :  { %1844 = vmatprep.mubr.f32.mxu1 %v5398_v31 }
 0xa97   :  { %v1822_v19 = vpop.f32.mrb[24].mxu1 }
 0xa98   :  { %v1824_v20 = vpop.f32.mrb[25].mxu1  ;;  %v1823_v54 = vadd.f32 %v1822_v19, %v1695_v21 }
 0xa99   :  { %v1825_v56 = vadd.f32 %v1824_v20, %v1695_v21 }
 0xa9a   :  { %v6215_v3 = vadd.f32 %v1823_v54, %v6052_v8 }
 0xa9b   :  { %v1828_v57 = vpop.f32.mrb[26].mxu1  ;;  %v6221_v0 = vadd.f32 %v1825_v56, %v6058_v9 }
 0xa9c   :  { %v1829_v58 = vadd.f32 %v1828_v57, %v1700_v55  ;;  %v1830_v59 = vpop.f32.mrb[27].mxu1 }
 0xa9d   :  { %v1831_v39 = vadd.f32 %v1830_v59, %v1700_v55 }
 0xa9e   :  { %v6218_v7 = vadd.f32 %v1829_v58, %v6055_v2  ;;  %v1710_v2 = vpop.permute.xlu1 %1709 }
 0xa9f   :  { %v6224_v4 = vadd.f32 %v1831_v39, %v6061_v24  ;;  %v1834_v16 = vpop.f32.mrb[28].mxu1 }
 0xaa0   :  { %v1836_v22 = vpop.f32.mrb[29].mxu1  ;;  %v5035_v27 = vpack.i.bf16 %v6218_v7, %v6215_v3  ;;  %v1835_v8 = vadd.f32 %v1834_v16, %v1705_v28 }
 0xaa1   :  { %v5040_v34 = vpack.i.bf16 %v6224_v4, %v6221_v0  ;;  %v1837_v29 = vadd.f32 %v1836_v22, %v1705_v28 }
 0xaa2   :  { %5036 = vrot.lane.b32.xlu0 %v5035_v27, %s5397_s3  ;;  %v6233_v32 = vadd.f32 %v1835_v8, %v6070_v40  ;;  %v4214_v40 = vld [vmem:[%s7121_s5 + $0x80] sm:$0xff] }
 0xaa3   :  { %v1840_v30 = vpop.f32.mrb[30].mxu1  ;;  %5041 = vrot.lane.b32.xlu1 %v5040_v34, %s5397_s3  ;;  %v6239_v37 = vadd.f32 %v1837_v29, %v6076_v62  ;;  %v4216_v62 = vld [vmem:[%s7121_s5 + $0x90] sm:$0xff] }
 0xaa4   :  { %v1841_v9 = vadd.f32 %v1840_v30, %v1710_v2  ;;  %v1842_v24 = vpop.f32.mrb[31].mxu1 }
 0xaa5   :  { %v1843_v36 = vadd.f32 %v1842_v24, %v1710_v2  ;;  %v4673_v24 = vpack.c.bf16 %v6218_v7, %v6215_v3 }
 0xaa6   :  { %v6236_v33 = vadd.f32 %v1841_v9, %v6073_v61  ;;  %v4215_v61 = vld [vmem:[%s7121_s5 + $0x88] sm:$0xff]  ;;  %v4671_v9 = vpack.c.bf16 %v6224_v4, %v6221_v0 }
 0xaa7   :  { %v6242_v38 = vadd.f32 %v1843_v36, %v6079_v41  ;;  %v4217_v41 = vld [vmem:[%s7121_s5 + $0x98] sm:$0xff] }
 0xaa8   :  { %v5045_v63 = vpack.i.bf16 %v6236_v33, %v6233_v32 }
 0xaa9   :  { %v5050_v1 = vpack.i.bf16 %v6242_v38, %v6239_v37  ;;  %v4675_v36 = vpack.c.bf16 %v6242_v38, %v6239_v37 }
 0xaaa   :  { %5046 = vrot.lane.b32.xlu0 %v5045_v63, %s5397_s3  ;;  %v4677_v63 = vpack.c.bf16 %v6236_v33, %v6233_v32 }
 0xaab   :  { %5051 = vrot.lane.b32.xlu1 %v5050_v1, %s5397_s3  ;;  %v4212_v1 = vld [vmem:[%s7120_s4 + $0x90] sm:$0xff] }
 0xaae   :  { %1929 = vperm.xlu0 %4954, %v4214_v40   ;;  %v4213_v40 = vld [vmem:[%s7120_s4 + $0x98] sm:$0xff] }
 0xaaf   :  { %1934 = vperm.xlu1 %4953, %v4215_v61   ;;  %v4190_v61 = vld [vmem:[%s7122_s6 + $0xe0] sm:$0xff] }
 0xab0   :  { %4206 = vmatmul.mubr.msk.f32.gmra.mrb[8].mxu1 %vm456_vm6, %v4190_v61 }
 0xab1   :  { %1850 = vmatprep.mubr.f32.mxu1 %v5398_v31 }
 0xab2   :  { %1939 = vperm.xlu0 %4954, %v4216_v62   ;;  %v4191_v62 = vld [vmem:[%s7122_s6 + $0xe8] sm:$0xff] }
 0xab3   :  { %1944 = vperm.xlu1 %4953, %v4217_v41   ;;  %v4192_v41 = vld [vmem:[%s7122_s6 + $0xf0] sm:$0xff] }
 0xab4   :  { %4207 = vmatmul.mubr.msk.f32.gmra.mrb[10].mxu1 %vm456_vm6, %v4191_v62 }
 0xab5   :  { %1856 = vmatprep.mubr.f32.mxu1 %v5398_v31 }
 0xab6   :  { %2116 = vperm.xlu0 %4954, %v4238_v45   ;;  %v4193_v45 = vld [vmem:[%s7122_s6 + $0xf8] sm:$0xff] }
 0xab7   :  { %2121 = vperm.xlu1 %4953, %v4239_v46  }
 0xab8   :  { %4208 = vmatmul.mubr.msk.f32.gmra.mrb[12].mxu1 %vm456_vm6, %v4192_v41 }
 0xab9   :  { %1862 = vmatprep.mubr.f32.mxu1 %v5398_v31 }
 0xaba   :  { %2126 = vperm.xlu0 %4954, %v4240_v49  }
 0xabb   :  { %2131 = vperm.xlu1 %4953, %v4241_v50  }
 0xabc   :  { %4209 = vmatmul.mubr.msk.f32.gmra.mrb[14].mxu1 %vm456_vm6, %v4193_v45 }
 0xabd   :  { %2242 = vmatprep.mubr.f32.mxu1 %v5398_v31 }
 0xb14   :  { %v5037_v42 = vpop.permute.xlu0 %5036 }
 0xb15   :  { %v5039_v43 = vunpack.i.h.bf16 %v5037_v42  ;;  %v5038_v51 = vunpack.i.l.bf16 %v5037_v42  ;;  %v5042_v52 = vpop.permute.xlu1 %5041 }
 0xb16   :  { %v5044_v18 = vunpack.i.h.bf16 %v5042_v52  ;;  %v5043_v19 = vunpack.i.l.bf16 %v5042_v52 }
 0xb18   :  { %v1901_v20 = vsel %vm107_vm0, %v5038_v51, %v5043_v19  ;;  %v1902_v21 = vsel %vm107_vm0, %v5039_v43, %v5044_v18  ;;  %v1905_v54 = vsel %vm107_vm0, %v5043_v19, %v5038_v51  ;;  %v1906_v55 = vsel %vm107_vm0, %v5044_v18, %v5039_v43 }
 0xb19   :  { %v4659_v56 = vpack.c.bf16 %v1902_v21, %v1901_v20  ;;  %v4662_v57 = vpack.c.bf16 %v1906_v55, %v1905_v54 }
 0xb1b   :  { %4661 = vmatprep.subr.msk.bf16.mxu0 %vm5630_vm3, %v4659_v56 }
 0xb1c   :  { %v5047_v58 = vpop.permute.xlu0 %5046  ;;  %4664 = vmatpush1.bf16.msk.msra.mxu0 %vm5641_vm4, %v4662_v57 }
 0xb1d   :  { %v5049_v59 = vunpack.i.h.bf16 %v5047_v58  ;;  %v5048_v39 = vunpack.i.l.bf16 %v5047_v58  ;;  %v5052_v16 = vpop.permute.xlu1 %5051 }
 0xb1e   :  { %v5054_v22 = vunpack.i.h.bf16 %v5052_v16  ;;  %v5053_v27 = vunpack.i.l.bf16 %v5052_v16 }
 0xb20   :  { %v1903_v28 = vsel %vm107_vm0, %v5048_v39, %v5053_v27  ;;  %v1904_v34 = vsel %vm107_vm0, %v5049_v59, %v5054_v22  ;;  %v1907_v8 = vsel %vm107_vm0, %v5053_v27, %v5048_v39  ;;  %v1908_v2 = vsel %vm107_vm0, %v5054_v22, %v5049_v59 }
 0xb21   :  { %v4665_v29 = vpack.c.bf16 %v1904_v34, %v1903_v28  ;;  %v4668_v30 = vpack.c.bf16 %v1908_v2, %v1907_v8 }
 0xb23   :  { %4667 = vmatprep.subr.msk.bf16.mxu0 %vm5630_vm3, %v4665_v29 }
 0xb24   :  { %4670 = vmatpush1.bf16.msk.msra.mxu0 %vm5641_vm4, %v4668_v30 }
 0xb25   :  { %4672 = vmatprep.subr.bf16.mxu0 %v4671_v9 }
 0xb28   :  { %4674 = vmatpush1.bf16.msra.mxu0 %v4673_v24 }
 0xb29   :  { %4676 = vmatprep.subr.bf16.mxu0 %v4675_v36 }
 0xb2c   :  { %4678 = vmatpush1.bf16.msra.mxu0 %v4677_v63 }
 0xb2d   :  { %v1930_v46 = vpop.permute.xlu0 %1929 }
 0xb2e   :  { %v1935_v52 = vpop.permute.xlu1 %1934 }
 0xb2f   :  { %4226 = vmatmul.mubr.msk.f32.vlgmr.msra.gmra.mrb[48].mxu0 %vm250_vm5, %v4210_v48 }
 0xb30   :  { %2029 = vmatprep.mubr.f32.mxu0 %v5398_v31 }
 0xb31   :  { %v1940_v56 = vpop.permute.xlu0 %1939 }
 0xb32   :  { %v1945_v27 = vpop.permute.xlu1 %1944 }
 0xb33   :  { %4227 = vmatmul.mubr.msk.f32.gmra.mrb[50].mxu0 %vm250_vm5, %v4211_v53 }
 0xb34   :  { %2035 = vmatprep.mubr.f32.mxu0 %v5398_v31 }
 0xb37   :  { %4228 = vmatmul.mubr.msk.f32.gmra.mrb[52].mxu0 %vm250_vm5, %v4212_v1 }
 0xb38   :  { %2041 = vmatprep.mubr.f32.mxu0 %v5398_v31 }
 0xb3b   :  { %4229 = vmatmul.mubr.msk.f32.gmra.mrb[54].mxu0 %vm250_vm5, %v4213_v40 }
 0xb3c   :  { %2445 = vmatprep.mubr.f32.mxu0 %v5398_v31 }
 0xc02   :  { %v2025_v49 = vpop.f32.mrb[48].mxu0 }
 0xc03   :  { %v2026_v50 = vadd.f32 %v2025_v49, %v1930_v46  ;;  %v2027_v42 = vpop.f32.mrb[49].mxu0 }
 0xc04   :  { %v2028_v43 = vadd.f32 %v2027_v42, %v1930_v46 }
 0xc05   :  { %v2056_v51 = vmul.f32 0.5, %v2026_v50 }
 0xc06   :  { %v2057_v18 = vmul.f32 0.5, %v2028_v43  ;;  %v2031_v19 = vpop.f32.mrb[50].mxu0 }
 0xc07   :  { %5243 = vtanh.f32 %v2056_v51  ;;  %v2032_v20 = vadd.f32 %v2031_v19, %v1935_v52  ;;  %v2033_v21 = vpop.f32.mrb[51].mxu0 }
 0xc08   :  { %5245 = vtanh.f32 %v2057_v18  ;;  %v2034_v54 = vadd.f32 %v2033_v21, %v1935_v52 }
 0xc09   :  { %5247 = vtanh.f32 %v2026_v50  ;;  %v2058_v55 = vmul.f32 0.5, %v2032_v20 }
 0xc0a   :  { %5249 = vtanh.f32 %v2028_v43  ;;  %v2059_v57 = vmul.f32 0.5, %v2034_v54  ;;  %v2037_v58 = vpop.f32.mrb[52].mxu0 }
 0xc0b   :  { %5251 = vtanh.f32 %v2058_v55  ;;  %v2038_v59 = vadd.f32 %v2037_v58, %v1940_v56  ;;  %v2039_v39 = vpop.f32.mrb[53].mxu0 }
 0xc0c   :  { %5253 = vtanh.f32 %v2059_v57  ;;  %v2040_v16 = vadd.f32 %v2039_v39, %v1940_v56 }
 0xc0d   :  { %5255 = vtanh.f32 %v2032_v20  ;;  %v2060_v22 = vmul.f32 0.5, %v2038_v59 }
 0xc0e   :  { %5257 = vtanh.f32 %v2034_v54  ;;  %v2061_v28 = vmul.f32 0.5, %v2040_v16  ;;  %v2043_v34 = vpop.f32.mrb[54].mxu0 }
 0xc0f   :  { %5259 = vtanh.f32 %v2060_v22  ;;  %v2044_v8 = vadd.f32 %v2043_v34, %v1945_v27  ;;  %v2045_v2 = vpop.f32.mrb[55].mxu0 }
 0xc10   :  { %5261 = vtanh.f32 %v2061_v28  ;;  %v2046_v29 = vadd.f32 %v2045_v2, %v1945_v27 }
 0xc11   :  { %v5244_v30 = vpop.eup %5243  ;;  %v2062_v9 = vmul.f32 0.5, %v2044_v8 }
 0xc12   :  { %v5246_v24 = vpop.eup %5245  ;;  %v2072_v36 = vadd.f32 1.0, %v5244_v30  ;;  %v2063_v63 = vmul.f32 0.5, %v2046_v29 }
 0xc13   :  { %v5248_v48 = vpop.eup %5247  ;;  %v2073_v53 = vadd.f32 1.0, %v5246_v24  ;;  %5263 = vtanh.f32 %v2062_v9 }
 0xc14   :  { %v5250_v1 = vpop.eup %5249  ;;  %5265 = vtanh.f32 %v2063_v63  ;;  %v2080_v62 = vmul.f32 0.5, %v2072_v36 }
 0xc15   :  { %v5252_v40 = vpop.eup %5251  ;;  %5267 = vtanh.f32 %v2038_v59  ;;  %v2081_v46 = vmul.f32 0.5, %v2073_v53 }
 0xc16   :  { %v5254_v61 = vpop.eup %5253  ;;  %v2074_v41 = vadd.f32 1.0, %v5252_v40  ;;  %5269 = vtanh.f32 %v2040_v16  ;;  %v2088_v18 = vmul.f32 %v5248_v48, %v2080_v62  ;;  %v4231_v40 = vld [vmem:[%s7122_s6 + $0x108] sm:$0xff]  ;;  %v4233_v62 = vld [vmem:[%s7122_s6 + $0x118] sm:$0xff] }
 0xc17   :  { %v5256_v45 = vpop.eup %5255  ;;  %v2075_v49 = vadd.f32 1.0, %v5254_v61  ;;  %5271 = vtanh.f32 %v2044_v8  ;;  %v2089_v54 = vmul.f32 %v5250_v1, %v2081_v46  ;;  %v4230_v1 = vld [vmem:[%s7122_s6 + $0x100] sm:$0xff]  ;;  %v4232_v61 = vld [vmem:[%s7122_s6 + $0x110] sm:$0xff]  ;;  %v2117_v46 = vpop.permute.xlu0 %2116 }
 0xc18   :  { %v5258_v50 = vpop.eup %5257  ;;  %v2082_v42 = vmul.f32 0.5, %v2074_v41  ;;  %5273 = vtanh.f32 %v2046_v29 }
 0xc19   :  { %v5260_v43 = vpop.eup %5259  ;;  %v2083_v51 = vmul.f32 0.5, %v2075_v49 }
 0xc1a   :  { %v5262_v52 = vpop.eup %5261  ;;  %v2090_v19 = vmul.f32 %v5256_v45, %v2082_v42  ;;  %v2076_v20 = vadd.f32 1.0, %v5260_v43 }
 0xc1b   :  { %v2077_v21 = vadd.f32 1.0, %v5262_v52  ;;  %v2091_v55 = vmul.f32 %v5258_v50, %v2083_v51  ;;  %v2122_v50 = vpop.permute.xlu1 %2121 }
 0xc1c   :  { %v4681_v56 = vpack.c.bf16 %v2090_v19, %v2088_v18  ;;  %v2084_v39 = vmul.f32 0.5, %v2076_v20 }
 0xc1d   :  { %v5264_v57 = vpop.eup %5263  ;;  %v4679_v58 = vpack.c.bf16 %v2091_v55, %v2089_v54  ;;  %v2085_v27 = vmul.f32 0.5, %v2077_v21 }
 0xc1e   :  { %v5266_v59 = vpop.eup %5265  ;;  %v2078_v16 = vadd.f32 1.0, %v5264_v57 }
 0xc1f   :  { %v5268_v22 = vpop.eup %5267  ;;  %v2079_v28 = vadd.f32 1.0, %v5266_v59  ;;  %4680 = vmatprep.subr.bf16.mxu1 %v4679_v58  ;;  %v2127_v58 = vpop.permute.xlu0 %2126 }
 0xc20   :  { %v5270_v34 = vpop.eup %5269  ;;  %v2086_v8 = vmul.f32 0.5, %v2078_v16  ;;  %4682 = vmatpush1.bf16.msra.mxu1 %v4681_v56  ;;  %v2092_v9 = vmul.f32 %v5268_v22, %v2084_v39 }
 0xc21   :  { %v5272_v2 = vpop.eup %5271  ;;  %v2087_v29 = vmul.f32 0.5, %v2079_v28  ;;  %v2093_v36 = vmul.f32 %v5270_v34, %v2085_v27 }
 0xc22   :  { %v5274_v30 = vpop.eup %5273  ;;  %v2094_v24 = vmul.f32 %v5272_v2, %v2086_v8 }
 0xc23   :  { %v2095_v63 = vmul.f32 %v5274_v30, %v2087_v29  ;;  %v4282_v30 = vld [vmem:[%s7123_s7 + $0x140] sm:$0xff] }
 0xc24   :  { %v4685_v48 = vpack.c.bf16 %v2094_v24, %v2092_v9  ;;  %v4283_v9 = vld [vmem:[%s7123_s7 + $0x148] sm:$0xff]  ;;  %v4284_v24 = vld [vmem:[%s7123_s7 + $0x150] sm:$0xff] }
 0xc25   :  { %v4683_v53 = vpack.c.bf16 %v2095_v63, %v2093_v36  ;;  %v4285_v36 = vld [vmem:[%s7123_s7 + $0x158] sm:$0xff] }
 0xc27   :  { %4684 = vmatprep.subr.bf16.mxu1 %v4683_v53 }
 0xc28   :  { %4686 = vmatpush1.bf16.msra.mxu1 %v4685_v48 }
 0xc2b   :  { %4246 = vmatmul.mubr.msk.f32.vlgmr.msra.gmra.mrb[32].mxu1 %vm456_vm6, %v4230_v1 }
 0xc2c   :  { %2248 = vmatprep.mubr.f32.mxu1 %v5398_v31 }
 0xc2f   :  { %4247 = vmatmul.mubr.msk.f32.gmra.mrb[34].mxu1 %vm456_vm6, %v4231_v40 }
 0xc30   :  { %2254 = vmatprep.mubr.f32.mxu1 %v5398_v31 }
 0xc33   :  { %4248 = vmatmul.mubr.msk.f32.gmra.mrb[36].mxu1 %vm456_vm6, %v4232_v61 }
 0xc34   :  { %2260 = vmatprep.mubr.f32.mxu1 %v5398_v31 }
 0xc37   :  { %4249 = vmatmul.mubr.msk.f32.gmra.mrb[38].mxu1 %vm456_vm6, %v4233_v62 }
 0xc38   :  { %2266 = vmatprep.mubr.f32.mxu1 %v5398_v31 }
 0xcfe   :  { %v2244_v41 = vpop.f32.mrb[32].mxu1 }
 0xcff   :  { %v2246_v45 = vpop.f32.mrb[33].mxu1  ;;  %v2245_v49 = vadd.f32 %v2244_v41, %v2117_v46 }
 0xd00   :  { %v2247_v42 = vadd.f32 %v2246_v45, %v2117_v46 }
 0xd01   :  { %v6367_v19 = vadd.f32 %v2245_v49, %v6215_v3 }
 0xd02   :  { %v2250_v43 = vpop.f32.mrb[34].mxu1  ;;  %v6373_v21 = vadd.f32 %v2247_v42, %v6221_v0 }
 0xd03   :  { %v2251_v51 = vadd.f32 %v2250_v43, %v2122_v50  ;;  %v2252_v52 = vpop.f32.mrb[35].mxu1 }
 0xd04   :  { %v2253_v18 = vadd.f32 %v2252_v52, %v2122_v50 }
 0xd05   :  { %v6370_v20 = vadd.f32 %v2251_v51, %v6218_v7  ;;  %v2132_v7 = vpop.permute.xlu1 %2131 }
 0xd06   :  { %v6376_v54 = vadd.f32 %v2253_v18, %v6224_v4  ;;  %v2256_v55 = vpop.f32.mrb[36].mxu1 }
 0xd07   :  { %v2258_v56 = vpop.f32.mrb[37].mxu1  ;;  %v5055_v57 = vpack.i.bf16 %v6370_v20, %v6367_v19  ;;  %v2257_v3 = vadd.f32 %v2256_v55, %v2127_v58 }
 0xd08   :  { %v5060_v59 = vpack.i.bf16 %v6376_v54, %v6373_v21  ;;  %v2259_v39 = vadd.f32 %v2258_v56, %v2127_v58 }
 0xd09   :  { %5056 = vrot.lane.b32.xlu0 %v5055_v57, %s5399_s16  ;;  %v6385_v27 = vadd.f32 %v2257_v3, %v6233_v32  ;;  %v4258_v32 = vld [vmem:[%s7121_s5 + $0xa0] sm:$0xff] }
 0xd0a   :  { %v2262_v16 = vpop.f32.mrb[38].mxu1  ;;  %5061 = vrot.lane.b32.xlu1 %v5060_v59, %s5399_s16  ;;  %v6391_v34 = vadd.f32 %v2259_v39, %v6239_v37  ;;  %v4260_v37 = vld [vmem:[%s7121_s5 + $0xb0] sm:$0xff]  ;;  %v4699_v39 = vpack.c.bf16 %v6376_v54, %v6373_v21 }
 0xd0b   :  { %v2263_v0 = vadd.f32 %v2262_v16, %v2132_v7  ;;  %v2264_v4 = vpop.f32.mrb[39].mxu1  ;;  %v4701_v16 = vpack.c.bf16 %v6370_v20, %v6367_v19 }
 0xd0c   :  { %v2265_v22 = vadd.f32 %v2264_v4, %v2132_v7 }
 0xd0d   :  { %v6388_v28 = vadd.f32 %v2263_v0, %v6236_v33  ;;  %v4259_v33 = vld [vmem:[%s7121_s5 + $0xa8] sm:$0xff] }
 0xd0e   :  { %v6394_v8 = vadd.f32 %v2265_v22, %v6242_v38  ;;  %v4261_v38 = vld [vmem:[%s7121_s5 + $0xb8] sm:$0xff]  ;;  %v4256_v22 = vld [vmem:[%s7120_s4 + $0xb0] sm:$0xff] }
 0xd0f   :  { %v5065_v2 = vpack.i.bf16 %v6388_v28, %v6385_v27  ;;  %v4705_v4 = vpack.c.bf16 %v6388_v28, %v6385_v27 }
 0xd10   :  { %v5070_v29 = vpack.i.bf16 %v6394_v8, %v6391_v34  ;;  %v4703_v0 = vpack.c.bf16 %v6394_v8, %v6391_v34 }
 0xd11   :  { %5066 = vrot.lane.b32.xlu0 %v5065_v2, %s5399_s16  ;;  %v4257_v2 = vld [vmem:[%s7120_s4 + $0xb8] sm:$0xff] }
 0xd12   :  { %5071 = vrot.lane.b32.xlu1 %v5070_v29, %s5399_s16  ;;  %v4234_v29 = vld [vmem:[%s7122_s6 + $0x120] sm:$0xff] }
 0xd13   :  { %4250 = vmatmul.mubr.msk.f32.gmra.mrb[8].mxu1 %vm456_vm6, %v4234_v29 }
 0xd14   :  { %2272 = vmatprep.mubr.f32.mxu1 %v5398_v31 }
 0xd15   :  { %2351 = vperm.xlu0 %4954, %v4258_v32   ;;  %v4235_v32 = vld [vmem:[%s7122_s6 + $0x128] sm:$0xff] }
 0xd16   :  { %2356 = vperm.xlu1 %4953, %v4259_v33   ;;  %v4236_v33 = vld [vmem:[%s7122_s6 + $0x130] sm:$0xff] }
 0xd17   :  { %4251 = vmatmul.mubr.msk.f32.gmra.mrb[10].mxu1 %vm456_vm6, %v4235_v32 }
 0xd18   :  { %2278 = vmatprep.mubr.f32.mxu1 %v5398_v31 }
 0xd19   :  { %2361 = vperm.xlu0 %4954, %v4260_v37   ;;  %v4237_v37 = vld [vmem:[%s7122_s6 + $0x138] sm:$0xff] }
 0xd1a   :  { %2366 = vperm.xlu1 %4953, %v4261_v38  }
 0xd1b   :  { %4252 = vmatmul.mubr.msk.f32.gmra.mrb[12].mxu1 %vm456_vm6, %v4236_v33 }
 0xd1c   :  { %2284 = vmatprep.mubr.f32.mxu1 %v5398_v31 }
 0xd1d   :  { %2538 = vperm.xlu0 %4954, %v4282_v30  }
 0xd1e   :  { %2543 = vperm.xlu1 %4953, %v4283_v9  }
 0xd1f   :  { %4253 = vmatmul.mubr.msk.f32.gmra.mrb[14].mxu1 %vm456_vm6, %v4237_v37 }
 0xd20   :  { %2664 = vmatprep.mubr.f32.mxu1 %v5398_v31 }
 0xd21   :  { %2548 = vperm.xlu0 %4954, %v4284_v24  }
 0xd22   :  { %2553 = vperm.xlu1 %4953, %v4285_v36  }
 0xd7b   :  { %v5057_v63 = vpop.permute.xlu0 %5056 }
 0xd7c   :  { %v5059_v48 = vunpack.i.h.bf16 %v5057_v63  ;;  %v5058_v53 = vunpack.i.l.bf16 %v5057_v63  ;;  %v5062_v1 = vpop.permute.xlu1 %5061 }
 0xd7d   :  { %v5064_v40 = vunpack.i.h.bf16 %v5062_v1  ;;  %v5063_v61 = vunpack.i.l.bf16 %v5062_v1 }
 0xd7f   :  { %v2323_v62 = vsel %vm626_vm7, %v5058_v53, %v5063_v61  ;;  %v2324_v41 = vsel %vm626_vm7, %v5059_v48, %v5064_v40  ;;  %v2327_v45 = vsel %vm626_vm7, %v5063_v61, %v5058_v53  ;;  %v2328_v46 = vsel %vm626_vm7, %v5064_v40, %v5059_v48 }
 0xd80   :  { %v4687_v49 = vpack.c.bf16 %v2324_v41, %v2323_v62  ;;  %v4690_v50 = vpack.c.bf16 %v2328_v46, %v2327_v45 }
 0xd82   :  { %4689 = vmatprep.subr.msk.bf16.mxu0 %vm5800_vm10, %v4687_v49 }
 0xd83   :  { %v5067_v42 = vpop.permute.xlu0 %5066  ;;  %4692 = vmatpush1.bf16.msk.msra.mxu0 %vm5804_vm11, %v4690_v50 }
 0xd84   :  { %v5069_v43 = vunpack.i.h.bf16 %v5067_v42  ;;  %v5068_v51 = vunpack.i.l.bf16 %v5067_v42  ;;  %v5072_v52 = vpop.permute.xlu1 %5071 }
 0xd85   :  { %v5074_v18 = vunpack.i.h.bf16 %v5072_v52  ;;  %v5073_v55 = vunpack.i.l.bf16 %v5072_v52 }
 0xd87   :  { %v2325_v56 = vsel %vm626_vm7, %v5068_v51, %v5073_v55  ;;  %v2326_v57 = vsel %vm626_vm7, %v5069_v43, %v5074_v18  ;;  %v2329_v58 = vsel %vm626_vm7, %v5073_v55, %v5068_v51  ;;  %v2330_v59 = vsel %vm626_vm7, %v5074_v18, %v5069_v43 }
 0xd88   :  { %v4693_v3 = vpack.c.bf16 %v2326_v57, %v2325_v56  ;;  %v4696_v7 = vpack.c.bf16 %v2330_v59, %v2329_v58 }
 0xd8a   :  { %4695 = vmatprep.subr.msk.bf16.mxu0 %vm5800_vm10, %v4693_v3 }
 0xd8b   :  { %4698 = vmatpush1.bf16.msk.msra.mxu0 %vm5804_vm11, %v4696_v7 }
 0xd8c   :  { %4700 = vmatprep.subr.bf16.mxu0 %v4699_v39 }
 0xd8f   :  { %4702 = vmatpush1.bf16.msra.mxu0 %v4701_v16 }
 0xd90   :  { %4704 = vmatprep.subr.bf16.mxu0 %v4703_v0 }
 0xd93   :  { %4706 = vmatpush1.bf16.msra.mxu0 %v4705_v4 }
 0xd94   :  { %v2352_v38 = vpop.permute.xlu0 %2351 }
 0xd95   :  { %v2357_v48 = vpop.permute.xlu1 %2356 }
 0xd96   :  { %4270 = vmatmul.mubr.msk.f32.vlgmr.msra.gmra.mrb[56].mxu0 %vm250_vm5, %v4254_v44 }
 0xd97   :  { %2451 = vmatprep.mubr.f32.mxu0 %v5398_v31 }
 0xd98   :  { %v2362_v45 = vpop.permute.xlu0 %2361 }
 0xd99   :  { %v2367_v52 = vpop.permute.xlu1 %2366 }
 0xd9a   :  { %4271 = vmatmul.mubr.msk.f32.gmra.mrb[58].mxu0 %vm250_vm5, %v4255_v47 }
 0xd9b   :  { %2457 = vmatprep.mubr.f32.mxu0 %v5398_v31 }
 0xd9e   :  { %4272 = vmatmul.mubr.msk.f32.gmra.mrb[60].mxu0 %vm250_vm5, %v4256_v22 }
 0xd9f   :  { %2463 = vmatprep.mubr.f32.mxu0 %v5398_v31 }
 0xda2   :  { %4273 = vmatmul.mubr.msk.f32.gmra.mrb[62].mxu0 %vm250_vm5, %v4257_v2 }
 0xda3   :  { %2867 = vmatprep.mubr.f32.mxu0 %v5398_v31 }
 0xe69   :  { %v2447_v30 = vpop.f32.mrb[56].mxu0 }
 0xe6a   :  { %v2448_v9 = vadd.f32 %v2447_v30, %v2352_v38  ;;  %v2449_v24 = vpop.f32.mrb[57].mxu0 }
 0xe6b   :  { %v2450_v36 = vadd.f32 %v2449_v24, %v2352_v38 }
 0xe6c   :  { %v2478_v63 = vmul.f32 0.5, %v2448_v9 }
 0xe6d   :  { %v2479_v53 = vmul.f32 0.5, %v2450_v36  ;;  %v2453_v1 = vpop.f32.mrb[58].mxu0 }
 0xe6e   :  { %5275 = vtanh.f32 %v2478_v63  ;;  %v2454_v40 = vadd.f32 %v2453_v1, %v2357_v48  ;;  %v2455_v61 = vpop.f32.mrb[59].mxu0 }
 0xe6f   :  { %5277 = vtanh.f32 %v2479_v53  ;;  %v2456_v62 = vadd.f32 %v2455_v61, %v2357_v48 }
 0xe70   :  { %5279 = vtanh.f32 %v2448_v9  ;;  %v2480_v41 = vmul.f32 0.5, %v2454_v40 }
 0xe71   :  { %5281 = vtanh.f32 %v2450_v36  ;;  %v2481_v46 = vmul.f32 0.5, %v2456_v62  ;;  %v2459_v49 = vpop.f32.mrb[60].mxu0 }
 0xe72   :  { %5283 = vtanh.f32 %v2480_v41  ;;  %v2460_v50 = vadd.f32 %v2459_v49, %v2362_v45  ;;  %v2461_v42 = vpop.f32.mrb[61].mxu0 }
 0xe73   :  { %5285 = vtanh.f32 %v2481_v46  ;;  %v2462_v43 = vadd.f32 %v2461_v42, %v2362_v45 }
 0xe74   :  { %5287 = vtanh.f32 %v2454_v40  ;;  %v2482_v51 = vmul.f32 0.5, %v2460_v50 }
 0xe75   :  { %5289 = vtanh.f32 %v2456_v62  ;;  %v2483_v18 = vmul.f32 0.5, %v2462_v43  ;;  %v2465_v55 = vpop.f32.mrb[62].mxu0 }
 0xe76   :  { %5291 = vtanh.f32 %v2482_v51  ;;  %v2466_v56 = vadd.f32 %v2465_v55, %v2367_v52  ;;  %v2467_v57 = vpop.f32.mrb[63].mxu0 }
 0xe77   :  { %5293 = vtanh.f32 %v2483_v18  ;;  %v2468_v58 = vadd.f32 %v2467_v57, %v2367_v52 }
 0xe78   :  { %v5276_v59 = vpop.eup %5275  ;;  %v2484_v3 = vmul.f32 0.5, %v2466_v56 }
 0xe79   :  { %v5278_v7 = vpop.eup %5277  ;;  %v2494_v39 = vadd.f32 1.0, %v5276_v59  ;;  %v2485_v16 = vmul.f32 0.5, %v2468_v58 }
 0xe7a   :  { %v5280_v0 = vpop.eup %5279  ;;  %v2495_v4 = vadd.f32 1.0, %v5278_v7  ;;  %5295 = vtanh.f32 %v2484_v3 }
 0xe7b   :  { %v5282_v44 = vpop.eup %5281  ;;  %5297 = vtanh.f32 %v2485_v16  ;;  %v2502_v2 = vmul.f32 0.5, %v2494_v39 }
 0xe7c   :  { %v5284_v47 = vpop.eup %5283  ;;  %5299 = vtanh.f32 %v2460_v50  ;;  %v2503_v33 = vmul.f32 0.5, %v2495_v4  ;;  %v4275_v4 = vld [vmem:[%s7122_s6 + $0x148] sm:$0xff] }
 0xe7d   :  { %v5286_v22 = vpop.eup %5285  ;;  %v2496_v29 = vadd.f32 1.0, %v5284_v47  ;;  %5301 = vtanh.f32 %v2462_v43  ;;  %v2510_v63 = vmul.f32 %v5280_v0, %v2502_v2  ;;  %v4274_v0 = vld [vmem:[%s7122_s6 + $0x140] sm:$0xff]  ;;  %v4277_v47 = vld [vmem:[%s7122_s6 + $0x158] sm:$0xff] }
 0xe7e   :  { %v5288_v32 = vpop.eup %5287  ;;  %v2497_v37 = vadd.f32 1.0, %v5286_v22  ;;  %5303 = vtanh.f32 %v2466_v56  ;;  %v2511_v40 = vmul.f32 %v5282_v44, %v2503_v33  ;;  %v4276_v44 = vld [vmem:[%s7122_s6 + $0x150] sm:$0xff]  ;;  %v2544_v33 = vpop.permute.xlu1 %2543 }
 0xe7f   :  { %v5290_v38 = vpop.eup %5289  ;;  %v2504_v30 = vmul.f32 0.5, %v2496_v29  ;;  %5305 = vtanh.f32 %v2468_v58  ;;  %v2539_v29 = vpop.permute.xlu0 %2538 }
 0xe80   :  { %v5292_v9 = vpop.eup %5291  ;;  %v2505_v24 = vmul.f32 0.5, %v2497_v37 }
 0xe81   :  { %v5294_v36 = vpop.eup %5293  ;;  %v2512_v48 = vmul.f32 %v5288_v32, %v2504_v30  ;;  %v2498_v53 = vadd.f32 1.0, %v5292_v9 }
 0xe82   :  { %v2499_v1 = vadd.f32 1.0, %v5294_v36  ;;  %v2513_v61 = vmul.f32 %v5290_v38, %v2505_v24 }
 0xe83   :  { %v4709_v62 = vpack.c.bf16 %v2512_v48, %v2510_v63  ;;  %v2506_v49 = vmul.f32 0.5, %v2498_v53 }
 0xe84   :  { %v5296_v41 = vpop.eup %5295  ;;  %v4707_v45 = vpack.c.bf16 %v2513_v61, %v2511_v40  ;;  %v2507_v43 = vmul.f32 0.5, %v2499_v1 }
 0xe85   :  { %v5298_v46 = vpop.eup %5297  ;;  %v2500_v50 = vadd.f32 1.0, %v5296_v41 }
 0xe86   :  { %v5300_v42 = vpop.eup %5299  ;;  %v2501_v51 = vadd.f32 1.0, %v5298_v46  ;;  %4708 = vmatprep.subr.bf16.mxu1 %v4707_v45 }
 0xe87   :  { %v5302_v52 = vpop.eup %5301  ;;  %v2508_v18 = vmul.f32 0.5, %v2500_v50  ;;  %4710 = vmatpush1.bf16.msra.mxu1 %v4709_v62  ;;  %v2514_v58 = vmul.f32 %v5300_v42, %v2506_v49  ;;  %v2549_v62 = vpop.permute.xlu0 %2548 }
 0xe88   :  { %v5304_v55 = vpop.eup %5303  ;;  %v2509_v56 = vmul.f32 0.5, %v2501_v51  ;;  %v2515_v3 = vmul.f32 %v5302_v52, %v2507_v43 }
 0xe89   :  { %v5306_v57 = vpop.eup %5305  ;;  %v2516_v59 = vmul.f32 %v5304_v55, %v2508_v18  ;;  %v4326_v55 = vld [vmem:[%s7123_s7 + $0x180] sm:$0xff] }
 0xe8a   :  { %v2517_v7 = vmul.f32 %v5306_v57, %v2509_v56  ;;  %v4327_v56 = vld [vmem:[%s7123_s7 + $0x188] sm:$0xff]  ;;  %v4328_v57 = vld [vmem:[%s7123_s7 + $0x190] sm:$0xff] }
 0xe8b   :  { %v4713_v39 = vpack.c.bf16 %v2516_v59, %v2514_v58  ;;  %v4329_v58 = vld [vmem:[%s7123_s7 + $0x198] sm:$0xff] }
 0xe8c   :  { %v4711_v16 = vpack.c.bf16 %v2517_v7, %v2515_v3 }
 0xe8e   :  { %4712 = vmatprep.subr.bf16.mxu1 %v4711_v16 }
 0xe8f   :  { %4714 = vmatpush1.bf16.msra.mxu1 %v4713_v39 }
 0xe92   :  { %4290 = vmatmul.mubr.msk.f32.vlgmr.msra.gmra.mrb[40].mxu1 %vm456_vm6, %v4274_v0 }
 0xe93   :  { %2670 = vmatprep.mubr.f32.mxu1 %v5398_v31 }
 0xe96   :  { %4291 = vmatmul.mubr.msk.f32.gmra.mrb[42].mxu1 %vm456_vm6, %v4275_v4 }
 0xe97   :  { %2676 = vmatprep.mubr.f32.mxu1 %v5398_v31 }
 0xe9a   :  { %4292 = vmatmul.mubr.msk.f32.gmra.mrb[44].mxu1 %vm456_vm6, %v4276_v44 }
 0xe9b   :  { %2682 = vmatprep.mubr.f32.mxu1 %v5398_v31 }
 0xe9e   :  { %4293 = vmatmul.mubr.msk.f32.gmra.mrb[46].mxu1 %vm456_vm6, %v4277_v47 }
 0xe9f   :  { %2688 = vmatprep.mubr.f32.mxu1 %v5398_v31 }
 0xf65   :  { %v2666_v22 = vpop.f32.mrb[40].mxu1 }
 0xf66   :  { %v2668_v2 = vpop.f32.mrb[41].mxu1  ;;  %v2667_v32 = vadd.f32 %v2666_v22, %v2539_v29 }
 0xf67   :  { %v2669_v37 = vadd.f32 %v2668_v2, %v2539_v29 }
 0xf68   :  { %v6519_v36 = vadd.f32 %v2667_v32, %v6367_v19 }
 0xf69   :  { %v2672_v38 = vpop.f32.mrb[42].mxu1  ;;  %v6525_v48 = vadd.f32 %v2669_v37, %v6373_v21 }
 0xf6a   :  { %v2673_v30 = vadd.f32 %v2672_v38, %v2544_v33  ;;  %v2674_v9 = vpop.f32.mrb[43].mxu1 }
 0xf6b   :  { %v2675_v24 = vadd.f32 %v2674_v9, %v2544_v33 }
 0xf6c   :  { %v6522_v63 = vadd.f32 %v2673_v30, %v6370_v20  ;;  %v2554_v20 = vpop.permute.xlu1 %2553 }
 0xf6d   :  { %v6528_v53 = vadd.f32 %v2675_v24, %v6376_v54  ;;  %v2678_v1 = vpop.f32.mrb[44].mxu1 }
 0xf6e   :  { %v2680_v40 = vpop.f32.mrb[45].mxu1  ;;  %v5075_v61 = vpack.i.bf16 %v6522_v63, %v6519_v36  ;;  %v2679_v19 = vadd.f32 %v2678_v1, %v2549_v62 }
 0xf6f   :  { %v5080_v41 = vpack.i.bf16 %v6528_v53, %v6525_v48  ;;  %v2681_v45 = vadd.f32 %v2680_v40, %v2549_v62 }
 0xf70   :  { %5076 = vrot.lane.b32.xlu0 %v5075_v61, %s5400_s2  ;;  %v6537_v50 = vadd.f32 %v2679_v19, %v6385_v27  ;;  %v4302_v27 = vld [vmem:[%s7121_s5 + $0xc0] sm:$0xff]  ;;  %v4727_v19 = vpack.c.bf16 %v6528_v53, %v6525_v48 }
 0xf71   :  { %v2684_v46 = vpop.f32.mrb[46].mxu1  ;;  %5081 = vrot.lane.b32.xlu1 %v5080_v41, %s5400_s2  ;;  %v6543_v43 = vadd.f32 %v2681_v45, %v6391_v34  ;;  %v4304_v34 = vld [vmem:[%s7121_s5 + $0xd0] sm:$0xff] }
 0xf72   :  { %v2685_v21 = vadd.f32 %v2684_v46, %v2554_v20  ;;  %v2686_v54 = vpop.f32.mrb[47].mxu1 }
 0xf73   :  { %v2687_v49 = vadd.f32 %v2686_v54, %v2554_v20  ;;  %v4729_v20 = vpack.c.bf16 %v6522_v63, %v6519_v36  ;;  %v4301_v54 = vld [vmem:[%s7120_s4 + $0xd8] sm:$0xff] }
 0xf74   :  { %v6540_v42 = vadd.f32 %v2685_v21, %v6388_v28  ;;  %v4303_v28 = vld [vmem:[%s7121_s5 + $0xc8] sm:$0xff]  ;;  %v4300_v21 = vld [vmem:[%s7120_s4 + $0xd0] sm:$0xff] }
 0xf75   :  { %v6546_v51 = vadd.f32 %v2687_v49, %v6394_v8  ;;  %v4305_v8 = vld [vmem:[%s7121_s5 + $0xd8] sm:$0xff]  ;;  %v4278_v49 = vld [vmem:[%s7122_s6 + $0x160] sm:$0xff] }
 0xf76   :  { %v5085_v52 = vpack.i.bf16 %v6540_v42, %v6537_v50  ;;  %v4733_v46 = vpack.c.bf16 %v6540_v42, %v6537_v50  ;;  %4294 = vmatmul.mubr.msk.f32.gmra.mrb[8].mxu1 %vm456_vm6, %v4278_v49 }
 0xf77   :  { %v5090_v18 = vpack.i.bf16 %v6546_v51, %v6543_v43  ;;  %v4731_v45 = vpack.c.bf16 %v6546_v51, %v6543_v43  ;;  %2694 = vmatprep.mubr.f32.mxu1 %v5398_v31 }
 0xf78   :  { %5086 = vrot.lane.b32.xlu0 %v5085_v52, %s5400_s2  ;;  %v4279_v52 = vld [vmem:[%s7122_s6 + $0x168] sm:$0xff] }
 0xf79   :  { %5091 = vrot.lane.b32.xlu1 %v5090_v18, %s5400_s2  ;;  %v4280_v18 = vld [vmem:[%s7122_s6 + $0x170] sm:$0xff] }
 0xf7a   :  { %4295 = vmatmul.mubr.msk.f32.gmra.mrb[10].mxu1 %vm456_vm6, %v4279_v52 }
 0xf7b   :  { %2700 = vmatprep.mubr.f32.mxu1 %v5398_v31 }
 0xf7c   :  { %2773 = vperm.xlu0 %4954, %v4302_v27   ;;  %v4281_v27 = vld [vmem:[%s7122_s6 + $0x178] sm:$0xff] }
 0xf7d   :  { %2778 = vperm.xlu1 %4953, %v4303_v28  }
 0xf7e   :  { %4296 = vmatmul.mubr.msk.f32.gmra.mrb[12].mxu1 %vm456_vm6, %v4280_v18 }
 0xf7f   :  { %2706 = vmatprep.mubr.f32.mxu1 %v5398_v31 }
 0xf80   :  { %2783 = vperm.xlu0 %4954, %v4304_v34  }
 0xf81   :  { %2788 = vperm.xlu1 %4953, %v4305_v8  }
 0xf82   :  { %4297 = vmatmul.mubr.msk.f32.gmra.mrb[14].mxu1 %vm456_vm6, %v4281_v27 }
 0xf83   :  { %3086 = vmatprep.mubr.f32.mxu1 %v5398_v31 }
 0xf84   :  { %2960 = vperm.xlu0 %4954, %v4326_v55  }
 0xf85   :  { %2965 = vperm.xlu1 %4953, %v4327_v56  }
 0xf88   :  { %2970 = vperm.xlu0 %4954, %v4328_v57  }
 0xf89   :  { %2975 = vperm.xlu1 %4953, %v4329_v58  }
 0xfe2   :  { %v5077_v59 = vpop.permute.xlu0 %5076 }
 0xfe3   :  { %v5079_v3 = vunpack.i.h.bf16 %v5077_v59  ;;  %v5078_v7 = vunpack.i.l.bf16 %v5077_v59  ;;  %v5082_v39 = vpop.permute.xlu1 %5081 }
 0xfe4   :  { %v5084_v16 = vunpack.i.h.bf16 %v5082_v39  ;;  %v5083_v0 = vunpack.i.l.bf16 %v5082_v39 }
 0xfe6   :  { %v2745_v4 = vsel %vm1051_vm12, %v5078_v7, %v5083_v0  ;;  %v2746_v44 = vsel %vm1051_vm12, %v5079_v3, %v5084_v16  ;;  %v2749_v47 = vsel %vm1051_vm12, %v5083_v0, %v5078_v7  ;;  %v2750_v22 = vsel %vm1051_vm12, %v5084_v16, %v5079_v3 }
 0xfe7   :  { %v4715_v2 = vpack.c.bf16 %v2746_v44, %v2745_v4  ;;  %v4718_v29 = vpack.c.bf16 %v2750_v22, %v2749_v47 }
 0xfe9   :  { %4717 = vmatprep.subr.msk.bf16.mxu0 %vm5959_vm15, %v4715_v2 }
 0xfea   :  { %v5087_v32 = vpop.permute.xlu0 %5086  ;;  %4720 = vmatpush1.bf16.msk.msra.mxu0 %vm5963_vm1, %v4718_v29 }
 0xfeb   :  { %v5089_v33 = vunpack.i.h.bf16 %v5087_v32  ;;  %v5088_v37 = vunpack.i.l.bf16 %v5087_v32  ;;  %v5092_v38 = vpop.permute.xlu1 %5091 }
 0xfec   :  { %v5094_v30 = vunpack.i.h.bf16 %v5092_v38  ;;  %v5093_v9 = vunpack.i.l.bf16 %v5092_v38 }
 0xfee   :  { %v2747_v24 = vsel %vm1051_vm12, %v5088_v37, %v5093_v9  ;;  %v2748_v1 = vsel %vm1051_vm12, %v5089_v33, %v5094_v30  ;;  %v2751_v40 = vsel %vm1051_vm12, %v5093_v9, %v5088_v37  ;;  %v2752_v61 = vsel %vm1051_vm12, %v5094_v30, %v5089_v33 }
 0xfef   :  { %v4721_v62 = vpack.c.bf16 %v2748_v1, %v2747_v24  ;;  %v4724_v41 = vpack.c.bf16 %v2752_v61, %v2751_v40 }
 0xff1   :  { %4723 = vmatprep.subr.msk.bf16.mxu0 %vm5959_vm15, %v4721_v62 }
 0xff2   :  { %4726 = vmatpush1.bf16.msk.msra.mxu0 %vm5963_vm1, %v4724_v41 }
 0xff3   :  { %4728 = vmatprep.subr.bf16.mxu0 %v4727_v19 }
 0xff6   :  { %4730 = vmatpush1.bf16.msra.mxu0 %v4729_v20 }
 0xff7   :  { %4732 = vmatprep.subr.bf16.mxu0 %v4731_v45 }
 0xffa   :  { %4734 = vmatpush1.bf16.msra.mxu0 %v4733_v46 }
 0xffb   :  { %v2774_v28 = vpop.permute.xlu0 %2773 }
 0xffc   :  { %v2779_v58 = vpop.permute.xlu1 %2778 }
 0xffd   :  { %4314 = vmatmul.mubr.msk.f32.vlgmr.msra.gmra.mrb[64].mxu0 %vm250_vm5, %v4298_v5 }
 0xffe   :  { %2873 = vmatprep.mubr.f32.mxu0 %v5398_v31 }
 0xfff   :  { %v2784_v4 = vpop.permute.xlu0 %2783 }
0x1000   :  { %v2789_v33 = vpop.permute.xlu1 %2788 }
0x1001   :  { %4315 = vmatmul.mubr.msk.f32.gmra.mrb[66].mxu0 %vm250_vm5, %v4299_v26 }
0x1002   :  { %2879 = vmatprep.mubr.f32.mxu0 %v5398_v31 }
0x1005   :  { %4316 = vmatmul.mubr.msk.f32.gmra.mrb[68].mxu0 %vm250_vm5, %v4300_v21 }
0x1006   :  { %2885 = vmatprep.mubr.f32.mxu0 %v5398_v31 }
0x1009   :  { %4317 = vmatmul.mubr.msk.f32.gmra.mrb[70].mxu0 %vm250_vm5, %v4301_v54 }
0x100a   :  { %3289 = vmatprep.mubr.f32.mxu0 %v5398_v31 }
0x10d0   :  { %v2869_v34 = vpop.f32.mrb[64].mxu0 }
0x10d1   :  { %v2870_v8 = vadd.f32 %v2869_v34, %v2774_v28  ;;  %v2871_v55 = vpop.f32.mrb[65].mxu0 }
0x10d2   :  { %v2872_v56 = vadd.f32 %v2871_v55, %v2774_v28 }
0x10d3   :  { %v2900_v57 = vmul.f32 0.5, %v2870_v8 }
0x10d4   :  { %v2901_v59 = vmul.f32 0.5, %v2872_v56  ;;  %v2875_v3 = vpop.f32.mrb[66].mxu0 }
0x10d5   :  { %5307 = vtanh.f32 %v2900_v57  ;;  %v2876_v7 = vadd.f32 %v2875_v3, %v2779_v58  ;;  %v2877_v39 = vpop.f32.mrb[67].mxu0 }
0x10d6   :  { %5309 = vtanh.f32 %v2901_v59  ;;  %v2878_v16 = vadd.f32 %v2877_v39, %v2779_v58 }
0x10d7   :  { %5311 = vtanh.f32 %v2870_v8  ;;  %v2902_v0 = vmul.f32 0.5, %v2876_v7 }
0x10d8   :  { %5313 = vtanh.f32 %v2872_v56  ;;  %v2903_v44 = vmul.f32 0.5, %v2878_v16  ;;  %v2881_v47 = vpop.f32.mrb[68].mxu0 }
0x10d9   :  { %5315 = vtanh.f32 %v2902_v0  ;;  %v2882_v22 = vadd.f32 %v2881_v47, %v2784_v4  ;;  %v2883_v2 = vpop.f32.mrb[69].mxu0 }
0x10da   :  { %5317 = vtanh.f32 %v2903_v44  ;;  %v2884_v29 = vadd.f32 %v2883_v2, %v2784_v4 }
0x10db   :  { %5319 = vtanh.f32 %v2876_v7  ;;  %v2904_v32 = vmul.f32 0.5, %v2882_v22 }
0x10dc   :  { %5321 = vtanh.f32 %v2878_v16  ;;  %v2905_v37 = vmul.f32 0.5, %v2884_v29  ;;  %v2887_v38 = vpop.f32.mrb[70].mxu0 }
0x10dd   :  { %5323 = vtanh.f32 %v2904_v32  ;;  %v2888_v30 = vadd.f32 %v2887_v38, %v2789_v33  ;;  %v2889_v9 = vpop.f32.mrb[71].mxu0 }
0x10de   :  { %5325 = vtanh.f32 %v2905_v37  ;;  %v2890_v24 = vadd.f32 %v2889_v9, %v2789_v33 }
0x10df   :  { %v5308_v1 = vpop.eup %5307  ;;  %v2906_v40 = vmul.f32 0.5, %v2888_v30 }
0x10e0   :  { %v5310_v61 = vpop.eup %5309  ;;  %v2916_v62 = vadd.f32 1.0, %v5308_v1  ;;  %v2907_v41 = vmul.f32 0.5, %v2890_v24 }
0x10e1   :  { %v5312_v19 = vpop.eup %5311  ;;  %v2917_v20 = vadd.f32 1.0, %v5310_v61  ;;  %5327 = vtanh.f32 %v2906_v40 }
0x10e2   :  { %v5314_v45 = vpop.eup %5313  ;;  %5329 = vtanh.f32 %v2907_v41  ;;  %v2924_v26 = vmul.f32 0.5, %v2916_v62  ;;  %v4318_v62 = vld [vmem:[%s7122_s6 + $0x180] sm:$0xff]  ;;  %v4319_v41 = vld [vmem:[%s7122_s6 + $0x188] sm:$0xff] }
0x10e3   :  { %v5316_v46 = vpop.eup %5315  ;;  %5331 = vtanh.f32 %v2882_v22  ;;  %v2925_v49 = vmul.f32 0.5, %v2917_v20  ;;  %v4321_v20 = vld [vmem:[%s7122_s6 + $0x198] sm:$0xff] }
0x10e4   :  { %v5318_v5 = vpop.eup %5317  ;;  %v2918_v21 = vadd.f32 1.0, %v5316_v46  ;;  %5333 = vtanh.f32 %v2884_v29  ;;  %v2932_v55 = vmul.f32 %v5312_v19, %v2924_v26  ;;  %v4320_v19 = vld [vmem:[%s7122_s6 + $0x190] sm:$0xff] }
0x10e5   :  { %v5320_v54 = vpop.eup %5319  ;;  %v2919_v52 = vadd.f32 1.0, %v5318_v5  ;;  %5335 = vtanh.f32 %v2888_v30  ;;  %v2933_v59 = vmul.f32 %v5314_v45, %v2925_v49  ;;  %v2961_v5 = vpop.permute.xlu0 %2960 }
0x10e6   :  { %v5322_v18 = vpop.eup %5321  ;;  %v2926_v27 = vmul.f32 0.5, %v2918_v21  ;;  %5337 = vtanh.f32 %v2890_v24  ;;  %v2966_v21 = vpop.permute.xlu1 %2965 }
0x10e7   :  { %v5324_v28 = vpop.eup %5323  ;;  %v2927_v34 = vmul.f32 0.5, %v2919_v52 }
0x10e8   :  { %v5326_v8 = vpop.eup %5325  ;;  %v2934_v56 = vmul.f32 %v5320_v54, %v2926_v27  ;;  %v2920_v57 = vadd.f32 1.0, %v5324_v28 }
0x10e9   :  { %v2921_v58 = vadd.f32 1.0, %v5326_v8  ;;  %v2935_v3 = vmul.f32 %v5322_v18, %v2927_v34 }
0x10ea   :  { %v4737_v7 = vpack.c.bf16 %v2934_v56, %v2932_v55  ;;  %v2928_v4 = vmul.f32 0.5, %v2920_v57 }
0x10eb   :  { %v5328_v39 = vpop.eup %5327  ;;  %v4735_v16 = vpack.c.bf16 %v2935_v3, %v2933_v59  ;;  %v2929_v22 = vmul.f32 0.5, %v2921_v58  ;;  %v2971_v3 = vpop.permute.xlu0 %2970 }
0x10ec   :  { %v5330_v0 = vpop.eup %5329  ;;  %v2922_v44 = vadd.f32 1.0, %v5328_v39 }
0x10ed   :  { %v5332_v47 = vpop.eup %5331  ;;  %v2923_v2 = vadd.f32 1.0, %v5330_v0  ;;  %4736 = vmatprep.subr.bf16.mxu1 %v4735_v16 }
0x10ee   :  { %v5334_v29 = vpop.eup %5333  ;;  %v2930_v32 = vmul.f32 0.5, %v2922_v44  ;;  %4738 = vmatpush1.bf16.msra.mxu1 %v4737_v7  ;;  %v2936_v30 = vmul.f32 %v5332_v47, %v2928_v4 }
0x10ef   :  { %v5336_v33 = vpop.eup %5335  ;;  %v2931_v37 = vmul.f32 0.5, %v2923_v2  ;;  %v2937_v24 = vmul.f32 %v5334_v29, %v2929_v22 }
0x10f0   :  { %v5338_v38 = vpop.eup %5337  ;;  %v2938_v9 = vmul.f32 %v5336_v33, %v2930_v32 }
0x10f1   :  { %v2939_v1 = vmul.f32 %v5338_v38, %v2931_v37  ;;  %v4349_v37 = vld [vmem:[%s7121_s5 + $0xf8] sm:$0xff]  ;;  %v412_v38 = vld [vmem:[%s7123_s7 + $0x20] sm:$0xff] }
0x10f2   :  { %v4741_v40 = vpack.c.bf16 %v2938_v9, %v2936_v30  ;;  %v4110_v30 = vld [vmem:[%s7123_s7 + $0x60] sm:$0xff]  ;;  %v413_v9 = vld [vmem:[%s7123_s7 + $0x28] sm:$0xff] }
0x10f3   :  { %v4739_v61 = vpack.c.bf16 %v2939_v1, %v2937_v24  ;;  %v4154_v24 = vld [vmem:[%s7123_s7 + $0xa0] sm:$0xff]  ;;  %v4111_v1 = vld [vmem:[%s7123_s7 + $0x68] sm:$0xff] }
0x10f5   :  { %4740 = vmatprep.subr.bf16.mxu1 %v4739_v61  ;;  %v414_v61 = vld [vmem:[%s7123_s7 + $0x30] sm:$0xff] }
0x10f6   :  { %4742 = vmatpush1.bf16.msra.mxu1 %v4741_v40  ;;  %v4198_v40 = vld [vmem:[%s7123_s7 + $0xe0] sm:$0xff] }
0x10f9   :  { %4334 = vmatmul.mubr.msk.f32.vlgmr.msra.gmra.mrb[48].mxu1 %vm456_vm6, %v4318_v62  ;;  %v4155_v62 = vld [vmem:[%s7123_s7 + $0xa8] sm:$0xff] }
0x10fa   :  { %3092 = vmatprep.mubr.f32.mxu1 %v5398_v31 }
0x10fd   :  { %4335 = vmatmul.mubr.msk.f32.gmra.mrb[50].mxu1 %vm456_vm6, %v4319_v41  ;;  %v4242_v41 = vld [vmem:[%s7123_s7 + $0x120] sm:$0xff] }
0x10fe   :  { %3098 = vmatprep.mubr.f32.mxu1 %v5398_v31 }
0x1101   :  { %4336 = vmatmul.mubr.msk.f32.gmra.mrb[52].mxu1 %vm456_vm6, %v4320_v19  ;;  %v4112_v19 = vld [vmem:[%s7123_s7 + $0x70] sm:$0xff] }
0x1102   :  { %3104 = vmatprep.mubr.f32.mxu1 %v5398_v31 }
0x1105   :  { %4337 = vmatmul.mubr.msk.f32.gmra.mrb[54].mxu1 %vm456_vm6, %v4321_v20  ;;  %v4199_v20 = vld [vmem:[%s7123_s7 + $0xe8] sm:$0xff] }
0x1106   :  { %3110 = vmatprep.mubr.f32.mxu1 %v5398_v31 }
0x11cc   :  { %v3088_v45 = vpop.f32.mrb[48].mxu1 }
0x11cd   :  { %v3090_v46 = vpop.f32.mrb[49].mxu1  ;;  %v3089_v26 = vadd.f32 %v3088_v45, %v2961_v5  ;;  %v4286_v45 = vld [vmem:[%s7123_s7 + $0x160] sm:$0xff] }
0x11ce   :  { %v3091_v54 = vadd.f32 %v3090_v46, %v2961_v5  ;;  %v415_v46 = vld [vmem:[%s7123_s7 + $0x38] sm:$0xff]  ;;  %v4156_v5 = vld [vmem:[%s7123_s7 + $0xb0] sm:$0xff] }
0x11cf   :  { %v6671_v28 = vadd.f32 %v3089_v26, %v6519_v36  ;;  %v4243_v26 = vld [vmem:[%s7123_s7 + $0x128] sm:$0xff] }
0x11d0   :  { %v3094_v49 = vpop.f32.mrb[50].mxu1  ;;  %v6677_v8 = vadd.f32 %v3091_v54, %v6525_v48  ;;  %v4113_v54 = vld [vmem:[%s7123_s7 + $0x78] sm:$0xff] }
0x11d1   :  { %v3095_v52 = vadd.f32 %v3094_v49, %v2966_v21  ;;  %v3096_v18 = vpop.f32.mrb[51].mxu1  ;;  %v4200_v49 = vld [vmem:[%s7123_s7 + $0xf0] sm:$0xff] }
0x11d2   :  { %v3097_v27 = vadd.f32 %v3096_v18, %v2966_v21  ;;  %v4330_v21 = vld [vmem:[%s7123_s7 + $0x1a0] sm:$0xff] }
0x11d3   :  { %v6674_v34 = vadd.f32 %v3095_v52, %v6522_v63  ;;  %v4287_v52 = vld [vmem:[%s7123_s7 + $0x168] sm:$0xff]  ;;  %v4374_v18 = vld [vmem:[%s7123_s7 + $0x1e0] sm:$0xff] }
0x11d4   :  { %v6680_v55 = vadd.f32 %v3097_v27, %v6528_v53  ;;  %v3100_v56 = vpop.f32.mrb[52].mxu1  ;;  %v2976_v53 = vpop.permute.xlu1 %2975  ;;  %v4157_v27 = vld [vmem:[%s7123_s7 + $0xb8] sm:$0xff] }
0x11d5   :  { %v5095_v57 = vpack.i.bf16 %v6674_v34, %v6671_v28  ;;  %v4757_v58 = vpack.c.bf16 %v6674_v34, %v6671_v28  ;;  %v3102_v59 = vpop.f32.mrb[53].mxu1  ;;  %v3101_v48 = vadd.f32 %v3100_v56, %v2971_v3  ;;  %v4244_v56 = vld [vmem:[%s7123_s7 + $0x130] sm:$0xff]  ;;  %v4345_v34 = vld [vmem:[%s7120_s4 + $0xf8] sm:$0xff] }
0x11d6   :  { %v5100_v36 = vpack.i.bf16 %v6680_v55, %v6677_v8  ;;  %v4755_v63 = vpack.c.bf16 %v6680_v55, %v6677_v8  ;;  %v3103_v7 = vadd.f32 %v3102_v59, %v2971_v3  ;;  %v4201_v59 = vld [vmem:[%s7123_s7 + $0xf8] sm:$0xff]  ;;  %v4288_v3 = vld [vmem:[%s7123_s7 + $0x170] sm:$0xff]  ;;  %v4322_v8 = vld [vmem:[%s7122_s6 + $0x1a0] sm:$0xff] }
0x11d7   :  { %5096 = vrot.lane.b32.xlu0 %v5095_v57, %s5401_s0  ;;  %v6693_v44 = vadd.f32 %v3101_v48, %v6537_v50  ;;  %v4331_v57 = vld [vmem:[%s7123_s7 + $0x1a8] sm:$0xff]  ;;  %v4245_v48 = vld [vmem:[%s7123_s7 + $0x138] sm:$0xff]  ;;  %v4344_v28 = vld [vmem:[%s7120_s4 + $0xf0] sm:$0xff]  ;;  %4338 = vmatmul.mubr.msk.f32.gmra.mrb[8].mxu1 %vm456_vm6, %v4322_v8 }
0x11d8   :  { %v3106_v39 = vpop.f32.mrb[54].mxu1  ;;  %5101 = vrot.lane.b32.xlu1 %v5100_v36, %s5401_s0  ;;  %v6699_v22 = vadd.f32 %v3103_v7, %v6543_v43  ;;  %v4347_v43 = vld [vmem:[%s7121_s5 + $0xe8] sm:$0xff]  ;;  %v4289_v7 = vld [vmem:[%s7123_s7 + $0x178] sm:$0xff]  ;;  %3116 = vmatprep.mubr.f32.mxu1 %v5398_v31 }
0x11d9   :  { %v3107_v16 = vadd.f32 %v3106_v39, %v2976_v53  ;;  %v3108_v0 = vpop.f32.mrb[55].mxu1  ;;  %v4375_v36 = vld [vmem:[%s7123_s7 + $0x1e8] sm:$0xff]  ;;  %v4376_v39 = vld [vmem:[%s7123_s7 + $0x1f0] sm:$0xff] }
0x11da   :  { %v3109_v4 = vadd.f32 %v3108_v0, %v2976_v53  ;;  %v4332_v53 = vld [vmem:[%s7123_s7 + $0x1b0] sm:$0xff]  ;;  %v4377_v0 = vld [vmem:[%s7123_s7 + $0x1f8] sm:$0xff]  ;;  %v4323_v55 = vld [vmem:[%s7122_s6 + $0x1a8] sm:$0xff] }
0x11db   :  { %v6696_v47 = vadd.f32 %v3107_v16, %v6540_v42  ;;  %v4346_v42 = vld [vmem:[%s7121_s5 + $0xe0] sm:$0xff]  ;;  %v4333_v16 = vld [vmem:[%s7123_s7 + $0x1b8] sm:$0xff]  ;;  %4339 = vmatmul.mubr.msk.f32.gmra.mrb[10].mxu1 %vm456_vm6, %v4323_v55 }
0x11dc   :  { %v6702_v2 = vadd.f32 %v3109_v4, %v6546_v51  ;;  %v4348_v51 = vld [vmem:[%s7121_s5 + $0xf0] sm:$0xff]  ;;  %v3788_v4 = vld [vmem:[%s7125_s9] sm:$0xff]  ;;  %3122 = vmatprep.mubr.f32.mxu1 %v5398_v31 }
0x11dd   :  { %v5105_v29 = vpack.i.bf16 %v6696_v47, %v6693_v44  ;;  %v4761_v32 = vpack.c.bf16 %v6696_v47, %v6693_v44  ;;  %v3586_v44 = vmul.u32 128, %v5521_v35  ;;  %v3557_v35 = vadd.s32 24, %v5494_v11 }
0x11de   :  { %v5110_v33 = vpack.i.bf16 %v6702_v2, %v6699_v22  ;;  %v4759_v50 = vpack.c.bf16 %v6702_v2, %v6699_v22  ;;  %v3570_v22 = vadd.s32 128, %v5494_v11  ;;  %v3571_v2 = vadd.s32 136, %v5494_v11 }
0x11df   :  { %5106 = vrot.lane.b32.xlu0 %v5105_v29, %s5401_s0  ;;  %v3789_v29 = vld [vmem:[%s7125_s9 + $0x8] sm:$0xff]  ;;  %v6922_v47 = vadd.s32 127, %v3586_v44 }
0x11e0   :  { %5111 = vrot.lane.b32.xlu1 %v5110_v33, %s5401_s0  ;;  %v3790_v33 = vld [vmem:[%s7125_s9 + $0x10] sm:$0xff] }
0x11e1   :  { %vm3588_vm0 = vcmp.eq.s32.totalorder %v5494_v11, %v6922_v47  ;;  %vm3604_vm3 = vcmp.eq.s32.totalorder %v3570_v22, %v6922_v47  ;;  %vm3605_vm4 = vcmp.eq.s32.totalorder %v3571_v2, %v6922_v47  ;;  %vm3591_vm1 = vcmp.eq.s32.totalorder %v3557_v35, %v6922_v47 }
0x11e2   :  { %vm4771_vm7 = vmpackc.low %vm3605_vm4, %vm3604_vm3 }
0x11e3   :  { %3195 = vperm.xlu0 %4954, %v4346_v42   ;;  %v3791_v42 = vld [vmem:[%s7125_s9 + $0x18] sm:$0xff] }
0x11e4   :  { %3200 = vperm.xlu1 %4953, %v4347_v43   ;;  %v3917_v43 = vld [vmem:[%s7127_s11] sm:$0xff] }
0x11e7   :  { %3205 = vperm.xlu0 %4954, %v4348_v51   ;;  %v3918_v51 = vld [vmem:[%s7127_s11 + $0x8] sm:$0xff] }
0x11e8   :  { %3210 = vperm.xlu1 %4953, %v4349_v37   ;;  %v3919_v37 = vld [vmem:[%s7127_s11 + $0x10] sm:$0xff] }
0x11eb   :  { %438 = vperm.xlu0 %4954, %v412_v38   ;;  %v3920_v38 = vld [vmem:[%s7127_s11 + $0x18] sm:$0xff] }
0x11ec   :  { %864 = vperm.xlu1 %4953, %v4110_v30  }
0x11ef   :  { %443 = vperm.xlu0 %4954, %v413_v9  }
0x11f0   :  { %1289 = vperm.xlu1 %4953, %v4154_v24  }
0x11f3   :  { %869 = vperm.xlu0 %4954, %v4111_v1  }
0x11f4   :  { %1714 = vperm.xlu1 %4953, %v4198_v40  }
0x11f7   :  { %448 = vperm.xlu0 %4954, %v414_v61  }
0x11f8   :  { %1294 = vperm.xlu1 %4953, %v4155_v62  }
0x11fb   :  { %2136 = vperm.xlu0 %4954, %v4242_v41  }
0x11fc   :  { %874 = vperm.xlu1 %4953, %v4112_v19  }
0x11ff   :  { %1719 = vperm.xlu0 %4954, %v4199_v20  }
0x1200   :  { %2558 = vperm.xlu1 %4953, %v4286_v45  }
0x1203   :  { %453 = vperm.xlu0 %4954, %v415_v46  }
0x1204   :  { %1299 = vperm.xlu1 %4953, %v4156_v5  }
0x1207   :  { %2141 = vperm.xlu0 %4954, %v4243_v26  }
0x1208   :  { %2980 = vperm.xlu1 %4953, %v4330_v21  }
0x120b   :  { %879 = vperm.xlu0 %4954, %v4113_v54  }
0x120c   :  { %1724 = vperm.xlu1 %4953, %v4200_v49  }
0x120f   :  { %2563 = vperm.xlu0 %4954, %v4287_v52  }
0x1210   :  { %3398 = vperm.xlu1 %4953, %v4374_v18  }
0x1213   :  { %1304 = vperm.xlu0 %4954, %v4157_v27  }
0x1214   :  { %2146 = vperm.xlu1 %4953, %v4244_v56  }
0x1217   :  { %2985 = vperm.xlu0 %4954, %v4331_v57  }
0x1218   :  { %1729 = vperm.xlu1 %4953, %v4201_v59  }
0x121b   :  { %2568 = vperm.xlu0 %4954, %v4288_v3  }
0x121c   :  { %3403 = vperm.xlu1 %4953, %v4375_v36   ;;  %v3573_v36 = vadd.s32 152, %v5494_v11 }
0x121e   :  { %vm3607_vm11 = vcmp.eq.s32.totalorder %v3573_v36, %v6922_v47 }
0x121f   :  { %2151 = vperm.xlu0 %4954, %v4245_v48   ;;  %v3556_v48 = vadd.s32 16, %v5494_v11 }
0x1220   :  { %2990 = vperm.xlu1 %4953, %v4332_v53   ;;  %v3574_v53 = vadd.s32 160, %v5494_v11 }
0x1221   :  { %vm3590_vm12 = vcmp.eq.s32.totalorder %v3556_v48, %v6922_v47 }
0x1222   :  { %vm3608_vm8 = vcmp.eq.s32.totalorder %v3574_v53, %v6922_v47  ;;  %vm4777_vm9 = vmpackc.low %vm3591_vm1, %vm3590_vm12 }
0x1223   :  { %2573 = vperm.xlu0 %4954, %v4289_v7   ;;  %v5402_v7 = vmov 1.0|1.0  }
0x1224   :  { %3408 = vperm.xlu1 %4953, %v4376_v39   ;;  %v3575_v39 = vadd.s32 168, %v5494_v11 }
0x1227   :  { %2995 = vperm.xlu0 %4954, %v4333_v16   ;;  %v3558_v16 = vadd.s32 32, %v5494_v11 }
0x1228   :  { %3413 = vperm.xlu1 %4953, %v4377_v0   ;;  %v3559_v0 = vadd.s32 40, %v5494_v11 }
0x122a   :  { %vm3593_vm3 = vcmp.eq.s32.totalorder %v3559_v0, %v6922_v47 }
0x122b   :  { %3794 = vperm.xlu0 %4954, %v3788_v4   ;;  %v3576_v4 = vadd.s32 176, %v5494_v11 }
0x122c   :  { %3799 = vperm.xlu1 %4953, %v3789_v29   ;;  %v3577_v29 = vadd.s32 184, %v5494_v11 }
0x122d   :  { %vm3610_vm4 = vcmp.eq.s32.totalorder %v3576_v4, %v6922_v47 }
0x122f   :  { %3804 = vperm.xlu0 %4954, %v3790_v33   ;;  %v3560_v33 = vadd.s32 48, %v5494_v11 }
0x1230   :  { %3809 = vperm.xlu1 %4953, %v3791_v42   ;;  %v3561_v42 = vadd.s32 56, %v5494_v11 }
0x1232   :  { %vm3595_vm12 = vcmp.eq.s32.totalorder %v3561_v42, %v6922_v47 }
0x1233   :  { %3923 = vperm.xlu0 %4954, %v3917_v43   ;;  %v3578_v43 = vadd.s32 192, %v5494_v11 }
0x1234   :  { %3928 = vperm.xlu1 %4953, %v3918_v51   ;;  %v3579_v51 = vadd.s32 200, %v5494_v11 }
0x1236   :  { %vm3613_vm1 = vcmp.eq.s32.totalorder %v3579_v51, %v6922_v47 }
0x1237   :  { %3933 = vperm.xlu0 %4954, %v3919_v37   ;;  %v3562_v37 = vadd.s32 64, %v5494_v11 }
0x1238   :  { %3938 = vperm.xlu1 %4953, %v3920_v38   ;;  %v3563_v38 = vadd.s32 72, %v5494_v11 }
0x1249   :  { %v5097_v30 = vpop.permute.xlu0 %5096 }
0x124a   :  { %v5099_v9 = vunpack.i.h.bf16 %v5097_v30  ;;  %v5098_v24 = vunpack.i.l.bf16 %v5097_v30  ;;  %v5102_v1 = vpop.permute.xlu1 %5101 }
0x124b   :  { %v5104_v40 = vunpack.i.h.bf16 %v5102_v1  ;;  %v5103_v61 = vunpack.i.l.bf16 %v5102_v1 }
0x124d   :  { %v3167_v62 = vsel %vm1476_vm2, %v5098_v24, %v5103_v61  ;;  %v3168_v41 = vsel %vm1476_vm2, %v5099_v9, %v5104_v40  ;;  %v3171_v19 = vsel %vm1476_vm2, %v5103_v61, %v5098_v24  ;;  %v3172_v20 = vsel %vm1476_vm2, %v5104_v40, %v5099_v9 }
0x124e   :  { %v4743_v45 = vpack.c.bf16 %v3168_v41, %v3167_v62  ;;  %v4746_v46 = vpack.c.bf16 %v3172_v20, %v3171_v19 }
0x1250   :  { %4745 = vmatprep.subr.msk.bf16.mxu0 %vm6122_vm13, %v4743_v45 }
0x1251   :  { %v5107_v5 = vpop.permute.xlu0 %5106  ;;  %4748 = vmatpush1.bf16.msk.msra.mxu0 %vm6126_vm14, %v4746_v46 }
0x1252   :  { %v5109_v26 = vunpack.i.h.bf16 %v5107_v5  ;;  %v5108_v21 = vunpack.i.l.bf16 %v5107_v5  ;;  %v5112_v54 = vpop.permute.xlu1 %5111 }
0x1253   :  { %v5114_v49 = vunpack.i.h.bf16 %v5112_v54  ;;  %v5113_v52 = vunpack.i.l.bf16 %v5112_v54 }
0x1255   :  { %v3169_v18 = vsel %vm1476_vm2, %v5108_v21, %v5113_v52  ;;  %v3170_v27 = vsel %vm1476_vm2, %v5109_v26, %v5114_v49  ;;  %v3173_v56 = vsel %vm1476_vm2, %v5113_v52, %v5108_v21  ;;  %v3174_v57 = vsel %vm1476_vm2, %v5114_v49, %v5109_v26 }
0x1256   :  { %v4749_v59 = vpack.c.bf16 %v3170_v27, %v3169_v18  ;;  %v4752_v3 = vpack.c.bf16 %v3174_v57, %v3173_v56 }
0x1258   :  { %4751 = vmatprep.subr.msk.bf16.mxu0 %vm6122_vm13, %v4749_v59  ;;  %vm3609_vm13 = vcmp.eq.s32.totalorder %v3575_v39, %v6922_v47 }
0x1259   :  { %4754 = vmatpush1.bf16.msk.msra.mxu0 %vm6126_vm14, %v4752_v3  ;;  %vm4779_vm14 = vmpackc.low %vm3609_vm13, %vm3608_vm8  ;;  %vm3597_vm13 = vcmp.eq.s32.totalorder %v3563_v38, %v6922_v47 }
0x125a   :  { %4756 = vmatprep.subr.bf16.mxu0 %v4755_v63  ;;  %v4325_v63 = vld [vmem:[%s7122_s6 + $0x1b8] sm:$0xff] }
0x125d   :  { %4758 = vmatpush1.bf16.msra.mxu0 %v4757_v58  ;;  %v4324_v58 = vld [vmem:[%s7122_s6 + $0x1b0] sm:$0xff] }
0x125e   :  { %4760 = vmatprep.subr.bf16.mxu0 %v4759_v50  ;;  %4340 = vmatmul.mubr.msk.f32.gmra.mrb[12].mxu1 %vm456_vm6, %v4324_v58  ;;  %v3572_v50 = vadd.s32 144, %v5494_v11 }
0x125f   :  { %3128 = vmatprep.mubr.f32.mxu1 %v5398_v31 }
0x1260   :  { %vm3606_vm10 = vcmp.eq.s32.totalorder %v3572_v50, %v6922_v47 }
0x1261   :  { %4762 = vmatpush1.bf16.msra.mxu0 %v4761_v32  ;;  %v3555_v32 = vadd.s32 8, %v5494_v11  ;;  %vm4775_vm2 = vmpackc.low %vm3607_vm11, %vm3606_vm10  ;;  %vm3594_vm11 = vcmp.eq.s32.totalorder %v3560_v33, %v6922_v47 }
0x1262   :  { %4341 = vmatmul.mubr.msk.f32.gmra.mrb[14].mxu1 %vm456_vm6, %v4325_v63  ;;  %4772 = vmatprep.subr.msk.bf16.mxu0 %vm4771_vm7, %v5402_v7  ;;  %v3196_v30 = vpop.permute.xlu0 %3195 }
0x1263   :  { %3504 = vmatprep.mubr.f32.mxu1 %v5398_v31  ;;  %v3201_v62 = vpop.permute.xlu1 %3200 }
0x1264   :  { %4358 = vmatmul.mubr.msk.f32.vlgmr.msra.gmra.mrb[72].mxu0 %vm250_vm5, %v4342_v60 }
0x1265   :  { %3295 = vmatprep.mubr.f32.mxu0 %v5398_v31 }
0x1266   :  { %v3206_v26 = vpop.permute.xlu0 %3205 }
0x1267   :  { %v3211_v56 = vpop.permute.xlu1 %3210 }
0x1268   :  { %4359 = vmatmul.mubr.msk.f32.gmra.mrb[74].mxu0 %vm250_vm5, %v4343_v6 }
0x1269   :  { %3301 = vmatprep.mubr.f32.mxu0 %v5398_v31 }
0x126c   :  { %4360 = vmatmul.mubr.msk.f32.gmra.mrb[76].mxu0 %vm250_vm5, %v4344_v28 }
0x126d   :  { %3307 = vmatprep.mubr.f32.mxu0 %v5398_v31 }
0x1270   :  { %4361 = vmatmul.mubr.msk.f32.gmra.mrb[78].mxu0 %vm250_vm5, %v4345_v34  ;;  %vm3589_vm5 = vcmp.eq.s32.totalorder %v3555_v32, %v6922_v47 }
0x1271   :  { %vm4773_vm15 = vmpackc.low %vm3589_vm5, %vm3588_vm0  ;;  %vm3592_vm0 = vcmp.eq.s32.totalorder %v3558_v16, %v6922_v47  ;;  %vm3611_vm5 = vcmp.eq.s32.totalorder %v3577_v29, %v6922_v47 }
0x1272   :  { %4774 = vmatpush3.bf16.msk.msra.mxu0 %vm4773_vm15, %v5402_v7  ;;  %vm4781_vm7 = vmpackc.low %vm3593_vm3, %vm3592_vm0  ;;  %vm3612_vm15 = vcmp.eq.s32.totalorder %v3578_v43, %v6922_v47 }
0x1273   :  { %4776 = vmatprep.subr.msk.bf16.mxu0 %vm4775_vm2, %v5402_v7  ;;  %vm4783_vm10 = vmpackc.low %vm3611_vm5, %vm3610_vm4 }
0x1274   :  { %vm4785_vm2 = vmpackc.low %vm3595_vm12, %vm3594_vm11 }
0x1275   :  { %vm4787_vm8 = vmpackc.low %vm3613_vm1, %vm3612_vm15 }
0x1276   :  { %4778 = vmatpush3.bf16.msk.msra.mxu0 %vm4777_vm9, %v5402_v7  ;;  %vm3596_vm9 = vcmp.eq.s32.totalorder %v3562_v37, %v6922_v47 }
0x1277   :  { %4780 = vmatprep.subr.msk.bf16.mxu0 %vm4779_vm14, %v5402_v7  ;;  %vm4789_vm14 = vmpackc.low %vm3597_vm13, %vm3596_vm9 }
0x127a   :  { %4782 = vmatpush3.bf16.msk.msra.mxu0 %vm4781_vm7, %v5402_v7 }
0x127b   :  { %4784 = vmatprep.subr.msk.bf16.mxu0 %vm4783_vm10, %v5402_v7 }
0x127e   :  { %4786 = vmatpush3.bf16.msk.msra.mxu0 %vm4785_vm2, %v5402_v7 }
0x127f   :  { %4788 = vmatprep.subr.msk.bf16.mxu0 %vm4787_vm8, %v5402_v7 }
0x1282   :  { %4790 = vmatpush3.bf16.msk.msra.mxu0 %vm4789_vm14, %v5402_v7 }
0x1337   :  { %v3291_v9 = vpop.f32.mrb[72].mxu0 }
0x1338   :  { %v3292_v24 = vadd.f32 %v3291_v9, %v3196_v30  ;;  %v3293_v1 = vpop.f32.mrb[73].mxu0 }
0x1339   :  { %v3294_v40 = vadd.f32 %v3293_v1, %v3196_v30 }
0x133a   :  { %v3322_v61 = vmul.f32 0.5, %v3292_v24 }
0x133b   :  { %v3323_v41 = vmul.f32 0.5, %v3294_v40  ;;  %v3297_v19 = vpop.f32.mrb[74].mxu0 }
0x133c   :  { %5339 = vtanh.f32 %v3322_v61  ;;  %v3298_v20 = vadd.f32 %v3297_v19, %v3201_v62  ;;  %v3299_v45 = vpop.f32.mrb[75].mxu0 }
0x133d   :  { %5341 = vtanh.f32 %v3323_v41  ;;  %v3300_v46 = vadd.f32 %v3299_v45, %v3201_v62 }
0x133e   :  { %5343 = vtanh.f32 %v3292_v24  ;;  %v3324_v5 = vmul.f32 0.5, %v3298_v20 }
0x133f   :  { %5345 = vtanh.f32 %v3294_v40  ;;  %v3325_v21 = vmul.f32 0.5, %v3300_v46  ;;  %v3303_v54 = vpop.f32.mrb[76].mxu0 }
0x1340   :  { %5347 = vtanh.f32 %v3324_v5  ;;  %v3304_v49 = vadd.f32 %v3303_v54, %v3206_v26  ;;  %v3305_v52 = vpop.f32.mrb[77].mxu0 }
0x1341   :  { %5349 = vtanh.f32 %v3325_v21  ;;  %v3306_v18 = vadd.f32 %v3305_v52, %v3206_v26 }
0x1342   :  { %5351 = vtanh.f32 %v3298_v20  ;;  %v3326_v27 = vmul.f32 0.5, %v3304_v49 }
0x1343   :  { %5353 = vtanh.f32 %v3300_v46  ;;  %v3327_v57 = vmul.f32 0.5, %v3306_v18  ;;  %v3309_v59 = vpop.f32.mrb[78].mxu0 }
0x1344   :  { %5355 = vtanh.f32 %v3326_v27  ;;  %v3310_v3 = vadd.f32 %v3309_v59, %v3211_v56  ;;  %v3311_v60 = vpop.f32.mrb[79].mxu0  ;;  %v4364_v59 = vld [vmem:[%s7122_s6 + $0x1d0] sm:$0xff] }
0x1345   :  { %5357 = vtanh.f32 %v3327_v57  ;;  %v3312_v6 = vadd.f32 %v3311_v60, %v3211_v56  ;;  %v4362_v56 = vld [vmem:[%s7122_s6 + $0x1c0] sm:$0xff]  ;;  %v4363_v57 = vld [vmem:[%s7122_s6 + $0x1c8] sm:$0xff] }
0x1346   :  { %v5340_v28 = vpop.eup %5339  ;;  %v3328_v34 = vmul.f32 0.5, %v3310_v3  ;;  %v4366_v60 = vld [vmem:[%s7122_s6 + $0x1e0] sm:$0xff] }
0x1347   :  { %v5342_v8 = vpop.eup %5341  ;;  %v3338_v55 = vadd.f32 1.0, %v5340_v28  ;;  %v3329_v58 = vmul.f32 0.5, %v3312_v6  ;;  %v4368_v28 = vld [vmem:[%s7122_s6 + $0x1f0] sm:$0xff] }
0x1348   :  { %v5344_v63 = vpop.eup %5343  ;;  %v3339_v44 = vadd.f32 1.0, %v5342_v8  ;;  %5359 = vtanh.f32 %v3328_v34  ;;  %v4369_v34 = vld [vmem:[%s7122_s6 + $0x1f8] sm:$0xff]  ;;  %v3580_v8 = vadd.s32 208, %v5494_v11 }
0x1349   :  { %v5346_v22 = vpop.eup %5345  ;;  %5361 = vtanh.f32 %v3329_v58  ;;  %v3346_v50 = vmul.f32 0.5, %v3338_v55  ;;  %v3581_v55 = vadd.s32 216, %v5494_v11  ;;  %v3564_v58 = vadd.s32 80, %v5494_v11 }
0x134a   :  { %v5348_v2 = vpop.eup %5347  ;;  %5363 = vtanh.f32 %v3304_v49  ;;  %v3347_v35 = vmul.f32 0.5, %v3339_v44  ;;  %vm3614_vm0 = vcmp.eq.s32.totalorder %v3580_v8, %v6922_v47  ;;  %v3583_v44 = vadd.s32 232, %v5494_v11 }
0x134b   :  { %v5350_v32 = vpop.eup %5349  ;;  %v3340_v36 = vadd.f32 1.0, %v5348_v2  ;;  %5365 = vtanh.f32 %v3306_v18  ;;  %v3354_v33 = vmul.f32 %v5344_v63, %v3346_v50  ;;  %vm3615_vm3 = vcmp.eq.s32.totalorder %v3581_v55, %v6922_v47 }
0x134c   :  { %v5352_v48 = vpop.eup %5351  ;;  %v3341_v53 = vadd.f32 1.0, %v5350_v32  ;;  %5367 = vtanh.f32 %v3310_v3  ;;  %v3355_v37 = vmul.f32 %v5346_v22, %v3347_v35  ;;  %v4365_v3 = vld [vmem:[%s7122_s6 + $0x1d8] sm:$0xff]  ;;  %vm4791_vm4 = vmpackc.low %vm3615_vm3, %vm3614_vm0  ;;  %v3565_v63 = vadd.s32 88, %v5494_v11  ;;  %v439_v35 = vpop.permute.xlu0 %438 }
0x134d   :  { %v5354_v39 = vpop.eup %5353  ;;  %v3348_v16 = vmul.f32 0.5, %v3340_v36  ;;  %5369 = vtanh.f32 %v3312_v6  ;;  %v4367_v6 = vld [vmem:[%s7122_s6 + $0x1e8] sm:$0xff]  ;;  %4792 = vmatprep.subr.msk.bf16.mxu0 %vm4791_vm4, %v5402_v7  ;;  %vm3598_vm5 = vcmp.eq.s32.totalorder %v3564_v58, %v6922_v47  ;;  %v3566_v22 = vadd.s32 96, %v5494_v11 }
0x134e   :  { %v5356_v0 = vpop.eup %5355  ;;  %v3349_v4 = vmul.f32 0.5, %v3341_v53  ;;  %vm3599_vm7 = vcmp.eq.s32.totalorder %v3565_v63, %v6922_v47  ;;  %v3567_v2 = vadd.s32 104, %v5494_v11  ;;  %vm3617_vm12 = vcmp.eq.s32.totalorder %v3583_v44, %v6922_v47  ;;  %v865_v53 = vpop.permute.xlu1 %864 }
0x134f   :  { %v5358_v29 = vpop.eup %5357  ;;  %v3356_v42 = vmul.f32 %v5352_v48, %v3348_v16  ;;  %v3342_v43 = vadd.f32 1.0, %v5356_v0  ;;  %vm4793_vm10 = vmpackc.low %vm3599_vm7, %vm3598_vm5  ;;  %vm3600_vm1 = vcmp.eq.s32.totalorder %v3566_v22, %v6922_v47  ;;  %v3584_v32 = vadd.s32 240, %v5494_v11 }
0x1350   :  { %v3343_v51 = vadd.f32 1.0, %v5358_v29  ;;  %v3357_v38 = vmul.f32 %v5354_v39, %v3349_v4  ;;  %4794 = vmatpush3.bf16.msk.msra.mxu0 %vm4793_vm10, %v5402_v7  ;;  %vm3601_vm2 = vcmp.eq.s32.totalorder %v3567_v2, %v6922_v47  ;;  %v3585_v50 = vadd.s32 248, %v5494_v11  ;;  %v444_v39 = vpop.permute.xlu0 %443 }
0x1351   :  { %v4765_v30 = vpack.c.bf16 %v3356_v42, %v3354_v33  ;;  %v3350_v40 = vmul.f32 0.5, %v3342_v43  ;;  %vm4797_vm8 = vmpackc.low %vm3601_vm2, %vm3600_vm1  ;;  %v3568_v36 = vadd.s32 112, %v5494_v11  ;;  %v3569_v48 = vadd.s32 120, %v5494_v11 }
0x1352   :  { %v5360_v9 = vpop.eup %5359  ;;  %v4763_v24 = vpack.c.bf16 %v3357_v38, %v3355_v37  ;;  %v3351_v41 = vmul.f32 0.5, %v3343_v51  ;;  %vm3618_vm9 = vcmp.eq.s32.totalorder %v3584_v32, %v6922_v47  ;;  %vm3619_vm13 = vcmp.eq.s32.totalorder %v3585_v50, %v6922_v47  ;;  %v1290_v16 = vpop.permute.xlu1 %1289 }
0x1353   :  { %v5362_v1 = vpop.eup %5361  ;;  %v3344_v61 = vadd.f32 1.0, %v5360_v9  ;;  %vm4799_vm14 = vmpackc.low %vm3619_vm13, %vm3618_vm9  ;;  %vm3602_vm0 = vcmp.eq.s32.totalorder %v3568_v36, %v6922_v47  ;;  %vm3603_vm3 = vcmp.eq.s32.totalorder %v3569_v48, %v6922_v47 }
0x1354   :  { %v5364_v62 = vpop.eup %5363  ;;  %v3345_v19 = vadd.f32 1.0, %v5362_v1  ;;  %4764 = vmatprep.subr.bf16.mxu1 %v4763_v24  ;;  %vm4801_vm4 = vmpackc.low %vm3603_vm3, %vm3602_vm0  ;;  %v870_v0 = vpop.permute.xlu0 %869 }
0x1355   :  { %v5366_v20 = vpop.eup %5365  ;;  %v3352_v45 = vmul.f32 0.5, %v3344_v61  ;;  %4766 = vmatpush1.bf16.msra.mxu1 %v4765_v30  ;;  %v3358_v21 = vmul.f32 %v5364_v62, %v3350_v40 }
0x1356   :  { %v5368_v46 = vpop.eup %5367  ;;  %v3353_v5 = vmul.f32 0.5, %v3345_v19  ;;  %v3359_v49 = vmul.f32 %v5366_v20, %v3351_v41  ;;  %v572_v41 = vadd.f32 %v5852_v10, %v439_v35  ;;  %v574_v19 = vadd.f32 %v5854_v12, %v439_v35 }
0x1357   :  { %v5370_v26 = vpop.eup %5369  ;;  %v3360_v54 = vmul.f32 %v5368_v46, %v3352_v45 }
0x1358   :  { %v3361_v52 = vmul.f32 %v5370_v26, %v3353_v5  ;;  %v449_v4 = vpop.permute.xlu0 %448  ;;  %v4820_v46 = vadd.f32 %v865_v53, %v572_v41  ;;  %v4829_v26 = vadd.f32 %v865_v53, %v574_v19 }
0x1359   :  { %v4769_v18 = vpack.c.bf16 %v3360_v54, %v3358_v21  ;;  %v586_v58 = vadd.f32 %v5862_v15, %v449_v4 }
0x135a   :  { %v4767_v27 = vpack.c.bf16 %v3361_v52, %v3359_v49  ;;  %v578_v49 = vadd.f32 %v5856_v13, %v444_v39  ;;  %v4821_v52 = vadd.f32 %v4820_v46, %v1290_v16 }
0x135c   :  { %4768 = vmatprep.subr.bf16.mxu1 %v4767_v27  ;;  %v2137_v33 = vpop.permute.xlu0 %2136  ;;  %v580_v27 = vadd.f32 %v5858_v14, %v444_v39 }
0x135d   :  { %4770 = vmatpush1.bf16.msra.mxu1 %v4769_v18 }
0x1360   :  { %4378 = vmatmul.mubr.msk.f32.vlgmr.msra.gmra.mrb[56].mxu1 %vm456_vm6, %v4362_v56  ;;  %v1720_v43 = vpop.permute.xlu0 %1719  ;;  %v4830_v56 = vadd.f32 %v4829_v26, %v1290_v16 }
0x1361   :  { %3508 = vmatprep.mubr.f32.mxu1 %v5398_v31 }
0x1364   :  { %4379 = vmatmul.mubr.msk.f32.gmra.mrb[58].mxu1 %vm456_vm6, %v4363_v57  ;;  %v454_v37 = vpop.permute.xlu0 %453 }
0x1365   :  { %3512 = vmatprep.mubr.f32.mxu1 %v5398_v31  ;;  %v590_v22 = vadd.f32 %v5864_v23, %v454_v37  ;;  %v592_v36 = vadd.f32 %v5866_v25, %v454_v37 }
0x1368   :  { %4380 = vmatmul.mubr.msk.f32.gmra.mrb[60].mxu1 %vm456_vm6, %v4364_v59  ;;  %v4838_v59 = vadd.f32 %v870_v0, %v578_v49 }
0x1369   :  { %3516 = vmatprep.mubr.f32.mxu1 %v5398_v31 }
0x136c   :  { %4381 = vmatmul.mubr.msk.f32.gmra.mrb[62].mxu1 %vm456_vm6, %v4365_v3  ;;  %v4847_v3 = vadd.f32 %v870_v0, %v580_v27 }
0x136d   :  { %3520 = vmatprep.mubr.f32.mxu1 %v5398_v31 }
0x1370   :  { %4382 = vmatmul.mubr.msk.f32.gmra.mrb[8].mxu1 %vm456_vm6, %v4366_v60 }
0x1371   :  { %3526 = vmatprep.mubr.f32.mxu1 %v5398_v31 }
0x1374   :  { %4383 = vmatmul.mubr.msk.f32.gmra.mrb[10].mxu1 %vm456_vm6, %v4367_v6 }
0x1375   :  { %3532 = vmatprep.mubr.f32.mxu1 %v5398_v31 }
0x1378   :  { %4384 = vmatmul.mubr.msk.f32.gmra.mrb[12].mxu1 %vm456_vm6, %v4368_v28  ;;  %v584_v28 = vadd.f32 %v5860_v17, %v449_v4 }
0x1379   :  { %3538 = vmatprep.mubr.f32.mxu1 %v5398_v31  ;;  %v3582_v31 = vadd.s32 224, %v5494_v11  ;;  %v1715_v11 = vpop.permute.xlu1 %1714 }
0x137a   :  { %v4822_v10 = vadd.f32 %v4821_v52, %v1715_v11  ;;  %v4831_v12 = vadd.f32 %v4830_v56, %v1715_v11 }
0x137b   :  { %vm3616_vm11 = vcmp.eq.s32.totalorder %v3582_v31, %v6922_v47  ;;  %v2142_v47 = vpop.permute.xlu0 %2141 }
0x137c   :  { %4385 = vmatmul.mubr.msk.f32.gmra.mrb[14].mxu1 %vm456_vm6, %v4369_v34  ;;  %vm4795_vm15 = vmpackc.low %vm3617_vm12, %vm3616_vm11  ;;  %v4823_v8 = vadd.f32 %v4822_v10, %v2137_v33  ;;  %v4832_v63 = vadd.f32 %v4831_v12, %v2137_v33 }
0x137d   :  { %4796 = vmatprep.subr.msk.bf16.mxu0 %vm4795_vm15, %v5402_v7  ;;  %v1295_v29 = vpop.permute.xlu1 %1294 }
0x137e   :  { %4798 = vmatpush3.bf16.msk.msra.mxu0 %vm4797_vm8, %v5402_v7  ;;  %v4839_v34 = vadd.f32 %v4838_v59, %v1295_v29  ;;  %v4848_v13 = vadd.f32 %v4847_v3, %v1295_v29 }
0x137f   :  { %4800 = vmatprep.subr.msk.bf16.mxu0 %vm4799_vm14, %v5402_v7  ;;  %v880_v9 = vpop.permute.xlu0 %879 }
0x1380   :  { %v4840_v44 = vadd.f32 %v4839_v34, %v1720_v43  ;;  %v4849_v32 = vadd.f32 %v4848_v13, %v1720_v43  ;;  %v4874_v16 = vadd.f32 %v880_v9, %v590_v22  ;;  %v4883_v29 = vadd.f32 %v880_v9, %v592_v36 }
0x1381   :  { %v875_v42 = vpop.permute.xlu1 %874 }
0x1382   :  { %4802 = vmatpush3.bf16.msk.msra.mxu0 %vm4801_vm4, %v5402_v7  ;;  %v4856_v31 = vadd.f32 %v875_v42, %v584_v28  ;;  %v4865_v2 = vadd.f32 %v875_v42, %v586_v58  ;;  %v4841_v53 = vadd.f32 %v4840_v44, %v2142_v47  ;;  %v4850_v11 = vadd.f32 %v4849_v32, %v2142_v47  ;;  %v3784_v32 = vld [vmem:[%s7124_s8] sm:$0xff] }
0x1383   :  { %v2564_v1 = vpop.permute.xlu0 %2563 }
0x1384   :  { %v4842_v19 = vadd.f32 %v4841_v53, %v2564_v1 }
0x1385   :  { %v2559_v51 = vpop.permute.xlu1 %2558 }
0x1386   :  { %v4824_v14 = vadd.f32 %v4823_v8, %v2559_v51  ;;  %v4833_v50 = vadd.f32 %v4832_v63, %v2559_v51  ;;  %v4851_v51 = vadd.f32 %v4850_v11, %v2564_v1 }
0x1387   :  { %v1305_v40 = vpop.permute.xlu0 %1304 }
0x1388   :  { %v4875_v42 = vadd.f32 %v4874_v16, %v1305_v40  ;;  %v4884_v25 = vadd.f32 %v4883_v29, %v1305_v40  ;;  %v4450_v16 = vld [vmem:[%s7117_s1] ss:$0 sm:$0xff] }
0x1389   :  { %v1300_v38 = vpop.permute.xlu1 %1299 }
0x138a   :  { %v4857_v17 = vadd.f32 %v4856_v31, %v1300_v38  ;;  %v4866_v15 = vadd.f32 %v4865_v2, %v1300_v38 }
0x138b   :  { %v7050_v62 = vpop.permute.xlu0 %2985 }
0x138d   :  { %v2981_v30 = vpop.permute.xlu1 %2980 }
0x138e   :  { %v4825_v39 = vadd.f32 %v4824_v14, %v2981_v30  ;;  %v4834_v4 = vadd.f32 %v4833_v50, %v2981_v30  ;;  %v4852_v30 = vadd.f32 %v4851_v51, %v7050_v62 }
0x138f   :  { %v7054_v21 = vpop.permute.xlu0 %2568 }
0x1391   :  { %v1725_v24 = vpop.permute.xlu1 %1724 }
0x1392   :  { %v4858_v41 = vadd.f32 %v4857_v17, %v1725_v24  ;;  %v4867_v43 = vadd.f32 %v4866_v15, %v1725_v24 }
0x1393   :  { %v2152_v60 = vpop.permute.xlu0 %2151 }
0x1395   :  { %v3399_v7 = vpop.permute.xlu1 %3398 }
0x1396   :  { %v4826_v23 = vadd.f32 %v4825_v39, %v3399_v7 }
0x1397   :  { %v2574_v33 = vpop.permute.xlu0 %2573 }
0x1399   :  { %v7048_v61 = vpop.permute.xlu1 %2146 }
0x139a   :  { %v4859_v46 = vadd.f32 %v4858_v41, %v7048_v61  ;;  %v4868_v47 = vadd.f32 %v4867_v43, %v7048_v61 }
0x139b   :  { %v2996_v56 = vpop.permute.xlu0 %2995 }
0x139c   :  { %v4860_v24 = vadd.f32 %v4859_v46, %v7054_v21  ;;  %v4869_v40 = vadd.f32 %v4868_v47, %v7054_v21  ;;  %v3785_v46 = vld [vmem:[%s7124_s8 + $0x8] sm:$0xff] }
0x139d   :  { %v1730_v20 = vpop.permute.xlu1 %1729 }
0x139e   :  { %v4876_v26 = vadd.f32 %v4875_v42, %v1730_v20  ;;  %v4885_v9 = vadd.f32 %v4884_v25, %v1730_v20 }
0x139f   :  { %v3795_v47 = vpop.permute.xlu0 %3794 }
0x13a0   :  { %v4886_v27 = vadd.f32 %v4885_v9, %v2152_v60 }
0x13a1   :  { %v3404_v57 = vpop.permute.xlu1 %3403 }
0x13a2   :  { %v4887_v20 = vadd.f32 %v4886_v27, %v2574_v33 }
0x13a5   :  { %v2991_v48 = vpop.permute.xlu1 %2990 }
0x13a6   :  { %v4861_v10 = vadd.f32 %v4860_v24, %v2991_v48 }
0x13a9   :  { %v3409_v49 = vpop.permute.xlu1 %3408 }
0x13aa   :  { %v4862_v28 = vadd.f32 %v4861_v10, %v3409_v49 }
0x13ad   :  { %v3414_v58 = vpop.permute.xlu1 %3413 }
0x1433   :  { %v3506_v45 = vpop.f32.mrb[56].mxu1 }
0x1434   :  { %v3507_v5 = vpop.f32.mrb[57].mxu1  ;;  %v4835_v45 = vadd.f32 %v4834_v4, %v3399_v7  ;;  %v4877_v7 = vadd.f32 %v4876_v26, %v2152_v60  ;;  %v3787_v26 = vld [vmem:[%s7124_s8 + $0x18] sm:$0xff] }
0x1435   :  { %v4843_v5 = vadd.f32 %v4842_v19, %v7050_v62  ;;  %v4870_v62 = vadd.f32 %v4869_v40, %v2991_v48 }
0x1436   :  { %v4878_v3 = vadd.f32 %v4877_v7, %v2574_v33 }
0x1437   :  { %v3510_v54 = vpop.f32.mrb[58].mxu1  ;;  %v4844_v1 = vadd.f32 %v4843_v5, %v3404_v57  ;;  %v4871_v8 = vadd.f32 %v4870_v62, %v3409_v49  ;;  %v3786_v5 = vld [vmem:[%s7124_s8 + $0x10] sm:$0xff]  ;;  %v3914_v62 = vld [vmem:[%s7126_s10 + $0x8] sm:$0xff] }
0x1438   :  { %v3511_v18 = vpop.f32.mrb[59].mxu1  ;;  %v4879_v34 = vadd.f32 %v4878_v3, %v2996_v56 }
0x1439   :  { %v4853_v18 = vadd.f32 %v4852_v30, %v3404_v57 }
0x143a   :  { %v4880_v63 = vadd.f32 %v4879_v34, %v3414_v58 }
0x143b   :  { %v3514_v6 = vpop.f32.mrb[60].mxu1 }
0x143c   :  { %v3515_v55 = vpop.f32.mrb[61].mxu1 }
0x143d   :  { %v4888_v55 = vadd.f32 %v4887_v20, %v2996_v56  ;;  %v3915_v20 = vld [vmem:[%s7126_s10 + $0x10] sm:$0xff] }
0x143f   :  { %v3518_v35 = vpop.f32.mrb[62].mxu1  ;;  %v4889_v31 = vadd.f32 %v4888_v55, %v3414_v58 }
0x1440   :  { %v3519_v0 = vpop.f32.mrb[63].mxu1 }
0x1443   :  { %v3522_v37 = vpop.f32.mrb[8].mxu1 }
0x1444   :  { %v4827_v54 = vadd.f32 %v4826_v23, %v3522_v37  ;;  %v3524_v38 = vpop.f32.mrb[9].mxu1 }
0x1445   :  { %v4836_v52 = vadd.f32 %v4835_v45, %v3524_v38  ;;  %v3800_v38 = vpop.permute.xlu1 %3799 }
0x1447   :  { %v3528_v59 = vpop.f32.mrb[10].mxu1  ;;  %3748 = vmatprep.mubr.f32.mxu0 %v4836_v52 }
0x1448   :  { %v4845_v12 = vadd.f32 %v4844_v1, %v3528_v59  ;;  %v3530_v61 = vpop.f32.mrb[11].mxu1  ;;  %3749 = vmatmul.mubr.f32.vlgmr.msra.gmra.mrb[80].mxu0 %v4827_v54  ;;  %v3913_v54 = vld [vmem:[%s7126_s10] sm:$0xff] }
0x1449   :  { %v4854_v6 = vadd.f32 %v4853_v18, %v3530_v61  ;;  %v3810_v1 = vpop.permute.xlu1 %3809  ;;  %v3805_v18 = vpop.permute.xlu0 %3804 }
0x144b   :  { %v3534_v13 = vpop.f32.mrb[12].mxu1  ;;  %3753 = vmatprep.mubr.f32.mxu0 %v4854_v6  ;;  %v3916_v6 = vld [vmem:[%s7126_s10 + $0x18] sm:$0xff]  ;;  %s5371_s10 = scalar_lea.vmem %s4048_s15, 512 }
0x144c   :  { %v4863_v21 = vadd.f32 %v4862_v28, %v3534_v13  ;;  %v3536_v57 = vpop.f32.mrb[13].mxu1  ;;  %3754 = vmatmul.mubr.f32.gmra.mrb[82].mxu0 %v4845_v12  ;;  %p5372_p0 = scmp.ne.s32.totalorder %s4048_s15, %s5371_s10  ;;  %p5377_p2 = scmp.lt.s32.totalorder %s5371_s10, %s5371_s10 }
0x144d   :  { %v4872_v60 = vadd.f32 %v4871_v8, %v3536_v57  ;;  %v3929_v28 = vpop.permute.xlu1 %3928  ;;  %v3924_v34 = vpop.permute.xlu0 %3923 }
0x144e   :  { %p5378_p3 = por %p5377_p2, %p5376_p1 }
0x144f   :  { %v3540_v44 = vpop.f32.mrb[14].mxu1  ;;  %3758 = vmatprep.mubr.f32.mxu0 %v4872_v60 }
0x1450   :  { %v4881_v14 = vadd.f32 %v4880_v63, %v3540_v44  ;;  %v3542_v22 = vpop.f32.mrb[15].mxu1  ;;  %3759 = vmatmul.mubr.f32.gmra.mrb[84].mxu0 %v4863_v21  ;;  %p5379_p4 = pnand %p5378_p3, %p5372_p0 }
0x1451   :  { %v4890_v2 = vadd.f32 %v4889_v31, %v3542_v22  ;;  %v3939_v21 = vpop.permute.xlu1 %3938  ;;  %v3934_v60 = vpop.permute.xlu0 %3933 }
0x1453   :  { %3763 = vmatprep.mubr.f32.mxu0 %v4890_v2 }
0x1454   :  { %3764 = vmatmul.mubr.f32.gmra.mrb[86].mxu0 %v4881_v14 }
0x1455   :  { %4527 = vmatprep.mubr.msk.f32.mxu0 %vm456_vm6, %v3784_v32 }
0x151b   :  { %v4491_v50 = vpop.f32.mrb[80].mxu0 }
0x151c   :  { %v4492_v36 = vpop.f32.mrb[81].mxu0 }
0x151d   :  { %v4493_v48 = vadd.f32 %v4492_v36, %v4491_v50 }
0x151f   :  { %v4494_v35 = vpop.f32.mrb[82].mxu0  ;;  %v3769_v53 = vmax.f32 %v4493_v48, 0.0 }
0x1520   :  { %v4495_v17 = vpop.f32.mrb[83].mxu0 }
0x1521   :  { %v4496_v39 = vadd.f32 %v4495_v17, %v4494_v35  ;;  %v3780_v4 = vadd.f32 %v4450_v16, %v3769_v53 }
0x1523   :  { %v3770_v0 = vmax.f32 %v4496_v39, 0.0  ;;  %v4497_v15 = vpop.f32.mrb[84].mxu0 }
0x1524   :  { %v4498_v11 = vpop.f32.mrb[85].mxu0 }
0x1525   :  { %v3781_v29 = vadd.f32 %v4450_v16, %v3770_v0  ;;  %v4499_v33 = vadd.f32 %v4498_v11, %v4497_v15 }
0x1527   :  { %v4500_v41 = vpop.f32.mrb[86].mxu0  ;;  %v4803_v19 = vpack.c.bf16 %v3781_v29, %v3780_v4  ;;  %v3771_v42 = vmax.f32 %v4499_v33, 0.0 }
0x1528   :  { %v4501_v23 = vpop.f32.mrb[87].mxu0 }
0x1529   :  { %v4502_v43 = vadd.f32 %v4501_v23, %v4500_v41  ;;  %4804 = vmatprep.subr.bf16.mxu0 %v4803_v19  ;;  %v3782_v45 = vadd.f32 %v4450_v16, %v3771_v42 }
0x152a   :  { %4806 = vmatpush3.bf16.msra.mxu0 %v4803_v19 }
0x152b   :  { %v3772_v51 = vmax.f32 %v4502_v43, 0.0 }
0x152d   :  { %v3783_v25 = vadd.f32 %v4450_v16, %v3772_v51 }
0x152f   :  { %v4807_v37 = vpack.c.bf16 %v3783_v25, %v3782_v45 }
0x1531   :  { %4808 = vmatprep.subr.bf16.mxu0 %v4807_v37 }
0x1532   :  { %4810 = vmatpush3.bf16.msra.mxu0 %v4807_v37 }
0x1535   :  { %4528 = vmatmul.mubr.msk.f32.vlgmr.msra.gmra.mrb[88].mxu0 %vm456_vm6, %v3785_v46 }
0x1536   :  { %4530 = vmatprep.mubr.msk.f32.mxu0 %vm456_vm6, %v3786_v5 }
0x1539   :  { %4531 = vmatmul.mubr.msk.f32.gmra.mrb[90].mxu0 %vm456_vm6, %v3787_v26 }
0x153a   :  { %4541 = vmatprep.mubr.msk.f32.mxu0 %vm456_vm6, %v3913_v54 }
0x1608   :  { %v4529_v30 = vpop.f32.mrb[88].mxu0 }
0x1609   :  { %v3896_v9 = vadd.f32 %v4529_v30, %v3800_v38  ;;  %v3890_v49 = vpop.f32.mrb[89].mxu0 }
0x160a   :  { %v3891_v52 = vadd.f32 %v3890_v49, %v3795_v47 }
0x160b   :  { %v3910_v24 = vmax.f32 %v3896_v9, 0.0 }
0x160c   :  { %v3909_v7 = vmax.f32 %v3891_v52, 0.0  ;;  %v4532_v40 = vpop.f32.mrb[90].mxu0 }
0x160d   :  { %v3906_v27 = vadd.f32 %v4532_v40, %v3810_v1  ;;  %v3900_v56 = vpop.f32.mrb[91].mxu0 }
0x160e   :  { %v4811_v59 = vpack.c.bf16 %v3910_v24, %v3909_v7  ;;  %v3901_v10 = vadd.f32 %v3900_v56, %v3805_v18 }
0x160f   :  { %v3912_v3 = vmax.f32 %v3906_v27, 0.0 }
0x1610   :  { %v3911_v12 = vmax.f32 %v3901_v10, 0.0  ;;  %4812 = vmatprep.subr.bf16.mxu0 %v4811_v59 }
0x1611   :  { %4814 = vmatpush3.bf16.msra.mxu0 %v4811_v59 }
0x1612   :  { %v4815_v61 = vpack.c.bf16 %v3912_v3, %v3911_v12 }
0x1614   :  { %4816 = vmatprep.subr.bf16.mxu0 %v4815_v61 }
0x1615   :  { %4818 = vmatpush3.bf16.msra.mxu0 %v4815_v61 }
0x1618   :  { %4542 = vmatmul.mubr.msk.f32.vlgmr.msra.gmra.mrb[92].mxu0 %vm456_vm6, %v3914_v62 }
0x1619   :  { %4544 = vmatprep.mubr.msk.f32.mxu0 %vm456_vm6, %v3915_v20 }
0x161c   :  { %4545 = vmatmul.mubr.msk.f32.gmra.mrb[94].mxu0 %vm456_vm6, %v3916_v6 }
0x16eb   :  { %v4543_v8 = vpop.f32.mrb[92].mxu0 }
0x16ec   :  { %v4025_v55 = vadd.f32 %v4543_v8, %v3929_v28  ;;  %v4019_v58 = vpop.f32.mrb[93].mxu0 }
0x16ed   :  { %v4020_v13 = vadd.f32 %v4019_v58, %v3924_v34 }
0x16ee   :  { %4039 = vst [vmem:[#allocation2 + $0x8] sm:$0xff] %v4025_v55 }
0x16ef   :  { %4038 = vst [vmem:[#allocation2] sm:$0xff] %v4020_v13  ;;  %v4546_v57 = vpop.f32.mrb[94].mxu0 }
0x16f0   :  { %v4035_v63 = vadd.f32 %v4546_v57, %v3939_v21  ;;  %v4029_v31 = vpop.f32.mrb[95].mxu0 }
0x16f1   :  { %v4030_v44 = vadd.f32 %v4029_v31, %v3934_v60 }
0x16f2   :  { %4041 = vst [vmem:[#allocation2 + $0x18] sm:$0xff] %v4035_v63 }
0x16f3   :  { %4040 = vst [vmem:[#allocation2 + $0x10] sm:$0xff] %v4030_v44 }
0x16f4   :  { %5382 = shalt.err (!%p5379_p4)
}
0x16f5   :  { %s5383_s11 = scalar_lea.hbm %s7128_s12, 512 }
0x16f6   :  { %p5384_p5 = scmp.ne.s32.totalorder %s7128_s12, %s5383_s11  ;;  %p5387_p6 = scmp.lt.u32.totalorder %s5383_s11, %s7128_s12 }
0x16f8   :  { %p5389_p7 = pnand %p5387_p6, %p5384_p5 }
0x16fa   :  { %5392 = shalt.err (!%p5389_p7)
}
0x16fb   :  { %s5404_s20 = smov 128  }
0x16fc   :  { %4053 = dma.vmem_to_hbm [thread:$0]  %s4048_s15, 512, %s7128_s12, [#allocation3], %s5404_s20, %s5404_s20, %s5401_s0  }
0x16fd   :  { %5393 = dma.done.wait [#allocation3], 512  }
0x16fe   :  { %5394 = vsyncadd [#allocation3], 4294966784 }
0x16ff   :  { %4057 = vsyncpa [#allocation3], 1 }

</bundles_post_ra>
